<compile_context>
chip_gen: v7x
topology: tpu7x:2x2x1
jax: 0.10.0
libtpu: 0.0.40
codegen_flags: <defaults>
</compile_context>

<pallas_src>
import numpy as np
import jax
import jax.numpy as jnp
from jax.experimental import pallas as pl
from jax.experimental.pallas import tpu as pltpu

NEG_INF = -1e9      # additive mask for non-edges (f32 softmax -> exp underflows to exact 0)
HEAD_PAD = 8        # dst / src logit columns each padded to 8 -> packed projection width 16
LANE = 128          # layer-2 output feature width padded to full lane width
NODE_PAD = 128      # node axis padded to lane width (lane-dense [N,N] softmax / aggregation)


def _use_bf16_softmax():
    """Use the bf16 EUP/VPU softmax path only on chips that have it (v6e / v7x)."""
    try:
        kind = jax.devices()[0].device_kind.lower()
    except Exception:
        return False
    return ("v6" in kind) or ("v7" in kind)


# ----------------------------------------------------------------------------
# Fused 2-layer GAT kernel
# ----------------------------------------------------------------------------
def make_fused_gat_kernel(heads1, fout1, fout2_padded, softmax_bf16):
    """Fused GAT: layer1 (heads1 x fout1, concat, ReLU) -> layer2 (1 x fout2_padded)."""

    def softmax_rows(e):
        # e: [N, N] f32 with mask bias already added.  Row-max + denom stay f32
        # (stability); exp / alpha go bf16 on chips with a bf16 EUP/VPU path.
        e = e - jnp.max(e, axis=1, keepdims=True)
        if softmax_bf16:
            p = jnp.exp(e.astype(jnp.bfloat16))                            # bf16 EUP exp
            denom = jnp.sum(p, axis=1, keepdims=True, dtype=jnp.float32)   # f32 denom
            inv = pl.reciprocal(jnp.maximum(denom, 1e-6), approx=True)     # EUP recip
            return p * inv.astype(jnp.bfloat16)                            # bf16 alpha
        p = jnp.exp(e)                                                     # f32 (v5e path)
        denom = jnp.maximum(jnp.sum(p, axis=1, keepdims=True), 1e-6)
        return (p * pl.reciprocal(denom, approx=True)).astype(jnp.bfloat16)

    def kernel(x_ref, mask_ref, w1_ref, a1_ref, b1_ref,
               w2_ref, a2_ref, b2_ref, out_ref, h1_ref):
        # Precomputed additive mask bias: 0 on edges, -1e9 elsewhere (incl. padding).
        mask_bias = mask_ref[...]                                          # [N, N] f32

        # ---------------- Layer 1: heads1 x fout1, concat, ReLU ----------------
        h1 = jnp.dot(x_ref[...], w1_ref[...], preferred_element_type=jnp.float32)
        h1b = h1.astype(jnp.bfloat16)
        # One bf16 matmul produces dst+src logits for ALL heads: [N, 2*HEAD_PAD].
        proj1 = jnp.dot(h1b, a1_ref[...], preferred_element_type=jnp.float32)
        src1 = jnp.transpose(proj1[:, HEAD_PAD:])                          # [HEAD_PAD, N]

        # Static unroll over heads (heads1 is tiny); each head writes its lane slice
        # of the bf16 layer-1 accumulator scratch -> no jnp.concatenate relayouts.
        for hd in range(heads1):
            e = proj1[:, hd:hd + 1] + src1[hd:hd + 1, :]                   # [N, N]
            e = jnp.maximum(e, 0.2 * e) + mask_bias                        # LeakyReLU+mask
            alpha = softmax_rows(e)                                        # bf16 [N, N]
            out_h = jnp.dot(alpha, h1b[:, hd * fout1:(hd + 1) * fout1],
                            preferred_element_type=jnp.float32)            # [N, fout1]
            out_h = jnp.maximum(out_h + b1_ref[:, hd * fout1:(hd + 1) * fout1], 0.0)
            h1_ref[:, hd * fout1:(hd + 1) * fout1] = out_h.astype(jnp.bfloat16)

        # --------- Layer 2: 1 head, concat=False (mean == identity), padded -----
        h2 = jnp.dot(h1_ref[...], w2_ref[...], preferred_element_type=jnp.float32)
        h2b = h2.astype(jnp.bfloat16)
        proj2 = jnp.dot(h2b, a2_ref[...], preferred_element_type=jnp.float32)
        src2 = jnp.transpose(proj2[:, HEAD_PAD:HEAD_PAD + 1])              # [1, N]
        e = proj2[:, 0:1] + src2
        e = jnp.maximum(e, 0.2 * e) + mask_bias
        alpha = softmax_rows(e)
        out2 = jnp.dot(alpha, h2b, preferred_element_type=jnp.float32)     # [N, 128]
        out_ref[...] = out2 + b2_ref[...]              # full 128-lane dense f32 store

    return kernel


# ----------------------------------------------------------------------------
# Wrapper: parameter packing + pallas_call
# ----------------------------------------------------------------------------
def _pack_attention(att_src, att_dst, heads, fout):
    """Pack [att_dst | att_src] of all heads into ONE block matrix so a single
    hb @ A (bf16) produces every per-head dst/src attention logit."""
    assert heads <= HEAD_PAD
    att_src = np.asarray(att_src, np.float32)
    att_dst = np.asarray(att_dst, np.float32)
    hf = heads * fout
    a = np.zeros((hf, 2 * HEAD_PAD), np.float32)
    for hd in range(heads):
        a[hd * fout:(hd + 1) * fout, hd] = att_dst[hd]                 # dst cols 0..heads
        a[hd * fout:(hd + 1) * fout, HEAD_PAD + hd] = att_src[hd]      # src cols 8..8+heads
    return a


def _pad_cols(a, width):
    a = np.asarray(a, np.float32)
    out = np.zeros((a.shape[0], width), np.float32)
    out[:, :a.shape[1]] = a
    return out


def gat_schema_linker_forward(params, x, adj, *, hidden_dim, num_heads):
    n = x.shape[0]
    n_pad = max(NODE_PAD, ((n + NODE_PAD - 1) // NODE_PAD) * NODE_PAD)   # lane-dense N
    f2p = LANE                                                           # padded layer-2 width

    # Node features (bf16) padded with zero rows.
    x_p = jnp.zeros((n_pad, x.shape[1]), jnp.bfloat16).at[:n, :].set(x.astype(jnp.bfloat16))

    # Precomputed f32 additive mask bias (0 on edges / -1e9 off-edges & padding).
    adj_f = jnp.asarray(adj, jnp.float32)
    mask_bias = jnp.full((n_pad, n_pad), NEG_INF, jnp.float32)
    mask_bias = mask_bias.at[:n, :n].set(jnp.where(adj_f > 0, 0.0, NEG_INF))

    # Layer-1 params (bf16 weights, packed bf16 attention matrix, f32 bias).
    w1 = jnp.asarray(params["w1"], jnp.float32).astype(jnp.bfloat16)
    a1 = jnp.asarray(_pack_attention(params["att_src1"], params["att_dst1"],
                                     num_heads, hidden_dim)).astype(jnp.bfloat16)
    b1 = jnp.asarray(params["bias1"], jnp.float32)

    # Layer-2 params, feature width zero-padded to 128 for lane-dense output stores.
    w2 = jnp.asarray(_pad_cols(params["w2"], f2p)).astype(jnp.bfloat16)
    a2 = jnp.asarray(_pack_attention(_pad_cols(params["att_src2"], f2p),
                                     _pad_cols(params["att_dst2"], f2p),
                                     1, f2p)).astype(jnp.bfloat16)
    b2 = jnp.asarray(_pad_cols(params["bias2"], f2p))

    kernel = make_fused_gat_kernel(num_heads, hidden_dim, f2p, _use_bf16_softmax())
    vm = pl.BlockSpec(memory_space=pltpu.MemorySpace.VMEM)
    out_pad = pl.pallas_call(
        kernel,
        out_shape=jax.ShapeDtypeStruct((n_pad, f2p), jnp.float32),
        in_specs=[vm] * 8,
        out_specs=vm,
        scratch_shapes=[pltpu.VMEM((n_pad, num_heads * hidden_dim), jnp.bfloat16)],
        compiler_params=pltpu.CompilerParams(vmem_limit_bytes=32 * 1024 * 1024),
    )(x_p, mask_bias, w1, a1, b1, w2, a2, b2)

    return out_pad[:n, :hidden_dim]


# ----------------------------------------------------------------------------
# Parameters
# ----------------------------------------------------------------------------
def glorot(key, shape):
    fan_in, fan_out = shape[0], shape[-1]
    limit = float(np.sqrt(6.0 / (fan_in + fan_out)))
    return jax.random.uniform(key, shape, jnp.float32, -limit, limit)


def init_params(key, input_dim, hidden_dim, num_heads):
    ks = jax.random.split(key, 6)
    return {
        # gat1: in=input_dim, out=hidden_dim, heads=num_heads, concat=True
        "w1": glorot(ks[0], (input_dim, num_heads * hidden_dim)),
        "att_src1": glorot(ks[1], (num_heads, hidden_dim)),
        "att_dst1": glorot(ks[2], (num_heads, hidden_dim)),
        "bias1": jnp.zeros((1, num_heads * hidden_dim), jnp.float32),
        # gat2: in=hidden_dim*num_heads, out=hidden_dim, heads=1, concat=False
        "w2": glorot(ks[3], (num_heads * hidden_dim, hidden_dim)),
        "att_src2": glorot(ks[4], (1, hidden_dim)),
        "att_dst2": glorot(ks[5], (1, hidden_dim)),
        "bias2": jnp.zeros((1, hidden_dim), jnp.float32),
    }


# ----------------------------------------------------------------------------
# Pure-JAX f32 reference (dense GAT math) for correctness checking.
# ----------------------------------------------------------------------------
def gat_layer_ref(x, adj, w, att_src, att_dst, bias, num_heads, out_dim,
                  concat, apply_relu):
    n = x.shape[0]
    h = x @ w
    h3 = h.reshape(n, num_heads, out_dim)
    a_src = jnp.einsum("nhf,hf->nh", h3, att_src)
    a_dst = jnp.einsum("nhf,hf->nh", h3, att_dst)
    e = a_dst[:, None, :] + a_src[None, :, :]            # [dst, src, H]
    e = jnp.where(e > 0, e, 0.2 * e)
    mask = adj[:, :, None] > 0
    e = jnp.where(mask, e, NEG_INF)
    e = e - e.max(axis=1, keepdims=True)
    p = jnp.where(mask, jnp.exp(e), 0.0)
    alpha = p / p.sum(axis=1, keepdims=True)
    out3 = jnp.einsum("ijh,jhf->ihf", alpha, h3)
    out = out3.reshape(n, num_heads * out_dim) if concat else out3.mean(axis=1)
    out = out + bias.reshape(-1)
    if apply_relu:
        out = jnp.maximum(out, 0.0)
    return out


def forward_ref(params, x, adj, *, hidden_dim, num_heads):
    h = gat_layer_ref(x, adj, params["w1"], params["att_src1"],
                      params["att_dst1"], params["bias1"],
                      num_heads, hidden_dim, True, True)
    return gat_layer_ref(h, adj, params["w2"], params["att_src2"],
                         params["att_dst2"], params["bias2"],
                         1, hidden_dim, False, False)


if __name__ == "__main__":
    N, INPUT_DIM, HIDDEN_DIM, NUM_HEADS = 16, 8, 16, 4

    key = jax.random.PRNGKey(0)
    k_x, k_p = jax.random.split(key)

    # Node features (data.x)
    x = jax.random.normal(k_x, (N, INPUT_DIM), dtype=jnp.float32)

    # Deterministic graph (data.edge_index): bidirectional ring, [2, E] src/dst.
    src = np.arange(N)
    dst = (np.arange(N) + 1) % N
    edge_index = np.stack(
        [np.concatenate([src, dst]), np.concatenate([dst, src])], axis=0
    ).astype(np.int32)

    # Densify edge_index -> adjacency mask adj[dst, src], with self-loops (PyG default).
    adj_np = np.zeros((N, N), np.float32)
    adj_np[edge_index[1], edge_index[0]] = 1.0
    np.fill_diagonal(adj_np, 1.0)
    adj = jnp.asarray(adj_np)

    params = init_params(k_p, INPUT_DIM, HIDDEN_DIM, NUM_HEADS)

    out = gat_schema_linker_forward(params, x, adj,
                                    hidden_dim=HIDDEN_DIM, num_heads=NUM_HEADS)
    out = jax.block_until_ready(out)

    ref = jax.block_until_ready(
        forward_ref(params, x, adj, hidden_dim=HIDDEN_DIM, num_heads=NUM_HEADS))

    assert out.shape == (N, HIDDEN_DIM), out.shape
    # Tolerance accounts for bf16 MXU inputs (features, attention projections,
    # aggregation), the optional bf16 exp path, and the approximate EUP reciprocal;
    # the reference is pure f32.  A semantic bug diverges by orders of magnitude.
    assert np.allclose(np.asarray(out), np.asarray(ref), rtol=5e-2, atol=1e-1), (
        "Pallas output diverges from reference")

    print("KERNEL_OK")
</pallas_src>

<mosaic_0001>
module attributes {stable_mosaic.version = 11 : i64} {
  func.func @kernel(%arg0: memref<128x8xbf16, #tpu.memory_space<vmem>>, %arg1: memref<128x128xf32, #tpu.memory_space<vmem>>, %arg2: memref<8x64xbf16, #tpu.memory_space<vmem>>, %arg3: memref<64x16xbf16, #tpu.memory_space<vmem>>, %arg4: memref<1x64xf32, #tpu.memory_space<vmem>>, %arg5: memref<64x128xbf16, #tpu.memory_space<vmem>>, %arg6: memref<128x16xbf16, #tpu.memory_space<vmem>>, %arg7: memref<1x128xf32, #tpu.memory_space<vmem>>, %arg8: memref<128x128xf32, #tpu.memory_space<vmem>>, %arg9: memref<128x64xbf16, #tpu.memory_space<vmem>>) attributes {dimension_semantics = [], scalar_prefetch = 0 : i64, scratch_operands = 1 : i64, tpu.core_type = #tpu.core_type<tc>} {
    %c0 = arith.constant 0 : index
    %c0_0 = arith.constant 0 : index
    %0 = vector.load %arg1[%c0, %c0_0] : memref<128x128xf32, #tpu.memory_space<vmem>>, vector<128x128xf32>
    %c0_1 = arith.constant 0 : index
    %c0_2 = arith.constant 0 : index
    %1 = vector.load %arg0[%c0_1, %c0_2] : memref<128x8xbf16, #tpu.memory_space<vmem>>, vector<128x8xbf16>
    %c0_3 = arith.constant 0 : index
    %c0_4 = arith.constant 0 : index
    %2 = vector.load %arg2[%c0_3, %c0_4] : memref<8x64xbf16, #tpu.memory_space<vmem>>, vector<8x64xbf16>
    %cst = arith.constant dense<0.000000e+00> : vector<128x64xf32>
    %3 = tpu.matmul %1, %2, %cst {dimension_numbers = #tpu.dot_dimension_numbers<[1], [0], [0], [1], [0, 0, 1, 1], [], []>} : vector<128x8xbf16>, vector<8x64xbf16>, vector<128x64xf32> -> vector<128x64xf32>
    %4 = arith.truncf %3 : vector<128x64xf32> to vector<128x64xbf16>
    %c0_5 = arith.constant 0 : index
    %c0_6 = arith.constant 0 : index
    %5 = vector.load %arg3[%c0_5, %c0_6] : memref<64x16xbf16, #tpu.memory_space<vmem>>, vector<64x16xbf16>
    %cst_7 = arith.constant dense<0.000000e+00> : vector<128x16xf32>
    %6 = tpu.matmul %4, %5, %cst_7 {dimension_numbers = #tpu.dot_dimension_numbers<[1], [0], [0], [1], [0, 0, 1, 1], [], []>} : vector<128x64xbf16>, vector<64x16xbf16>, vector<128x16xf32> -> vector<128x16xf32>
    %7 = vector.extract_strided_slice %6 {offsets = [0, 8], sizes = [128, 8], strides = [1, 1]} : vector<128x16xf32> to vector<128x8xf32>
    %8 = tpu.transpose %7, [1, 0] : vector<128x8xf32> -> vector<8x128xf32>
    %9 = vector.extract_strided_slice %6 {offsets = [0, 0], sizes = [128, 1], strides = [1, 1]} : vector<128x16xf32> to vector<128x1xf32>
    %10 = vector.extract_strided_slice %8 {offsets = [0, 0], sizes = [1, 128], strides = [1, 1]} : vector<8x128xf32> to vector<1x128xf32>
    %11 = vector.broadcast %9 : vector<128x1xf32> to vector<128x128xf32>
    %12 = vector.broadcast %10 : vector<1x128xf32> to vector<128x128xf32>
    %13 = arith.addf %11, %12 : vector<128x128xf32>
    %cst_8 = arith.constant 2.000000e-01 : f32
    %14 = vector.broadcast %cst_8 : f32 to vector<128x128xf32>
    %15 = arith.mulf %14, %13 : vector<128x128xf32>
    %16 = arith.maximumf %13, %15 : vector<128x128xf32>
    %17 = arith.addf %16, %0 : vector<128x128xf32>
    %cst_9 = arith.constant dense<0xFF800000> : vector<128xf32>
    %18 = vector.multi_reduction <maximumf>, %17, %cst_9 [1] : vector<128x128xf32> to vector<128xf32>
    %19 = vector.shape_cast %18 : vector<128xf32> to vector<128x1xf32>
    %20 = vector.broadcast %19 : vector<128x1xf32> to vector<128x128xf32>
    %21 = arith.subf %17, %20 : vector<128x128xf32>
    %22 = math.exp %21 : vector<128x128xf32>
    %cst_10 = arith.constant dense<0.000000e+00> : vector<128xf32>
    %23 = vector.multi_reduction <add>, %22, %cst_10 [1] : vector<128x128xf32> to vector<128xf32>
    %24 = vector.shape_cast %23 : vector<128xf32> to vector<128x1xf32>
    %cst_11 = arith.constant 9.99999997E-7 : f32
    %25 = vector.broadcast %cst_11 : f32 to vector<128x1xf32>
    %26 = arith.maximumf %24, %25 : vector<128x1xf32>
    %27 = tpu.reciprocal %26 {approx = true} : vector<128x1xf32> -> vector<128x1xf32>
    %28 = vector.broadcast %27 : vector<128x1xf32> to vector<128x128xf32>
    %29 = arith.mulf %22, %28 : vector<128x128xf32>
    %30 = arith.truncf %29 : vector<128x128xf32> to vector<128x128xbf16>
    %31 = vector.extract_strided_slice %4 {offsets = [0, 0], sizes = [128, 16], strides = [1, 1]} : vector<128x64xbf16> to vector<128x16xbf16>
    %cst_12 = arith.constant dense<0.000000e+00> : vector<128x16xf32>
    %32 = tpu.matmul %30, %31, %cst_12 {dimension_numbers = #tpu.dot_dimension_numbers<[1], [0], [0], [1], [0, 0, 1, 1], [], []>} : vector<128x128xbf16>, vector<128x16xbf16>, vector<128x16xf32> -> vector<128x16xf32>
    %c0_13 = arith.constant 0 : index
    %c0_14 = arith.constant 0 : index
    %33 = vector.load %arg4[%c0_13, %c0_14] : memref<1x64xf32, #tpu.memory_space<vmem>>, vector<1x16xf32>
    %34 = vector.broadcast %33 : vector<1x16xf32> to vector<128x16xf32>
    %35 = arith.addf %32, %34 : vector<128x16xf32>
    %cst_15 = arith.constant 0.000000e+00 : f32
    %36 = vector.broadcast %cst_15 : f32 to vector<128x16xf32>
    %37 = arith.maximumf %35, %36 : vector<128x16xf32>
    %38 = arith.truncf %37 : vector<128x16xf32> to vector<128x16xbf16>
    %c0_16 = arith.constant 0 : index
    %c0_17 = arith.constant 0 : index
    %39 = vector.load %arg9[%c0_16, %c0_17] : memref<128x64xbf16, #tpu.memory_space<vmem>>, vector<128x16xbf16>
    tpu.vector_store %arg9[%c0_16, %c0_17], %38 {strides = array<i32>} : memref<128x64xbf16, #tpu.memory_space<vmem>>, vector<128x16xbf16>,
    %40 = vector.extract_strided_slice %6 {offsets = [0, 1], sizes = [128, 1], strides = [1, 1]} : vector<128x16xf32> to vector<128x1xf32>
    %41 = vector.extract_strided_slice %8 {offsets = [1, 0], sizes = [1, 128], strides = [1, 1]} : vector<8x128xf32> to vector<1x128xf32>
    %42 = vector.broadcast %40 : vector<128x1xf32> to vector<128x128xf32>
    %43 = vector.broadcast %41 : vector<1x128xf32> to vector<128x128xf32>
    %44 = arith.addf %42, %43 : vector<128x128xf32>
    %cst_18 = arith.constant 2.000000e-01 : f32
    %45 = vector.broadcast %cst_18 : f32 to vector<128x128xf32>
    %46 = arith.mulf %45, %44 : vector<128x128xf32>
    %47 = arith.maximumf %44, %46 : vector<128x128xf32>
    %48 = arith.addf %47, %0 : vector<128x128xf32>
    %cst_19 = arith.constant dense<0xFF800000> : vector<128xf32>
    %49 = vector.multi_reduction <maximumf>, %48, %cst_19 [1] : vector<128x128xf32> to vector<128xf32>
    %50 = vector.shape_cast %49 : vector<128xf32> to vector<128x1xf32>
    %51 = vector.broadcast %50 : vector<128x1xf32> to vector<128x128xf32>
    %52 = arith.subf %48, %51 : vector<128x128xf32>
    %53 = math.exp %52 : vector<128x128xf32>
    %cst_20 = arith.constant dense<0.000000e+00> : vector<128xf32>
    %54 = vector.multi_reduction <add>, %53, %cst_20 [1] : vector<128x128xf32> to vector<128xf32>
    %55 = vector.shape_cast %54 : vector<128xf32> to vector<128x1xf32>
    %cst_21 = arith.constant 9.99999997E-7 : f32
    %56 = vector.broadcast %cst_21 : f32 to vector<128x1xf32>
    %57 = arith.maximumf %55, %56 : vector<128x1xf32>
    %58 = tpu.reciprocal %57 {approx = true} : vector<128x1xf32> -> vector<128x1xf32>
    %59 = vector.broadcast %58 : vector<128x1xf32> to vector<128x128xf32>
    %60 = arith.mulf %53, %59 : vector<128x128xf32>
    %61 = arith.truncf %60 : vector<128x128xf32> to vector<128x128xbf16>
    %62 = vector.extract_strided_slice %4 {offsets = [0, 16], sizes = [128, 16], strides = [1, 1]} : vector<128x64xbf16> to vector<128x16xbf16>
    %cst_22 = arith.constant dense<0.000000e+00> : vector<128x16xf32>
    %63 = tpu.matmul %61, %62, %cst_22 {dimension_numbers = #tpu.dot_dimension_numbers<[1], [0], [0], [1], [0, 0, 1, 1], [], []>} : vector<128x128xbf16>, vector<128x16xbf16>, vector<128x16xf32> -> vector<128x16xf32>
    %c0_23 = arith.constant 0 : index
    %c16 = arith.constant 16 : index
    %64 = vector.load %arg4[%c0_23, %c16] : memref<1x64xf32, #tpu.memory_space<vmem>>, vector<1x16xf32>
    %65 = vector.broadcast %64 : vector<1x16xf32> to vector<128x16xf32>
    %66 = arith.addf %63, %65 : vector<128x16xf32>
    %cst_24 = arith.constant 0.000000e+00 : f32
    %67 = vector.broadcast %cst_24 : f32 to vector<128x16xf32>
    %68 = arith.maximumf %66, %67 : vector<128x16xf32>
    %69 = arith.truncf %68 : vector<128x16xf32> to vector<128x16xbf16>
    %c0_25 = arith.constant 0 : index
    %c16_26 = arith.constant 16 : index
    %70 = vector.load %arg9[%c0_25, %c16_26] : memref<128x64xbf16, #tpu.memory_space<vmem>>, vector<128x16xbf16>
    tpu.vector_store %arg9[%c0_25, %c16_26], %69 {strides = array<i32>} : memref<128x64xbf16, #tpu.memory_space<vmem>>, vector<128x16xbf16>,
    %71 = vector.extract_strided_slice %6 {offsets = [0, 2], sizes = [128, 1], strides = [1, 1]} : vector<128x16xf32> to vector<128x1xf32>
    %72 = vector.extract_strided_slice %8 {offsets = [2, 0], sizes = [1, 128], strides = [1, 1]} : vector<8x128xf32> to vector<1x128xf32>
    %73 = vector.broadcast %71 : vector<128x1xf32> to vector<128x128xf32>
    %74 = vector.broadcast %72 : vector<1x128xf32> to vector<128x128xf32>
    %75 = arith.addf %73, %74 : vector<128x128xf32>
    %cst_27 = arith.constant 2.000000e-01 : f32
    %76 = vector.broadcast %cst_27 : f32 to vector<128x128xf32>
    %77 = arith.mulf %76, %75 : vector<128x128xf32>
    %78 = arith.maximumf %75, %77 : vector<128x128xf32>
    %79 = arith.addf %78, %0 : vector<128x128xf32>
    %cst_28 = arith.constant dense<0xFF800000> : vector<128xf32>
    %80 = vector.multi_reduction <maximumf>, %79, %cst_28 [1] : vector<128x128xf32> to vector<128xf32>
    %81 = vector.shape_cast %80 : vector<128xf32> to vector<128x1xf32>
    %82 = vector.broadcast %81 : vector<128x1xf32> to vector<128x128xf32>
    %83 = arith.subf %79, %82 : vector<128x128xf32>
    %84 = math.exp %83 : vector<128x128xf32>
    %cst_29 = arith.constant dense<0.000000e+00> : vector<128xf32>
    %85 = vector.multi_reduction <add>, %84, %cst_29 [1] : vector<128x128xf32> to vector<128xf32>
    %86 = vector.shape_cast %85 : vector<128xf32> to vector<128x1xf32>
    %cst_30 = arith.constant 9.99999997E-7 : f32
    %87 = vector.broadcast %cst_30 : f32 to vector<128x1xf32>
    %88 = arith.maximumf %86, %87 : vector<128x1xf32>
    %89 = tpu.reciprocal %88 {approx = true} : vector<128x1xf32> -> vector<128x1xf32>
    %90 = vector.broadcast %89 : vector<128x1xf32> to vector<128x128xf32>
    %91 = arith.mulf %84, %90 : vector<128x128xf32>
    %92 = arith.truncf %91 : vector<128x128xf32> to vector<128x128xbf16>
    %93 = vector.extract_strided_slice %4 {offsets = [0, 32], sizes = [128, 16], strides = [1, 1]} : vector<128x64xbf16> to vector<128x16xbf16>
    %cst_31 = arith.constant dense<0.000000e+00> : vector<128x16xf32>
    %94 = tpu.matmul %92, %93, %cst_31 {dimension_numbers = #tpu.dot_dimension_numbers<[1], [0], [0], [1], [0, 0, 1, 1], [], []>} : vector<128x128xbf16>, vector<128x16xbf16>, vector<128x16xf32> -> vector<128x16xf32>
    %c0_32 = arith.constant 0 : index
    %c32 = arith.constant 32 : index
    %95 = vector.load %arg4[%c0_32, %c32] : memref<1x64xf32, #tpu.memory_space<vmem>>, vector<1x16xf32>
    %96 = vector.broadcast %95 : vector<1x16xf32> to vector<128x16xf32>
    %97 = arith.addf %94, %96 : vector<128x16xf32>
    %cst_33 = arith.constant 0.000000e+00 : f32
    %98 = vector.broadcast %cst_33 : f32 to vector<128x16xf32>
    %99 = arith.maximumf %97, %98 : vector<128x16xf32>
    %100 = arith.truncf %99 : vector<128x16xf32> to vector<128x16xbf16>
    %c0_34 = arith.constant 0 : index
    %c32_35 = arith.constant 32 : index
    %101 = vector.load %arg9[%c0_34, %c32_35] : memref<128x64xbf16, #tpu.memory_space<vmem>>, vector<128x16xbf16>
    tpu.vector_store %arg9[%c0_34, %c32_35], %100 {strides = array<i32>} : memref<128x64xbf16, #tpu.memory_space<vmem>>, vector<128x16xbf16>,
    %102 = vector.extract_strided_slice %6 {offsets = [0, 3], sizes = [128, 1], strides = [1, 1]} : vector<128x16xf32> to vector<128x1xf32>
    %103 = vector.extract_strided_slice %8 {offsets = [3, 0], sizes = [1, 128], strides = [1, 1]} : vector<8x128xf32> to vector<1x128xf32>
    %104 = vector.broadcast %102 : vector<128x1xf32> to vector<128x128xf32>
    %105 = vector.broadcast %103 : vector<1x128xf32> to vector<128x128xf32>
    %106 = arith.addf %104, %105 : vector<128x128xf32>
    %cst_36 = arith.constant 2.000000e-01 : f32
    %107 = vector.broadcast %cst_36 : f32 to vector<128x128xf32>
    %108 = arith.mulf %107, %106 : vector<128x128xf32>
    %109 = arith.maximumf %106, %108 : vector<128x128xf32>
    %110 = arith.addf %109, %0 : vector<128x128xf32>
    %cst_37 = arith.constant dense<0xFF800000> : vector<128xf32>
    %111 = vector.multi_reduction <maximumf>, %110, %cst_37 [1] : vector<128x128xf32> to vector<128xf32>
    %112 = vector.shape_cast %111 : vector<128xf32> to vector<128x1xf32>
    %113 = vector.broadcast %112 : vector<128x1xf32> to vector<128x128xf32>
    %114 = arith.subf %110, %113 : vector<128x128xf32>
    %115 = math.exp %114 : vector<128x128xf32>
    %cst_38 = arith.constant dense<0.000000e+00> : vector<128xf32>
    %116 = vector.multi_reduction <add>, %115, %cst_38 [1] : vector<128x128xf32> to vector<128xf32>
    %117 = vector.shape_cast %116 : vector<128xf32> to vector<128x1xf32>
    %cst_39 = arith.constant 9.99999997E-7 : f32
    %118 = vector.broadcast %cst_39 : f32 to vector<128x1xf32>
    %119 = arith.maximumf %117, %118 : vector<128x1xf32>
    %120 = tpu.reciprocal %119 {approx = true} : vector<128x1xf32> -> vector<128x1xf32>
    %121 = vector.broadcast %120 : vector<128x1xf32> to vector<128x128xf32>
    %122 = arith.mulf %115, %121 : vector<128x128xf32>
    %123 = arith.truncf %122 : vector<128x128xf32> to vector<128x128xbf16>
    %124 = vector.extract_strided_slice %4 {offsets = [0, 48], sizes = [128, 16], strides = [1, 1]} : vector<128x64xbf16> to vector<128x16xbf16>
    %cst_40 = arith.constant dense<0.000000e+00> : vector<128x16xf32>
    %125 = tpu.matmul %123, %124, %cst_40 {dimension_numbers = #tpu.dot_dimension_numbers<[1], [0], [0], [1], [0, 0, 1, 1], [], []>} : vector<128x128xbf16>, vector<128x16xbf16>, vector<128x16xf32> -> vector<128x16xf32>
    %c0_41 = arith.constant 0 : index
    %c48 = arith.constant 48 : index
    %126 = vector.load %arg4[%c0_41, %c48] : memref<1x64xf32, #tpu.memory_space<vmem>>, vector<1x16xf32>
    %127 = vector.broadcast %126 : vector<1x16xf32> to vector<128x16xf32>
    %128 = arith.addf %125, %127 : vector<128x16xf32>
    %cst_42 = arith.constant 0.000000e+00 : f32
    %129 = vector.broadcast %cst_42 : f32 to vector<128x16xf32>
    %130 = arith.maximumf %128, %129 : vector<128x16xf32>
    %131 = arith.truncf %130 : vector<128x16xf32> to vector<128x16xbf16>
    %c0_43 = arith.constant 0 : index
    %c48_44 = arith.constant 48 : index
    %132 = vector.load %arg9[%c0_43, %c48_44] : memref<128x64xbf16, #tpu.memory_space<vmem>>, vector<128x16xbf16>
    tpu.vector_store %arg9[%c0_43, %c48_44], %131 {strides = array<i32>} : memref<128x64xbf16, #tpu.memory_space<vmem>>, vector<128x16xbf16>,
    %c0_45 = arith.constant 0 : index
    %c0_46 = arith.constant 0 : index
    %133 = vector.load %arg9[%c0_45, %c0_46] : memref<128x64xbf16, #tpu.memory_space<vmem>>, vector<128x64xbf16>
    %c0_47 = arith.constant 0 : index
    %c0_48 = arith.constant 0 : index
    %134 = vector.load %arg5[%c0_47, %c0_48] : memref<64x128xbf16, #tpu.memory_space<vmem>>, vector<64x128xbf16>
    %cst_49 = arith.constant dense<0.000000e+00> : vector<128x128xf32>
    %135 = tpu.matmul %133, %134, %cst_49 {dimension_numbers = #tpu.dot_dimension_numbers<[1], [0], [0], [1], [0, 0, 1, 1], [], []>} : vector<128x64xbf16>, vector<64x128xbf16>, vector<128x128xf32> -> vector<128x128xf32>
    %136 = arith.truncf %135 : vector<128x128xf32> to vector<128x128xbf16>
    %c0_50 = arith.constant 0 : index
    %c0_51 = arith.constant 0 : index
    %137 = vector.load %arg6[%c0_50, %c0_51] : memref<128x16xbf16, #tpu.memory_space<vmem>>, vector<128x16xbf16>
    %cst_52 = arith.constant dense<0.000000e+00> : vector<128x16xf32>
    %138 = tpu.matmul %136, %137, %cst_52 {dimension_numbers = #tpu.dot_dimension_numbers<[1], [0], [0], [1], [0, 0, 1, 1], [], []>} : vector<128x128xbf16>, vector<128x16xbf16>, vector<128x16xf32> -> vector<128x16xf32>
    %139 = vector.extract_strided_slice %138 {offsets = [0, 8], sizes = [128, 1], strides = [1, 1]} : vector<128x16xf32> to vector<128x1xf32>
    %140 = tpu.transpose %139, [1, 0] : vector<128x1xf32> -> vector<1x128xf32>
    %141 = vector.extract_strided_slice %138 {offsets = [0, 0], sizes = [128, 1], strides = [1, 1]} : vector<128x16xf32> to vector<128x1xf32>
    %142 = vector.broadcast %141 : vector<128x1xf32> to vector<128x128xf32>
    %143 = vector.broadcast %140 : vector<1x128xf32> to vector<128x128xf32>
    %144 = arith.addf %142, %143 : vector<128x128xf32>
    %cst_53 = arith.constant 2.000000e-01 : f32
    %145 = vector.broadcast %cst_53 : f32 to vector<128x128xf32>
    %146 = arith.mulf %145, %144 : vector<128x128xf32>
    %147 = arith.maximumf %144, %146 : vector<128x128xf32>
    %148 = arith.addf %147, %0 : vector<128x128xf32>
    %cst_54 = arith.constant dense<0xFF800000> : vector<128xf32>
    %149 = vector.multi_reduction <maximumf>, %148, %cst_54 [1] : vector<128x128xf32> to vector<128xf32>
    %150 = vector.shape_cast %149 : vector<128xf32> to vector<128x1xf32>
    %151 = vector.broadcast %150 : vector<128x1xf32> to vector<128x128xf32>
    %152 = arith.subf %148, %151 : vector<128x128xf32>
    %153 = math.exp %152 : vector<128x128xf32>
    %cst_55 = arith.constant dense<0.000000e+00> : vector<128xf32>
    %154 = vector.multi_reduction <add>, %153, %cst_55 [1] : vector<128x128xf32> to vector<128xf32>
    %155 = vector.shape_cast %154 : vector<128xf32> to vector<128x1xf32>
    %cst_56 = arith.constant 9.99999997E-7 : f32
    %156 = vector.broadcast %cst_56 : f32 to vector<128x1xf32>
    %157 = arith.maximumf %155, %156 : vector<128x1xf32>
    %158 = tpu.reciprocal %157 {approx = true} : vector<128x1xf32> -> vector<128x1xf32>
    %159 = vector.broadcast %158 : vector<128x1xf32> to vector<128x128xf32>
    %160 = arith.mulf %153, %159 : vector<128x128xf32>
    %161 = arith.truncf %160 : vector<128x128xf32> to vector<128x128xbf16>
    %cst_57 = arith.constant dense<0.000000e+00> : vector<128x128xf32>
    %162 = tpu.matmul %161, %136, %cst_57 {dimension_numbers = #tpu.dot_dimension_numbers<[1], [0], [0], [1], [0, 0, 1, 1], [], []>} : vector<128x128xbf16>, vector<128x128xbf16>, vector<128x128xf32> -> vector<128x128xf32>
    %c0_58 = arith.constant 0 : index
    %c0_59 = arith.constant 0 : index
    %163 = vector.load %arg7[%c0_58, %c0_59] : memref<1x128xf32, #tpu.memory_space<vmem>>, vector<1x128xf32>
    %164 = vector.broadcast %163 : vector<1x128xf32> to vector<128x128xf32>
    %165 = arith.addf %162, %164 : vector<128x128xf32>
    %c0_60 = arith.constant 0 : index
    %c0_61 = arith.constant 0 : index
    %166 = vector.load %arg8[%c0_60, %c0_61] : memref<128x128xf32, #tpu.memory_space<vmem>>, vector<128x128xf32>
    tpu.vector_store %arg8[%c0_60, %c0_61], %165 {strides = array<i32>} : memref<128x128xf32, #tpu.memory_space<vmem>>, vector<128x128xf32>,
    return
  }
}

</mosaic_0001>

<bundles_post_ra>
// kernel: tpu_custom_call.1
= control target key start
LH: loop header
LB: loop body
LE: loop exit
PB: predicated region body
PF: predicated region fallthrough
CT: control target
= control target key end

     0   :  { %vm129_vm0 = vcmask 1043456   ;;  %vm104_vm1 = vcmask 64512   ;;  %s6005_s0 = inlined_call_operand.vmem [shape: bf16[128,8], index: 0, kind: input, shape index: {}]   ;;  %s6006_s1 = inlined_call_operand.vmem [shape: f32[128,128], index: 1, kind: input, shape index: {}]   ;;  %s6007_s2 = inlined_call_operand.vmem [shape: bf16[8,64], index: 2, kind: input, shape index: {}]   ;;  %s6008_s3 = inlined_call_operand.vmem [shape: bf16[64,16], index: 3, kind: input, shape index: {}]   ;;  %s6009_s4 = inlined_call_operand.vmem [shape: f32[1,64], index: 4, kind: input, shape index: {}]   ;;  %s6010_s5 = inlined_call_operand.vmem [shape: bf16[64,128], index: 5, kind: input, shape index: {}]   ;;  %s6011_s6 = inlined_call_operand.vmem [shape: bf16[128,16], index: 6, kind: input, shape index: {}]   ;;  %s6012_s7 = inlined_call_operand.vmem [shape: f32[1,128], index: 7, kind: input, shape index: {}]   ;;  %s6013_s8 = inlined_call_operand.hbm [shape: f32[128,128], index: 8, kind: output, shape index: {}]  }
   0x1   :  { %v63_v0 = vld [vmem:[%s6007_s2] sm:$0xf]  ;;  %v3814_v3 = vld [vmem:[%s6005_s0 + $0x8] sm:$0xff]   ;;  %v3815_v4 = vld [vmem:[%s6005_s0 + $0x10] sm:$0xff]  }
   0x2   :  { %v3813_v1 = vld [vmem:[%s6005_s0] sm:$0xff]   ;;  %3736 = vmatprep.subr.msk.bf16.mxu0 %vm129_vm0, %v63_v0  ;;  %v131_v2 = vsel %vm129_vm0, %v63_v0, 0  ;;  %v3816_v5 = vld [vmem:[%s6005_s0 + $0x18] sm:$0xff]   ;;  %v3822_v8 = vld [vmem:[%s6008_s3 + $0x8] sm:$0xff]  }
   0x3   :  { %3463 = vmatpush3.bf16.msra.mxu0 %v131_v2  ;;  %3464 = vmatprep.mubr.msk.bf16.mxu0 %vm104_vm1, %v3813_v1  ;;  %v3817_v6 = vld [vmem:[%s6005_s0 + $0x20] sm:$0xff]   ;;  %v3823_v9 = vld [vmem:[%s6008_s3 + $0x10] sm:$0xff]   ;;  %v3818_v10 = vld [vmem:[%s6005_s0 + $0x28] sm:$0xff]  }
   0x4   :  { %v3821_v7 = vld [vmem:[%s6008_s3] sm:$0xff]   ;;  %v3819_v11 = vld [vmem:[%s6005_s0 + $0x30] sm:$0xff]  }
   0x5   :  { %3480 = vmatprep.subr.bf16.mxu1 %v3821_v7 }
   0x6   :  { %3465 = vmatmul.mubr.msk.bf16.vlgmr.msra.gmra.mrb[0].mxu0 %vm104_vm1, %v3814_v3  ;;  %3481 = vmatpush3.bf16.msra.mxu1 %v3821_v7 }
   0x7   :  { %3468 = vmatprep.mubr.msk.bf16.mxu0 %vm104_vm1, %v3815_v4  ;;  %3482 = vmatprep.subr.bf16.mxu1 %v3822_v8 }
   0xa   :  { %3483 = vmatpush3.bf16.msra.mxu1 %v3822_v8 }
   0xb   :  { %3484 = vmatprep.subr.bf16.mxu1 %v3823_v9 }
   0xe   :  { %3469 = vmatmul.mubr.msk.bf16.gmra.mrb[4].mxu0 %vm104_vm1, %v3816_v5  ;;  %3485 = vmatpush3.bf16.msra.mxu1 %v3823_v9 }
   0xf   :  { %3472 = vmatprep.mubr.msk.bf16.mxu0 %vm104_vm1, %v3817_v6 }
  0x10   :  { %13 = vsyncpa [#allocation4], 0  ;;  %v3820_v12 = vld [vmem:[%s6005_s0 + $0x38] sm:$0xff]   ;;  %vm270_vm2 = vcmask 523264   ;;  %s4197_s30 = smov 96   ;;  %s4198_s9 = smov 112  }
  0x11   :  { %v3824_v13 = vld [vmem:[%s6008_s3 + $0x18] sm:$0xff]   ;;  %s4199_s0 = smov 80   ;;  %v6014_v38 = vmov 0   ;;  %s4201_s3 = smov 120   ;;  %v4202_v60 = vmov 1   ;;  %v4203_v0 = vmov 2  }
  0x12   :  { %3486 = vmatprep.subr.bf16.mxu1 %v3824_v13  ;;  %3751 = vset.pattern.permute.xlu1 %v6014_v38  ;;  %v4204_v4 = vmov 3   ;;  %vm916_vm3 = vcmask 130048   ;;  %vm1419_vm4 = vcmask 261248   ;;  %s4207_s27 = smov 48   ;;  %vm1914_vm5 = vcmask 392448  }
  0x13   :  { %3487 = vmatpush3.bf16.msra.mxu1 %v3824_v13  ;;  %3755 = vset.pattern.permute.xlu0 %v6014_v38  ;;  %vm2409_vm6 = vcmask 523648  }
  0x16   :  { %3473 = vmatmul.mubr.msk.bf16.gmra.mrb[8].mxu0 %vm104_vm1, %v3818_v10 }
  0x17   :  { %3476 = vmatprep.mubr.msk.bf16.mxu0 %vm104_vm1, %v3819_v11 }
  0x1e   :  { %3477 = vmatmul.mubr.msk.bf16.gmra.mrb[12].mxu0 %vm104_vm1, %v3820_v12 }
  0xd9   :  { %v3466_v14 = vpop.f32.mrb[0].mxu0 }
  0xda   :  { %v167_v15 = vpop.f32.mrb[1].mxu0 }
  0xdb   :  { %v3467_v16 = vpop.f32.mrb[2].mxu0 }
  0xdc   :  { %v231_v17 = vpack.c.bf16 %v3467_v16, %v3466_v14  ;;  %v170_v18 = vpop.f32.mrb[3].mxu0 }
  0xdd   :  { %v230_v19 = vpack.c.bf16 %v170_v18, %v167_v15 }
  0xde   :  { %1736 = vrot.lane.b32.xlu1 %v231_v17, %s4197_s30  ;;  %1241 = vrot.lane.b32.xlu0 %v231_v17, %s4198_s9 }
  0xdf   :  { %3488 = vmatprep.mubr.msk.bf16.mxu1 %vm270_vm2, %v230_v19  ;;  %3504 = vmatprep.subr.bf16.mxu0 %v230_v19 }
  0xe0   :  { %3489 = vmatmul.mubr.msk.bf16.vlgmr.msra.gmra.mrb[0].mxu1 %vm270_vm2, %v231_v17  ;;  %3505 = vmatpush3.bf16.msra.mxu0 %v230_v19 }
  0xe1   :  { %3506 = vmatprep.subr.bf16.mxu0 %v231_v17  ;;  %v3470_v20 = vpop.f32.mrb[4].mxu0 }
  0xe2   :  { %2231 = vrot.lane.b32.xlu1 %v231_v17, %s4199_s0  ;;  %2229 = vrot.lane.b32.xlu0 %v230_v19, %s4199_s0  ;;  %v183_v21 = vpop.f32.mrb[5].mxu0 }
  0xe3   :  { %v3471_v22 = vpop.f32.mrb[6].mxu0 }
  0xe4   :  { %3507 = vmatpush3.bf16.msra.mxu0 %v231_v17  ;;  %v233_v23 = vpack.c.bf16 %v3471_v22, %v3470_v20  ;;  %v186_v24 = vpop.f32.mrb[7].mxu0 }
  0xe5   :  { %v232_v25 = vpack.c.bf16 %v186_v24, %v183_v21 }
  0xe6   :  { %1239 = vrot.lane.b32.xlu1 %v230_v19, %s4198_s9  ;;  %1245 = vrot.lane.b32.xlu0 %v233_v23, %s4198_s9 }
  0xe7   :  { %3492 = vmatprep.mubr.msk.bf16.mxu1 %vm270_vm2, %v232_v25  ;;  %3508 = vmatprep.subr.bf16.mxu0 %v232_v25 }
  0xe8   :  { %3493 = vmatmul.mubr.msk.bf16.gmra.mrb[4].mxu1 %vm270_vm2, %v233_v23  ;;  %3509 = vmatpush3.bf16.msra.mxu0 %v232_v25 }
  0xe9   :  { %v3474_v26 = vpop.f32.mrb[8].mxu0  ;;  %3510 = vmatprep.subr.bf16.mxu0 %v233_v23 }
  0xea   :  { %1734 = vrot.lane.b32.xlu1 %v230_v19, %s4197_s30  ;;  %v199_v27 = vpop.f32.mrb[9].mxu0  ;;  %1740 = vrot.lane.b32.xlu0 %v233_v23, %s4197_s30 }
  0xeb   :  { %v3475_v28 = vpop.f32.mrb[10].mxu0 }
  0xec   :  { %v4315_v29 = vpack.c.bf16 %v3475_v28, %v3474_v26  ;;  %v202_v30 = vpop.f32.mrb[11].mxu0  ;;  %3511 = vmatpush3.bf16.msra.mxu0 %v233_v23 }
  0xed   :  { %v4317_v31 = vpack.c.bf16 %v202_v30, %v199_v27 }
  0xee   :  { %6074 = vst [vmem:[#allocation6_spill] sm:$0xff] %v4315_v29  ;;  %2235 = vrot.lane.b32.xlu1 %v233_v23, %s4199_s0  ;;  %1738 = vrot.lane.b32.xlu0 %v232_v25, %s4197_s30 }
  0xef   :  { %6075 = vst [vmem:[#allocation7_spill] sm:$0xff] %v4317_v31  ;;  %3496 = vmatprep.mubr.msk.bf16.mxu1 %vm270_vm2, %v4317_v31  ;;  %3512 = vmatprep.subr.bf16.mxu0 %v4317_v31 }
  0xf0   :  { %3497 = vmatmul.mubr.msk.bf16.gmra.mrb[8].mxu1 %vm270_vm2, %v4315_v29  ;;  %3513 = vmatpush3.bf16.msra.mxu0 %v4317_v31 }
  0xf1   :  { %v3478_v32 = vpop.f32.mrb[12].mxu0  ;;  %3514 = vmatprep.subr.bf16.mxu0 %v4315_v29 }
  0xf2   :  { %1243 = vrot.lane.b32.xlu1 %v232_v25, %s4198_s9  ;;  %v215_v33 = vpop.f32.mrb[13].mxu0  ;;  %1249 = vrot.lane.b32.xlu0 %v4315_v29, %s4198_s9 }
  0xf3   :  { %v3479_v34 = vpop.f32.mrb[14].mxu0 }
  0xf4   :  { %v4331_v35 = vpack.c.bf16 %v3479_v34, %v3478_v32  ;;  %v218_v36 = vpop.f32.mrb[15].mxu0  ;;  %3515 = vmatpush3.bf16.msra.mxu0 %v4315_v29 }
  0xf5   :  { %v4334_v37 = vpack.c.bf16 %v218_v36, %v215_v33 }
  0xf6   :  { %6076 = vst [vmem:[#allocation8_spill] sm:$0xff] %v4331_v35  ;;  %2233 = vrot.lane.b32.xlu1 %v232_v25, %s4199_s0  ;;  %1253 = vrot.lane.b32.xlu0 %v4331_v35, %s4198_s9 }
  0xf7   :  { %6077 = vst [vmem:[#allocation9_spill] sm:$0xff] %v4334_v37  ;;  %3500 = vmatprep.mubr.msk.bf16.mxu1 %vm270_vm2, %v4334_v37  ;;  %3516 = vmatprep.subr.bf16.mxu0 %v4334_v37 }
  0xf8   :  { %3501 = vmatmul.mubr.msk.bf16.gmra.mrb[12].mxu1 %vm270_vm2, %v4331_v35  ;;  %3517 = vmatpush3.bf16.msra.mxu0 %v4334_v37 }
  0xf9   :  { %3518 = vmatprep.subr.bf16.mxu0 %v4331_v35 }
  0xfa   :  { %1247 = vrot.lane.b32.xlu1 %v4317_v31, %s4198_s9  ;;  %v552_v31 = vlaneseq }
  0xfc   :  { %3519 = vmatpush3.bf16.msra.mxu0 %v4331_v35 }
  0xfe   :  { %1251 = vrot.lane.b32.xlu1 %v4334_v37, %s4198_s9 }
 0x150   :  { %v4353_v39 = vpop.permute.xlu1 %1736  ;;  %v1242_v40 = vpop.permute.xlu0 %1241 }
 0x151   :  { %6078 = vst [vmem:[#allocation10_spill] sm:$0xff] %v4353_v39  ;;  %v6103_v39 = vmov 0  }
 0x154   :  { %v4355_v41 = vpop.permute.xlu1 %2231  ;;  %v4357_v42 = vpop.permute.xlu0 %2229 }
 0x155   :  { %6079 = vst [vmem:[#allocation11_spill] sm:$0xff] %v4355_v41  ;;  %6080 = vst [vmem:[#allocation12_spill] sm:$0xff] %v4357_v42 }
 0x158   :  { %v1240_v43 = vpop.permute.xlu1 %1239  ;;  %v1246_v44 = vpop.permute.xlu0 %1245 }
 0x159   :  { %3536 = vmatprep.subr.bf16.mxu1 %v1240_v43 }
 0x15a   :  { %3537 = vmatpush3.bf16.msra.mxu1 %v1240_v43 }
 0x15b   :  { %3538 = vmatprep.subr.bf16.mxu1 %v1242_v40 }
 0x15c   :  { %v4359_v45 = vpop.permute.xlu1 %1734  ;;  %v4364_v47 = vpop.permute.xlu0 %1740 }
 0x15d   :  { %6081 = vst [vmem:[#allocation13_spill] sm:$0xff] %v4359_v45  ;;  %3568 = vmatprep.subr.bf16.mxu0 %v4359_v45  ;;  %6083 = vst [vmem:[#allocation15_spill] sm:$0xff] %v4364_v47 }
 0x15e   :  { %3539 = vmatpush3.bf16.msra.mxu1 %v1242_v40 }
 0x160   :  { %v4362_v46 = vpop.permute.xlu1 %2235  ;;  %v4366_v49 = vpop.permute.xlu0 %1738 }
 0x161   :  { %6082 = vst [vmem:[#allocation14_spill] sm:$0xff] %v4362_v46  ;;  %6084 = vst [vmem:[#allocation16_spill] sm:$0xff] %v4366_v49 }
 0x164   :  { %v1244_v48 = vpop.permute.xlu1 %1243  ;;  %v1250_v52 = vpop.permute.xlu0 %1249 }
 0x165   :  { %3540 = vmatprep.subr.bf16.mxu1 %v1244_v48 }
 0x166   :  { %3541 = vmatpush3.bf16.msra.mxu1 %v1244_v48 }
 0x167   :  { %3542 = vmatprep.subr.bf16.mxu1 %v1246_v44 }
 0x168   :  { %v4368_v50 = vpop.permute.xlu1 %2233  ;;  %v1254_v54 = vpop.permute.xlu0 %1253 }
 0x169   :  { %6085 = vst [vmem:[#allocation17_spill] sm:$0xff] %v4368_v50 }
 0x16a   :  { %3543 = vmatpush3.bf16.msra.mxu1 %v1246_v44 }
 0x16c   :  { %v1248_v51 = vpop.permute.xlu1 %1247 }
 0x16d   :  { %3544 = vmatprep.subr.bf16.mxu1 %v1248_v51 }
 0x16e   :  { %3545 = vmatpush3.bf16.msra.mxu1 %v1248_v51 }
 0x16f   :  { %3546 = vmatprep.subr.bf16.mxu1 %v1250_v52 }
 0x170   :  { %v1252_v53 = vpop.permute.xlu1 %1251 }
 0x172   :  { %3547 = vmatpush3.bf16.msra.mxu1 %v1250_v52 }
 0x173   :  { %3548 = vmatprep.subr.bf16.mxu1 %v1252_v53 }
 0x176   :  { %3549 = vmatpush3.bf16.msra.mxu1 %v1252_v53 }
 0x177   :  { %3550 = vmatprep.subr.bf16.mxu1 %v1254_v54 }
 0x17a   :  { %3551 = vmatpush3.bf16.msra.mxu1 %v1254_v54 }
 0x17b   :  { %3600 = vmatprep.subr.bf16.mxu1 %v4357_v42 }
 0x1b3   :  { %v3490_v55 = vpop.f32.mrb[0].mxu1 }
 0x1b4   :  { %v329_v56 = vpop.f32.mrb[1].mxu1  ;;  %412 = vrot.lane.b32.xlu1 %v3490_v55, %s4201_s3 }
 0x1b5   :  { %v3491_v57 = vpop.f32.mrb[2].mxu1  ;;  %408 = vrot.lane.b32.xlu0 %v329_v56, %s4201_s3 }
 0x1b6   :  { %v332_v58 = vpop.f32.mrb[3].mxu1 }
 0x1b8   :  { %497 = vperm.xlu1 %3751, %v3490_v55  }
 0x1b9   :  { %489 = vperm.xlu0 %3755, %v329_v56  }
 0x1bb   :  { %v4373_v59 = vpop.f32.mrb[4].mxu1 }
 0x1bc   :  { %3752 = vset.pattern.permute.xlu1 %v4202_v60  ;;  %v4376_v61 = vpop.f32.mrb[5].mxu1 }
 0x1bd   :  { %501 = vperm.xlu0 %3755, %v3491_v57   ;;  %934 = vperm.xlu1 %3752, %v3490_v55   ;;  %v4378_v62 = vpop.f32.mrb[6].mxu1 }
 0x1be   :  { %v4380_v63 = vpop.f32.mrb[7].mxu1 }
 0x1c1   :  { %410 = vrot.lane.b32.xlu0 %v332_v58, %s4201_s3  ;;  %3753 = vset.pattern.permute.xlu1 %v4203_v0 }
 0x1c2   :  { %1437 = vperm.xlu1 %3753, %v3490_v55   ;;  %3763 = vset.pattern.permute.xlu0 %v4202_v60 }
 0x1c3   :  { %v4385_v1 = vpop.f32.mrb[8].mxu1 }
 0x1c4   :  { %v4387_v2 = vpop.f32.mrb[9].mxu1 }
 0x1c5   :  { %930 = vperm.xlu0 %3763, %v332_v58   ;;  %v4389_v3 = vpop.f32.mrb[10].mxu1 }
 0x1c6   :  { %3754 = vset.pattern.permute.xlu1 %v4204_v4  ;;  %v4392_v5 = vpop.f32.mrb[11].mxu1 }
 0x1c7   :  { %1932 = vperm.xlu1 %3754, %v3490_v55  }
 0x1c9   :  { %420 = vrot.lane.b32.xlu0 %v4373_v59, %s4201_s3 }
 0x1ca   :  { %3770 = vset.pattern.permute.xlu0 %v6014_v38 }
 0x1cb   :  { %3756 = vset.pattern.permute.xlu1 %v4202_v60  ;;  %v4398_v6 = vpop.f32.mrb[12].mxu1 }
 0x1cc   :  { %926 = vperm.xlu1 %3756, %v329_v56   ;;  %v4400_v7 = vpop.f32.mrb[13].mxu1 }
 0x1cd   :  { %416 = vrot.lane.b32.xlu0 %v4376_v61, %s4201_s3  ;;  %v4404_v8 = vpop.f32.mrb[14].mxu1 }
 0x1ce   :  { %v4406_v9 = vpop.f32.mrb[15].mxu1 }
 0x1d0   :  { %3757 = vset.pattern.permute.xlu1 %v4203_v0 }
 0x1d1   :  { %1429 = vperm.xlu1 %3757, %v329_v56   ;;  %505 = vperm.xlu0 %3770, %v4376_v61  }
 0x1d5   :  { %3758 = vset.pattern.permute.xlu1 %v4204_v4  ;;  %517 = vperm.xlu0 %3770, %v4378_v62  }
 0x1d6   :  { %1924 = vperm.xlu1 %3758, %v329_v56  }
 0x1d9   :  { %3778 = vset.pattern.permute.xlu0 %v4202_v60 }
 0x1da   :  { %414 = vrot.lane.b32.xlu1 %v3491_v57, %s4201_s3  ;;  %946 = vperm.xlu0 %3778, %v4380_v63  }
 0x1db   :  { %3759 = vset.pattern.permute.xlu1 %v4202_v60 }
 0x1de   :  { %938 = vperm.xlu1 %3759, %v3491_v57   ;;  %428 = vrot.lane.b32.xlu0 %v4385_v1, %s4201_s3 }
 0x1df   :  { %3785 = vset.pattern.permute.xlu0 %v6014_v38 }
 0x1e2   :  { %3760 = vset.pattern.permute.xlu1 %v4203_v0  ;;  %424 = vrot.lane.b32.xlu0 %v4387_v2, %s4201_s3 }
 0x1e3   :  { %1441 = vperm.xlu1 %3760, %v3491_v57  }
 0x1e6   :  { %521 = vperm.xlu0 %3785, %v4387_v2  }
 0x1e7   :  { %3761 = vset.pattern.permute.xlu1 %v4204_v4 }
 0x1e8   :  { %1936 = vperm.xlu1 %3761, %v3491_v57  }
 0x1ea   :  { %533 = vperm.xlu0 %3785, %v4389_v3  }
 0x1ec   :  { %3762 = vset.pattern.permute.xlu1 %v6014_v38 }
 0x1ed   :  { %493 = vperm.xlu1 %3762, %v332_v58  }
 0x1ee   :  { %3791 = vset.pattern.permute.xlu0 %v4204_v4 }
 0x1ef   :  { %1968 = vperm.xlu0 %3791, %v4389_v3  }
 0x1f1   :  { %3764 = vset.pattern.permute.xlu1 %v4203_v0 }
 0x1f2   :  { %1433 = vperm.xlu1 %3764, %v332_v58  }
 0x1f3   :  { %3793 = vset.pattern.permute.xlu0 %v4202_v60 }
 0x1f4   :  { %962 = vperm.xlu0 %3793, %v4392_v5  }
 0x1f6   :  { %3765 = vset.pattern.permute.xlu1 %v4204_v4 }
 0x1f7   :  { %1928 = vperm.xlu1 %3765, %v332_v58  }
 0x1f8   :  { %436 = vrot.lane.b32.xlu0 %v4398_v6, %s4201_s3 }
 0x1f9   :  { %3800 = vset.pattern.permute.xlu0 %v6014_v38 }
 0x1fb   :  { %3766 = vset.pattern.permute.xlu1 %v6014_v38 }
 0x1fc   :  { %513 = vperm.xlu1 %3766, %v4373_v59   ;;  %432 = vrot.lane.b32.xlu0 %v4400_v7, %s4201_s3 }
 0x200   :  { %3767 = vset.pattern.permute.xlu1 %v4202_v60  ;;  %537 = vperm.xlu0 %3800, %v4400_v7  }
 0x201   :  { %950 = vperm.xlu1 %3767, %v4373_v59  }
 0x204   :  { %549 = vperm.xlu0 %3800, %v4404_v8  }
 0x205   :  { %3768 = vset.pattern.permute.xlu1 %v4203_v0 }
 0x206   :  { %1453 = vperm.xlu1 %3768, %v4373_v59  }
 0x208   :  { %3808 = vset.pattern.permute.xlu0 %v4202_v60 }
 0x209   :  { %978 = vperm.xlu0 %3808, %v4406_v9  }
 0x20a   :  { %3769 = vset.pattern.permute.xlu1 %v4204_v4 }
 0x20b   :  { %1948 = vperm.xlu1 %3769, %v4373_v59  }
 0x20f   :  { %3771 = vset.pattern.permute.xlu1 %v4202_v60 }
 0x210   :  { %942 = vperm.xlu1 %3771, %v4376_v61  }
 0x214   :  { %3772 = vset.pattern.permute.xlu1 %v4203_v0 }
 0x215   :  { %1445 = vperm.xlu1 %3772, %v4376_v61  }
 0x219   :  { %3773 = vset.pattern.permute.xlu1 %v4204_v4 }
 0x21a   :  { %1940 = vperm.xlu1 %3773, %v4376_v61  }
 0x21e   :  { %422 = vrot.lane.b32.xlu1 %v4378_v62, %s4201_s3 }
 0x21f   :  { %3774 = vset.pattern.permute.xlu1 %v4202_v60 }
 0x222   :  { %954 = vperm.xlu1 %3774, %v4378_v62  }
 0x226   :  { %3775 = vset.pattern.permute.xlu1 %v4203_v0  ;;  %v413_v11 = vpop.permute.xlu1 %412 }
 0x227   :  { %v409_v10 = vpop.permute.xlu0 %408  ;;  %1457 = vperm.xlu1 %3775, %v4378_v62  }
 0x228   :  { %456 = vxpose.xlu0.b32.start [1/16] (narrow) %v409_v10, 8 }
 0x22b   :  { %3776 = vset.pattern.permute.xlu1 %v4204_v4 }
 0x22c   :  { %1952 = vperm.xlu1 %3776, %v4378_v62  }
 0x230   :  { %418 = vrot.lane.b32.xlu1 %v4380_v63, %s4201_s3 }
 0x231   :  { %3777 = vset.pattern.permute.xlu1 %v6014_v38 }
 0x234   :  { %509 = vperm.xlu1 %3777, %v4380_v63  }
 0x237   :  { %v4467_v12 = vpop.permute.xlu1 %497 }
 0x238   :  { %v4469_v13 = vpop.permute.xlu0 %489  ;;  %3779 = vset.pattern.permute.xlu1 %v4203_v0 }
 0x239   :  { %1449 = vperm.xlu1 %3779, %v4380_v63  }
 0x23c   :  { %v4473_v14 = vpop.permute.xlu0 %501  ;;  %v4475_v15 = vpop.permute.xlu1 %934 }
 0x23d   :  { %3780 = vset.pattern.permute.xlu1 %v4204_v4 }
 0x23e   :  { %1944 = vperm.xlu1 %3780, %v4380_v63  }
 0x240   :  { %v411_v16 = vpop.permute.xlu0 %410 }
 0x241   :  { %v4479_v17 = vpop.permute.xlu1 %1437  ;;  %457 = vxpose.xlu0.b32.cont [2/16] (narrow) %v411_v16, 8 }
 0x242   :  { %3781 = vset.pattern.permute.xlu1 %v6014_v38 }
 0x243   :  { %529 = vperm.xlu1 %3781, %v4385_v1  }
 0x244   :  { %v4493_v21 = vpop.permute.xlu0 %930 }
 0x245   :  { %458 = vxpose.xlu0.b32.cont [3/16] (narrow) %v413_v11, 8 }
 0x246   :  { %v4483_v18 = vpop.permute.xlu1 %1932 }
 0x247   :  { %3782 = vset.pattern.permute.xlu1 %v4202_v60 }
 0x248   :  { %966 = vperm.xlu1 %3782, %v4385_v1   ;;  %v4499_v23 = vpop.permute.xlu0 %420 }
 0x24b   :  { %v4487_v19 = vpop.permute.xlu1 %926 }
 0x24c   :  { %3783 = vset.pattern.permute.xlu1 %v4203_v0  ;;  %v417_v25 = vpop.permute.xlu0 %416 }
 0x24d   :  { %1469 = vperm.xlu1 %3783, %v4385_v1  }
 0x250   :  { %v4491_v20 = vpop.permute.xlu1 %1429  ;;  %v4563_v54 = vpop.permute.xlu0 %505 }
 0x251   :  { %3784 = vset.pattern.permute.xlu1 %v4204_v4 }
 0x252   :  { %1964 = vperm.xlu1 %3784, %v4385_v1  }
 0x254   :  { %v4570_v56 = vpop.permute.xlu0 %517 }
 0x255   :  { %v4497_v22 = vpop.permute.xlu1 %1924 }
 0x256   :  { %3786 = vset.pattern.permute.xlu1 %v4202_v60 }
 0x257   :  { %958 = vperm.xlu1 %3786, %v4387_v2  }
 0x259   :  { %v415_v24 = vpop.permute.xlu1 %414  ;;  %v4577_v59 = vpop.permute.xlu0 %946 }
 0x25a   :  { %459 = vxpose.xlu0.b32.cont [4/16] (narrow) %v415_v24, 8 }
 0x25b   :  { %3787 = vset.pattern.permute.xlu1 %v4203_v0 }
 0x25c   :  { %1461 = vperm.xlu1 %3787, %v4387_v2  }
 0x25d   :  { %v4505_v26 = vpop.permute.xlu1 %938 }
 0x25e   :  { %460 = vxpose.xlu0.b32.cont [5/16] (narrow) %v417_v25, 8 }
 0x260   :  { %3788 = vset.pattern.permute.xlu1 %v4204_v4 }
 0x261   :  { %1956 = vperm.xlu1 %3788, %v4387_v2  }
 0x262   :  { %v4509_v27 = vpop.permute.xlu1 %1441 }
 0x265   :  { %430 = vrot.lane.b32.xlu1 %v4389_v3, %s4201_s3 }
 0x266   :  { %3789 = vset.pattern.permute.xlu1 %v4202_v60 }
 0x267   :  { %v4514_v28 = vpop.permute.xlu1 %1936 }
 0x269   :  { %970 = vperm.xlu1 %3789, %v4389_v3  }
 0x26c   :  { %v4517_v30 = vpop.permute.xlu1 %493 }
 0x26d   :  { %3790 = vset.pattern.permute.xlu1 %v4203_v0 }
 0x26e   :  { %1473 = vperm.xlu1 %3790, %v4389_v3  }
 0x271   :  { %v4521_v32 = vpop.permute.xlu1 %1433 }
 0x272   :  { %426 = vrot.lane.b32.xlu1 %v4392_v5, %s4201_s3 }
 0x273   :  { %3792 = vset.pattern.permute.xlu1 %v6014_v38 }
 0x276   :  { %525 = vperm.xlu1 %3792, %v4392_v5   ;;  %v4527_v33 = vpop.permute.xlu1 %1928 }
 0x27a   :  { %3794 = vset.pattern.permute.xlu1 %v4203_v0 }
 0x27b   :  { %1465 = vperm.xlu1 %3794, %v4392_v5   ;;  %v4531_v34 = vpop.permute.xlu1 %513 }
 0x27f   :  { %3795 = vset.pattern.permute.xlu1 %v4204_v4 }
 0x280   :  { %1960 = vperm.xlu1 %3795, %v4392_v5   ;;  %v4535_v36 = vpop.permute.xlu1 %950 }
 0x284   :  { %3796 = vset.pattern.permute.xlu1 %v6014_v38 }
 0x285   :  { %v4538_v40 = vpop.permute.xlu1 %1453  ;;  %545 = vperm.xlu1 %3796, %v4398_v6  }
 0x289   :  { %3797 = vset.pattern.permute.xlu1 %v4202_v60 }
 0x28a   :  { %v4542_v43 = vpop.permute.xlu1 %1948  ;;  %982 = vperm.xlu1 %3797, %v4398_v6  }
 0x28b   :  { %6086 = vst [vmem:[#allocation18_spill] sm:$0xff] %v4542_v43 }
 0x28e   :  { %3798 = vset.pattern.permute.xlu1 %v4203_v0 }
 0x28f   :  { %v4546_v44 = vpop.permute.xlu1 %942  ;;  %1485 = vperm.xlu1 %3798, %v4398_v6  }
 0x293   :  { %3799 = vset.pattern.permute.xlu1 %v4204_v4 }
 0x294   :  { %v4550_v48 = vpop.permute.xlu1 %1445  ;;  %1980 = vperm.xlu1 %3799, %v4398_v6  }
 0x298   :  { %3801 = vset.pattern.permute.xlu1 %v4202_v60 }
 0x299   :  { %v4554_v51 = vpop.permute.xlu1 %1940  ;;  %974 = vperm.xlu1 %3801, %v4400_v7  }
 0x29a   :  { %6087 = vst [vmem:[#allocation19_spill] sm:$0xff] %v4554_v51 }
 0x29d   :  { %v423_v52 = vpop.permute.xlu1 %422  ;;  %3802 = vset.pattern.permute.xlu1 %v4203_v0 }
 0x29e   :  { %1477 = vperm.xlu1 %3802, %v4400_v7  }
 0x2a1   :  { %v4559_v53 = vpop.permute.xlu1 %954 }
 0x2a2   :  { %3803 = vset.pattern.permute.xlu1 %v4204_v4 }
 0x2a3   :  { %1972 = vperm.xlu1 %3803, %v4400_v7  }
 0x2a6   :  { %v4565_v55 = vpop.permute.xlu1 %1457 }
 0x2a7   :  { %438 = vrot.lane.b32.xlu1 %v4404_v8, %s4201_s3 }
 0x2a8   :  { %3804 = vset.pattern.permute.xlu1 %v4202_v60  ;;  %v429_v60 = vpop.permute.xlu0 %428 }
 0x2ab   :  { %v4572_v57 = vpop.permute.xlu1 %1952  ;;  %986 = vperm.xlu1 %3804, %v4404_v8  }
 0x2ac   :  { %6088 = vst [vmem:[#allocation20_spill] sm:$0xff] %v4572_v57  ;;  %v425_v63 = vpop.permute.xlu0 %424 }
 0x2af   :  { %v419_v58 = vpop.permute.xlu1 %418  ;;  %3805 = vset.pattern.permute.xlu1 %v4203_v0 }
 0x2b0   :  { %1489 = vperm.xlu1 %3805, %v4404_v8   ;;  %461 = vxpose.xlu0.b32.cont [6/16] (narrow) %v419_v58, 8  ;;  %v4611_v10 = vpop.permute.xlu0 %521 }
 0x2b3   :  { %v4579_v61 = vpop.permute.xlu1 %509 }
 0x2b4   :  { %3806 = vset.pattern.permute.xlu1 %v4204_v4  ;;  %462 = vxpose.xlu0.b32.cont [7/16] (narrow) %v4499_v23, 8 }
 0x2b5   :  { %1984 = vperm.xlu1 %3806, %v4404_v8  }
 0x2b8   :  { %v4584_v62 = vpop.permute.xlu1 %1449  ;;  %463 = vxpose.xlu0.b32.cont [8/16] (narrow) %v423_v52, 8 }
 0x2b9   :  { %434 = vrot.lane.b32.xlu1 %v4406_v9, %s4201_s3 }
 0x2ba   :  { %3807 = vset.pattern.permute.xlu1 %v6014_v38 }
 0x2bc   :  { %464 = vxpose.xlu0.b32.cont [9/16] (narrow) %v425_v63, 8 }
 0x2bd   :  { %v4589_v1 = vpop.permute.xlu1 %1944  ;;  %541 = vperm.xlu1 %3807, %v4406_v9  }
 0x2c1   :  { %3809 = vset.pattern.permute.xlu1 %v4203_v0 }
 0x2c2   :  { %v4593_v2 = vpop.permute.xlu1 %529  ;;  %1481 = vperm.xlu1 %3809, %v4406_v9  }
 0x2c6   :  { %3810 = vset.pattern.permute.xlu1 %v4204_v4  ;;  %v4613_v4 = vpop.permute.xlu0 %533 }
 0x2c7   :  { %v4597_v3 = vpop.permute.xlu1 %966  ;;  %1976 = vperm.xlu1 %3810, %v4406_v9  }
 0x2ca   :  { %v4617_v9 = vpop.permute.xlu0 %1968 }
 0x2cb   :  { %3811 = vset.pattern.permute.xlu1 %v6014_v38  ;;  %6093 = vst [vmem:[#allocation25_spill] sm:$0xff] %v4617_v9 }
 0x2cc   :  { %v4601_v5 = vpop.permute.xlu1 %1469 }
 0x2cd   :  { %6089 = vst [vmem:[#allocation21_spill] sm:$0xff] %v4601_v5 }
 0x2ce   :  { %v4621_v25 = vpop.permute.xlu0 %962 }
 0x2d1   :  { %v4603_v6 = vpop.permute.xlu1 %1964 }
 0x2d2   :  { %6090 = vst [vmem:[#allocation22_spill] sm:$0xff] %v4603_v6  ;;  %v437_v58 = vpop.permute.xlu0 %436 }
 0x2d6   :  { %v4605_v7 = vpop.permute.xlu1 %958  ;;  %v433_v38 = vpop.permute.xlu0 %432 }
 0x2da   :  { %v4650_v45 = vpop.permute.xlu0 %537 }
 0x2db   :  { %v4607_v8 = vpop.permute.xlu1 %1461 }
 0x2dc   :  { %6091 = vst [vmem:[#allocation23_spill] sm:$0xff] %v4607_v8 }
 0x2e0   :  { %v4609_v0 = vpop.permute.xlu1 %1956 }
 0x2e1   :  { %6092 = vst [vmem:[#allocation24_spill] sm:$0xff] %v4609_v0 }
 0x2e4   :  { %v431_v11 = vpop.permute.xlu1 %430 }
 0x2e8   :  { %v4615_v16 = vpop.permute.xlu1 %970 }
 0x2ed   :  { %v4619_v23 = vpop.permute.xlu1 %1473 }
 0x2ee   :  { %6094 = vst [vmem:[#allocation26_spill] sm:$0xff] %v4619_v23 }
 0x2f1   :  { %v427_v24 = vpop.permute.xlu1 %426 }
 0x2f2   :  { %465 = vxpose.xlu0.b32.cont [10/16] (narrow) %v427_v24, 8 }
 0x2f5   :  { %v4623_v52 = vpop.permute.xlu1 %525 }
 0x2f6   :  { %466 = vxpose.xlu0.b32.cont [11/16] (narrow) %v429_v60, 8 }
 0x2fa   :  { %v4625_v63 = vpop.permute.xlu1 %1465  ;;  %467 = vxpose.xlu0.b32.cont [12/16] (narrow) %v431_v11, 8 }
 0x2fb   :  { %6095 = vst [vmem:[#allocation27_spill] sm:$0xff] %v4625_v63 }
 0x2fe   :  { %468 = vxpose.xlu0.b32.cont [13/16] (narrow) %v433_v38, 8 }
 0x2ff   :  { %v4627_v35 = vpop.permute.xlu1 %1960 }
 0x300   :  { %6096 = vst [vmem:[#allocation28_spill] sm:$0xff] %v4627_v35 }
 0x304   :  { %v4629_v37 = vpop.permute.xlu1 %545 }
 0x309   :  { %v4631_v46 = vpop.permute.xlu1 %982 }
 0x30e   :  { %v4633_v50 = vpop.permute.xlu1 %1485 }
 0x30f   :  { %6097 = vst [vmem:[#allocation29_spill] sm:$0xff] %v4633_v50  ;;  %v4654_v50 = vshrl.u32 %v552_v31, 7 }
 0x311   :  { %6104 = vst [vmem:[#allocation35_spill] sm:$0xff] %v4654_v50 }
 0x313   :  { %v4635_v24 = vpop.permute.xlu1 %1980 }
 0x314   :  { %6098 = vst [vmem:[#allocation30_spill] sm:$0xff] %v4635_v24  ;;  %v4652_v24 = vpop.permute.xlu0 %549 }
 0x318   :  { %v4637_v41 = vpop.permute.xlu1 %974 }
 0x31d   :  { %v4639_v42 = vpop.permute.xlu1 %1477 }
 0x31e   :  { %6099 = vst [vmem:[#allocation31_spill] sm:$0xff] %v4639_v42  ;;  %v6031_v42 = vsub.s32 0, %v4654_v50 }
 0x322   :  { %v4641_v60 = vpop.permute.xlu1 %1972 }
 0x323   :  { %6100 = vst [vmem:[#allocation32_spill] sm:$0xff] %v4641_v60  ;;  %v4656_v60 = vpop.permute.xlu0 %978 }
 0x326   :  { %v439_v47 = vpop.permute.xlu1 %438 }
 0x32a   :  { %v4643_v11 = vpop.permute.xlu1 %986 }
 0x32f   :  { %v4645_v38 = vpop.permute.xlu1 %1489 }
 0x330   :  { %6101 = vst [vmem:[#allocation33_spill] sm:$0xff] %v4645_v38  ;;  %v991_v38 = vsub.s32 1, %v4654_v50 }
 0x334   :  { %v4647_v29 = vpop.permute.xlu1 %1984 }
 0x335   :  { %6102 = vst [vmem:[#allocation34_spill] sm:$0xff] %v4647_v29 }
 0x338   :  { %v435_v49 = vpop.permute.xlu1 %434 }
 0x339   :  { %469 = vxpose.xlu0.b32.cont [14/16] (narrow) %v435_v49, 8 }
 0x33d   :  { %470 = vxpose.xlu0.b32.cont [15/16] (narrow) %v437_v58, 8 }
 0x341   :  { %471 = vxpose.xlu0.b32.end [16/16] (narrow) %v439_v47, 8 }
 0x36a   :  { %3812 = vset.pattern.permute.xlu0 %v6103_v39 }
 0x385   :  { %v4660_v29 = vpop.trf.xlu0 }
 0x386   :  { %v4665_v47 = vrot.slane %v4660_v29, %v6031_v42  ;;  %v4668_v39 = vrot.slane %v4660_v29, %v991_v38 }
 0x388   :  { %v557_v31 = vadd.f32 %v4665_v47, %v4517_v30  ;;  %v556_v49 = vadd.f32 %v4665_v47, %v4469_v13  ;;  %v559_v58 = vadd.f32 %v4665_v47, %v4473_v14  ;;  %v558_v6 = vadd.f32 %v4665_v47, %v4467_v12  ;;  %v4685_v30 = vld [vmem:[%s6006_s1 + $0x8] sm:$0xff]  ;;  %v4690_v13 = vld [vmem:[%s6006_s1] sm:$0xff] }
 0x389   :  { %v994_v9 = vadd.f32 %v4668_v39, %v4493_v21  ;;  %v993_v42 = vadd.f32 %v4668_v39, %v4487_v19  ;;  %v996_v19 = vadd.f32 %v4668_v39, %v4505_v26  ;;  %v995_v8 = vadd.f32 %v4668_v39, %v4475_v15  ;;  %v4710_v26 = vld [vmem:[%s6006_s1 + $0x10] sm:$0xff] }
 0x38a   :  { %v573_v38 = vmul.f32 0.2, %v557_v31  ;;  %v572_v0 = vmul.f32 0.2, %v556_v49  ;;  %v575_v35 = vmul.f32 0.2, %v559_v58 }
 0x38b   :  { %v574_v12 = vmul.f32 0.2, %v558_v6  ;;  %v1010_v21 = vmul.f32 0.2, %v994_v9  ;;  %v1009_v23 = vmul.f32 0.2, %v993_v42 }
 0x38c   :  { %v589_v14 = vmax.f32 %v557_v31, %v573_v38  ;;  %v588_v5 = vmax.f32 %v556_v49, %v572_v0  ;;  %v591_v57 = vmax.f32 %v559_v58, %v575_v35  ;;  %v4705_v0 = vld [vmem:[%s6006_s1 + $0x18] sm:$0xff]  ;;  %v1011_v49 = vmul.f32 0.2, %v995_v8 }
 0x38d   :  { %v590_v51 = vmax.f32 %v558_v6, %v574_v12  ;;  %v1026_v15 = vmax.f32 %v994_v9, %v1010_v21  ;;  %v1025_v31 = vmax.f32 %v993_v42, %v1009_v23  ;;  %v561_v58 = vadd.f32 %v4665_v47, %v4579_v61 }
 0x38e   :  { %v4697_v63 = vadd.f32 %v589_v14, %v4685_v30  ;;  %v4700_v43 = vadd.f32 %v588_v5, %v4690_v13  ;;  %v1012_v5 = vmul.f32 0.2, %v996_v19  ;;  %v4715_v35 = vadd.f32 %v591_v57, %v4705_v0 }
 0x38f   :  { %v4718_v6 = vadd.f32 %v590_v51, %v4710_v26  ;;  %v560_v38 = vadd.f32 %v4665_v47, %v4563_v54  ;;  %v4727_v42 = vadd.f32 %v1026_v15, %v4685_v30  ;;  %v4730_v9 = vadd.f32 %v1025_v31, %v4690_v13 }
 0x390   :  { %622 = vmax.xlane.f32.xlu0 %v4697_v63  ;;  %620 = vmax.xlane.f32.xlu1 %v4700_v43  ;;  %v1028_v57 = vmax.f32 %v996_v19, %v1012_v5  ;;  %v1027_v23 = vmax.f32 %v995_v8, %v1011_v49  ;;  %v577_v51 = vmul.f32 0.2, %v561_v58  ;;  %v563_v61 = vadd.f32 %v4665_v47, %v4570_v56  ;;  %v4751_v5 = vld [vmem:[%s6006_s1 + $0x28] sm:$0xff]  ;;  %v4756_v49 = vld [vmem:[%s6006_s1 + $0x20] sm:$0xff] }
 0x391   :  { %v576_v12 = vmul.f32 0.2, %v560_v38  ;;  %v562_v54 = vadd.f32 %v4665_v47, %v4531_v34  ;;  %v998_v8 = vadd.f32 %v4668_v39, %v4577_v59  ;;  %v997_v19 = vadd.f32 %v4668_v39, %v4546_v44 }
 0x392   :  { %v4739_v14 = vadd.f32 %v1028_v57, %v4705_v0  ;;  %v4742_v21 = vadd.f32 %v1027_v23, %v4710_v26  ;;  %v593_v56 = vmax.f32 %v561_v58, %v577_v51  ;;  %v579_v31 = vmul.f32 0.2, %v563_v61 }
 0x393   :  { %v592_v15 = vmax.f32 %v560_v38, %v576_v12  ;;  %v578_v34 = vmul.f32 0.2, %v562_v54  ;;  %v1014_v59 = vmul.f32 0.2, %v998_v8  ;;  %v1013_v44 = vmul.f32 0.2, %v997_v19 }
 0x394   :  { %626 = vmax.xlane.f32.xlu0 %v4715_v35  ;;  %624 = vmax.xlane.f32.xlu1 %v4718_v6  ;;  %6105 = vst [vmem:[#allocation36_spill] sm:$0xff] %v4739_v14  ;;  %6106 = vst [vmem:[#allocation37_spill] sm:$0xff] %v4742_v21  ;;  %v1000_v58 = vadd.f32 %v4668_v39, %v4559_v53  ;;  %v999_v38 = vadd.f32 %v4668_v39, %v4535_v36  ;;  %v4778_v53 = vld [vmem:[%s6006_s1 + $0x30] sm:$0xff] }
 0x395   :  { %v4765_v57 = vadd.f32 %v593_v56, %v4751_v5  ;;  %v4768_v23 = vadd.f32 %v592_v15, %v4756_v49  ;;  %v595_v51 = vmax.f32 %v563_v61, %v579_v31  ;;  %v594_v12 = vmax.f32 %v562_v54, %v578_v34 }
 0x396   :  { %v1030_v36 = vmax.f32 %v998_v8, %v1014_v59  ;;  %v1029_v56 = vmax.f32 %v997_v19, %v1013_v44  ;;  %v1016_v15 = vmul.f32 0.2, %v1000_v58  ;;  %v565_v31 = vadd.f32 %v4665_v47, %v4623_v52 }
 0x397   :  { %v4786_v54 = vadd.f32 %v594_v12, %v4778_v53  ;;  %v564_v34 = vadd.f32 %v4665_v47, %v4611_v10  ;;  %v567_v52 = vadd.f32 %v4665_v47, %v4613_v4  ;;  %v566_v10 = vadd.f32 %v4665_v47, %v4593_v2 }
 0x398   :  { %1059 = vmax.xlane.f32.xlu0 %v4727_v42  ;;  %1057 = vmax.xlane.f32.xlu1 %v4730_v9  ;;  %v4795_v8 = vadd.f32 %v1030_v36, %v4751_v5  ;;  %v4798_v19 = vadd.f32 %v1029_v56, %v4756_v49  ;;  %v1032_v59 = vmax.f32 %v1000_v58, %v1016_v15 }
 0x399   :  { %v580_v12 = vmul.f32 0.2, %v564_v34  ;;  %v1001_v58 = vadd.f32 %v4668_v39, %v4605_v7  ;;  %v583_v15 = vmul.f32 0.2, %v567_v52  ;;  %v582_v2 = vmul.f32 0.2, %v566_v10 }
 0x39a   :  { %6108 = vst [vmem:[#allocation39_spill] sm:$0xff] %v4795_v8  ;;  %6109 = vst [vmem:[#allocation40_spill] sm:$0xff] %v4798_v19 }
 0x39b   :  { %v1017_v7 = vmul.f32 0.2, %v1001_v58 }
 0x39c   :  { %1063 = vmax.xlane.f32.xlu0 %v4739_v14  ;;  %1061 = vmax.xlane.f32.xlu1 %v4742_v21  ;;  %v4773_v21 = vld [vmem:[%s6006_s1 + $0x38] sm:$0xff]  ;;  %v1015_v14 = vmul.f32 0.2, %v999_v38 }
 0x39d   :  { %v4783_v61 = vadd.f32 %v595_v51, %v4773_v21  ;;  %v581_v51 = vmul.f32 0.2, %v565_v31  ;;  %v4807_v36 = vadd.f32 %v1032_v59, %v4773_v21  ;;  %v4824_v59 = vld [vmem:[%s6006_s1 + $0x40] sm:$0xff] }
 0x39e   :  { %v1031_v44 = vmax.f32 %v999_v38, %v1015_v14  ;;  %v1002_v14 = vadd.f32 %v4668_v39, %v4621_v25  ;;  %v596_v38 = vmax.f32 %v564_v34, %v580_v12  ;;  %v1003_v34 = vadd.f32 %v4668_v39, %v4597_v3  ;;  %v542_v3 = vpop.permute.xlu1 %541 }
 0x39f   :  { %6107 = vst [vmem:[#allocation38_spill] sm:$0xff] %v4783_v61  ;;  %6110 = vst [vmem:[#allocation41_spill] sm:$0xff] %v4807_v36  ;;  %v597_v4 = vmax.f32 %v565_v31, %v581_v51  ;;  %v1004_v31 = vadd.f32 %v4668_v39, %v4615_v16  ;;  %v599_v12 = vmax.f32 %v567_v52, %v583_v15  ;;  %v4846_v16 = vld [vmem:[%s6006_s1 + $0x50] sm:$0xff] }
 0x3a0   :  { %630 = vmax.xlane.f32.xlu0 %v4765_v57  ;;  %628 = vmax.xlane.f32.xlu1 %v4768_v23  ;;  %v4810_v56 = vadd.f32 %v1031_v44, %v4778_v53  ;;  %v1018_v25 = vmul.f32 0.2, %v1002_v14  ;;  %v4836_v51 = vadd.f32 %v596_v38, %v4824_v59  ;;  %v1033_v38 = vmax.f32 %v1001_v58, %v1017_v7 }
 0x3a1   :  { %v1019_v52 = vmul.f32 0.2, %v1003_v34 }
 0x3a2   :  { %6111 = vst [vmem:[#allocation42_spill] sm:$0xff] %v4810_v56  ;;  %v4865_v58 = vadd.f32 %v1033_v38, %v4824_v59 }
 0x3a3   :  { %v1035_v7 = vmax.f32 %v1003_v34, %v1019_v52  ;;  %v4887_v52 = vld [vmem:[%s6006_s1 + $0x68] sm:$0xff] }
 0x3a4   :  { %634 = vmax.xlane.f32.xlu0 %v4783_v61  ;;  %632 = vmax.xlane.f32.xlu1 %v4786_v54  ;;  %v568_v61 = vadd.f32 %v4665_v47, %v4650_v45  ;;  %6113 = vst [vmem:[#allocation44_spill] sm:$0xff] %v4865_v58  ;;  %v570_v45 = vadd.f32 %v4665_v47, %v4629_v37 }
 0x3a6   :  { %v586_v38 = vmul.f32 0.2, %v570_v45 }
 0x3a8   :  { %1067 = vmax.xlane.f32.xlu0 %v4795_v8  ;;  %1065 = vmax.xlane.f32.xlu1 %v4798_v19  ;;  %v4819_v19 = vld [vmem:[%s6006_s1 + $0x48] sm:$0xff]  ;;  %v598_v8 = vmax.f32 %v566_v10, %v582_v2  ;;  %v569_v2 = vadd.f32 %v4665_v47, %v542_v3  ;;  %v571_v3 = vadd.f32 %v4665_v47, %v4652_v24 }
 0x3a9   :  { %v4833_v44 = vadd.f32 %v597_v4, %v4819_v19  ;;  %v1034_v4 = vmax.f32 %v1002_v14, %v1018_v25  ;;  %v1005_v24 = vadd.f32 %v4668_v39, %v4637_v41 }
 0x3aa   :  { %v4854_v15 = vadd.f32 %v598_v8, %v4846_v16  ;;  %v584_v8 = vmul.f32 0.2, %v568_v61  ;;  %v587_v47 = vmul.f32 0.2, %v571_v3 }
 0x3ab   :  { %v4862_v14 = vadd.f32 %v1034_v4, %v4819_v19 }
 0x3ac   :  { %1071 = vmax.xlane.f32.xlu0 %v4807_v36  ;;  %1069 = vmax.xlane.f32.xlu1 %v4810_v56  ;;  %v4841_v56 = vld [vmem:[%s6006_s1 + $0x58] sm:$0xff]  ;;  %v1020_v36 = vmul.f32 0.2, %v1004_v31  ;;  %v600_v37 = vmax.f32 %v568_v61, %v584_v8  ;;  %v1008_v61 = vadd.f32 %v4668_v39, %v4643_v11  ;;  %v4917_v11 = vld [vmem:[%s6006_s1 + $0x70] sm:$0xff] }
 0x3ad   :  { %v4851_v10 = vadd.f32 %v599_v12, %v4841_v56  ;;  %v585_v12 = vmul.f32 0.2, %v569_v2 }
 0x3ae   :  { %v1036_v25 = vmax.f32 %v1004_v31, %v1020_v36  ;;  %v4878_v36 = vadd.f32 %v1035_v7, %v4846_v16  ;;  %v1006_v31 = vadd.f32 %v4668_v39, %v4656_v60  ;;  %v1021_v60 = vmul.f32 0.2, %v1005_v24 }
 0x3af   :  { %6112 = vst [vmem:[#allocation43_spill] sm:$0xff] %v4851_v10  ;;  %v601_v34 = vmax.f32 %v569_v2, %v585_v12  ;;  %v1007_v2 = vadd.f32 %v4668_v39, %v4631_v46  ;;  %v1989_v46 = vsub.s32 3, %v4654_v50 }
 0x3b0   :  { %638 = vmax.xlane.f32.xlu0 %v4833_v44  ;;  %636 = vmax.xlane.f32.xlu1 %v4836_v51  ;;  %v4875_v4 = vadd.f32 %v1036_v25, %v4841_v56  ;;  %6114 = vst [vmem:[#allocation45_spill] sm:$0xff] %v4878_v36  ;;  %v4892_v25 = vld [vmem:[%s6006_s1 + $0x60] sm:$0xff]  ;;  %v1022_v41 = vmul.f32 0.2, %v1006_v31 }
 0x3b1   :  { %v4904_v12 = vadd.f32 %v601_v34, %v4887_v52  ;;  %v4907_v8 = vadd.f32 %v600_v37, %v4892_v25  ;;  %v1037_v34 = vmax.f32 %v1005_v24, %v1021_v60 }
 0x3b2   :  { %v1038_v39 = vmax.f32 %v1006_v31, %v1022_v41 }
 0x3b3   :  { %6115 = vst [vmem:[#allocation46_spill] sm:$0xff] %v4904_v12  ;;  %v4941_v24 = vadd.f32 %v1037_v34, %v4892_v25 }
 0x3b4   :  { %642 = vmax.xlane.f32.xlu0 %v4851_v10  ;;  %640 = vmax.xlane.f32.xlu1 %v4854_v15  ;;  %v1494_v10 = vsub.s32 2, %v4654_v50  ;;  %v4938_v31 = vadd.f32 %v1038_v39, %v4887_v52 }
 0x3b6   :  { %v4895_v7 = vrot.slane %v4660_v29, %v1494_v10  ;;  %v603_v10 = vmax.f32 %v571_v3, %v587_v47  ;;  %v1024_v3 = vmul.f32 0.2, %v1008_v61 }
 0x3b8   :  { %1075 = vmax.xlane.f32.xlu0 %v4862_v14  ;;  %1073 = vmax.xlane.f32.xlu1 %v4865_v58  ;;  %v602_v58 = vmax.f32 %v570_v45, %v586_v38  ;;  %v1023_v45 = vmul.f32 0.2, %v1007_v2  ;;  %v1497_v38 = vadd.f32 %v4895_v7, %v4521_v32  ;;  %v1496_v50 = vadd.f32 %v4895_v7, %v4491_v20 }
 0x3b9   :  { %v1499_v20 = vadd.f32 %v4895_v7, %v4509_v27 }
 0x3ba   :  { %v4926_v47 = vadd.f32 %v602_v58, %v4917_v11  ;;  %v1040_v58 = vmax.f32 %v1008_v61, %v1024_v3  ;;  %v1039_v41 = vmax.f32 %v1007_v2, %v1023_v45  ;;  %v1513_v60 = vmul.f32 0.2, %v1497_v38 }
 0x3bb   :  { %v1512_v32 = vmul.f32 0.2, %v1496_v50  ;;  %v1515_v34 = vmul.f32 0.2, %v1499_v20 }
 0x3bc   :  { %1079 = vmax.xlane.f32.xlu0 %v4875_v4  ;;  %1077 = vmax.xlane.f32.xlu1 %v4878_v36  ;;  %v4912_v36 = vld [vmem:[%s6006_s1 + $0x78] sm:$0xff]  ;;  %v1529_v27 = vmax.f32 %v1497_v38, %v1513_v60 }
 0x3bd   :  { %v4923_v37 = vadd.f32 %v603_v10, %v4912_v36  ;;  %v4950_v10 = vadd.f32 %v1040_v58, %v4912_v36  ;;  %v1528_v39 = vmax.f32 %v1496_v50, %v1512_v32  ;;  %v1531_v50 = vmax.f32 %v1499_v20, %v1515_v34 }
 0x3be   :  { %v1500_v20 = vadd.f32 %v4895_v7, %v4550_v48  ;;  %v1502_v48 = vadd.f32 %v4895_v7, %v4538_v40 }
 0x3bf   :  { %6116 = vst [vmem:[#allocation47_spill] sm:$0xff] %v4950_v10 }
 0x3c0   :  { %646 = vmax.xlane.f32.xlu0 %v4904_v12  ;;  %644 = vmax.xlane.f32.xlu1 %v4907_v8  ;;  %v4933_v12 = vrot.slane %v4660_v29, %v1989_v46  ;;  %v1498_v29 = vadd.f32 %v4895_v7, %v4479_v17  ;;  %v4953_v46 = vadd.f32 %v1039_v41, %v4917_v11  ;;  %v1518_v40 = vmul.f32 0.2, %v1502_v48 }
 0x3c2   :  { %6117 = vst [vmem:[#allocation48_spill] sm:$0xff] %v4953_v46  ;;  %v1992_v61 = vadd.f32 %v4933_v12, %v4527_v33  ;;  %v1991_v2 = vadd.f32 %v4933_v12, %v4497_v22  ;;  %v1514_v17 = vmul.f32 0.2, %v1498_v29  ;;  %v1994_v58 = vadd.f32 %v4933_v12, %v4514_v28 }
 0x3c3   :  { %v1993_v41 = vadd.f32 %v4933_v12, %v4483_v18  ;;  %v4966_v33 = vadd.f32 %v1529_v27, %v4685_v30  ;;  %v4969_v22 = vadd.f32 %v1528_v39, %v4690_v13  ;;  %v4974_v28 = vadd.f32 %v1531_v50, %v4705_v0  ;;  %v6119_v50 = vld [vmem:[#allocation20_spill] sm:$0xff] }
 0x3c4   :  { %650 = vmax.xlane.f32.xlu0 %v4923_v37  ;;  %648 = vmax.xlane.f32.xlu1 %v4926_v47  ;;  %v2008_v3 = vmul.f32 0.2, %v1992_v61  ;;  %v2007_v45 = vmul.f32 0.2, %v1991_v2  ;;  %v1530_v38 = vmax.f32 %v1498_v29, %v1514_v17  ;;  %v1501_v27 = vadd.f32 %v4895_v7, %v4584_v62 }
 0x3c5   :  { %v1516_v17 = vmul.f32 0.2, %v1500_v20  ;;  %v1503_v62 = vadd.f32 %v4895_v7, %v4565_v55 }
 0x3c6   :  { %v2024_v60 = vmax.f32 %v1992_v61, %v2008_v3  ;;  %v2023_v32 = vmax.f32 %v1991_v2, %v2007_v45  ;;  %v4977_v18 = vadd.f32 %v1530_v38, %v4710_v26  ;;  %v1517_v34 = vmul.f32 0.2, %v1501_v27  ;;  %v6120_v38 = vld [vmem:[#allocation18_spill] sm:$0xff] }
 0x3c7   :  { %v1532_v45 = vmax.f32 %v1500_v20, %v1516_v17  ;;  %v1534_v20 = vmax.f32 %v1502_v48, %v1518_v40 }
 0x3c8   :  { %1083 = vmax.xlane.f32.xlu0 %v4938_v31  ;;  %1081 = vmax.xlane.f32.xlu1 %v4941_v24  ;;  %v4986_v29 = vadd.f32 %v2024_v60, %v4685_v30  ;;  %v4989_v61 = vadd.f32 %v2023_v32, %v4690_v13  ;;  %v1533_v55 = vmax.f32 %v1501_v27, %v1517_v34 }
 0x3c9   :  { %v1997_v60 = vadd.f32 %v4933_v12, %v6120_v38  ;;  %v5017_v32 = vadd.f32 %v1532_v45, %v4756_v49  ;;  %v6122_v38 = vld [vmem:[#allocation23_spill] sm:$0xff] }
 0x3cb   :  { %v2013_v17 = vmul.f32 0.2, %v1997_v60 }
 0x3cc   :  { %1087 = vmax.xlane.f32.xlu0 %v4950_v10  ;;  %1085 = vmax.xlane.f32.xlu1 %v4953_v46  ;;  %v2010_v46 = vmul.f32 0.2, %v1994_v58  ;;  %v2009_v10 = vmul.f32 0.2, %v1993_v41 }
 0x3ce   :  { %v2026_v2 = vmax.f32 %v1994_v58, %v2010_v46  ;;  %v2025_v39 = vmax.f32 %v1993_v41, %v2009_v10  ;;  %v1996_v10 = vadd.f32 %v4933_v12, %v4589_v1  ;;  %v6118_v46 = vld [vmem:[#allocation19_spill] sm:$0xff]  ;;  %v1519_v58 = vmul.f32 0.2, %v1503_v62 }
 0x3cf   :  { %v1995_v3 = vadd.f32 %v4933_v12, %v6118_v46  ;;  %v5014_v1 = vadd.f32 %v1533_v55, %v4751_v5  ;;  %v6121_v55 = vld [vmem:[#allocation27_spill] sm:$0xff] }
 0x3d0   :  { %1562 = vmax.xlane.f32.xlu0 %v4966_v33  ;;  %1560 = vmax.xlane.f32.xlu1 %v4969_v22  ;;  %v4998_v30 = vadd.f32 %v2026_v2, %v4705_v0  ;;  %v5001_v13 = vadd.f32 %v2025_v39, %v4710_v26  ;;  %v2012_v41 = vmul.f32 0.2, %v1996_v10  ;;  %v1998_v26 = vadd.f32 %v4933_v12, %v6119_v50 }
 0x3d1   :  { %v2011_v0 = vmul.f32 0.2, %v1995_v3  ;;  %v1535_v27 = vmax.f32 %v1503_v62, %v1519_v58  ;;  %v5025_v50 = vadd.f32 %v1534_v20, %v4778_v53  ;;  %v1505_v45 = vadd.f32 %v4895_v7, %v6121_v55  ;;  %v6126_v20 = vld [vmem:[#allocation21_spill] sm:$0xff] }
 0x3d2   :  { %v2028_v2 = vmax.f32 %v1996_v10, %v2012_v41  ;;  %v2014_v34 = vmul.f32 0.2, %v1998_v26  ;;  %v1504_v62 = vadd.f32 %v4895_v7, %v6122_v38  ;;  %v2029_v58 = vmax.f32 %v1997_v60, %v2013_v17 }
 0x3d3   :  { %v2027_v39 = vmax.f32 %v1995_v3, %v2011_v0  ;;  %v5022_v46 = vadd.f32 %v1535_v27, %v4773_v21  ;;  %v1521_v40 = vmul.f32 0.2, %v1505_v45  ;;  %v6125_v0 = vld [vmem:[#allocation26_spill] sm:$0xff]  ;;  %v1506_v55 = vadd.f32 %v4895_v7, %v6126_v20 }
 0x3d4   :  { %1566 = vmax.xlane.f32.xlu0 %v4974_v28  ;;  %1564 = vmax.xlane.f32.xlu1 %v4977_v18  ;;  %v5034_v48 = vadd.f32 %v2028_v2, %v4751_v5  ;;  %v2030_v3 = vmax.f32 %v1998_v26, %v2014_v34  ;;  %v1520_v41 = vmul.f32 0.2, %v1504_v62  ;;  %v1507_v27 = vadd.f32 %v4895_v7, %v6125_v0  ;;  %v6129_v26 = vld [vmem:[#allocation28_spill] sm:$0xff] }
 0x3d5   :  { %v5037_v10 = vadd.f32 %v2027_v39, %v4756_v49  ;;  %v5049_v49 = vadd.f32 %v2029_v58, %v4778_v53  ;;  %v2000_v60 = vadd.f32 %v4933_v12, %v6129_v26  ;;  %v6130_v2 = vld [vmem:[#allocation24_spill] sm:$0xff]  ;;  %v1537_v34 = vmax.f32 %v1505_v45, %v1521_v40  ;;  %v6132_v58 = vld [vmem:[#allocation22_spill] sm:$0xff] }
 0x3d6   :  { %6123 = vst [vmem:[#allocation19_spill] sm:$0xff] %v5034_v48  ;;  %v5046_v5 = vadd.f32 %v2030_v3, %v4773_v21  ;;  %v1999_v39 = vadd.f32 %v4933_v12, %v6130_v2  ;;  %v1536_v17 = vmax.f32 %v1504_v62, %v1520_v41  ;;  %v1523_v38 = vmul.f32 0.2, %v1507_v27  ;;  %v6131_v3 = vld [vmem:[#allocation25_spill] sm:$0xff]  ;;  %v1482_v41 = vpop.permute.xlu1 %1481 }
 0x3d7   :  { %6124 = vst [vmem:[#allocation20_spill] sm:$0xff] %v5037_v10  ;;  %6128 = vst [vmem:[#allocation27_spill] sm:$0xff] %v5049_v49  ;;  %v1522_v0 = vmul.f32 0.2, %v1506_v55  ;;  %v2016_v20 = vmul.f32 0.2, %v2000_v60  ;;  %v2002_v53 = vadd.f32 %v4933_v12, %v6131_v3  ;;  %v5062_v26 = vadd.f32 %v1537_v34, %v4819_v19 }
 0x3d8   :  { %2057 = vmax.xlane.f32.xlu0 %v4986_v29  ;;  %2055 = vmax.xlane.f32.xlu1 %v4989_v61  ;;  %6127 = vst [vmem:[#allocation18_spill] sm:$0xff] %v5046_v5  ;;  %v2015_v21 = vmul.f32 0.2, %v1999_v39  ;;  %v5065_v45 = vadd.f32 %v1536_v17, %v4824_v59  ;;  %v1539_v62 = vmax.f32 %v1507_v27, %v1523_v38 }
 0x3d9   :  { %v1538_v40 = vmax.f32 %v1506_v55, %v1522_v0  ;;  %v2032_v2 = vmax.f32 %v2000_v60, %v2016_v20  ;;  %v1509_v17 = vadd.f32 %v4895_v7, %v1482_v41 }
 0x3db   :  { %v5073_v34 = vadd.f32 %v1538_v40, %v4846_v16  ;;  %v5081_v55 = vadd.f32 %v2032_v2, %v4819_v19  ;;  %v1525_v0 = vmul.f32 0.2, %v1509_v17  ;;  %v6135_v40 = vld [vmem:[#allocation29_spill] sm:$0xff] }
 0x3dc   :  { %2061 = vmax.xlane.f32.xlu0 %v4998_v30  ;;  %2059 = vmax.xlane.f32.xlu1 %v5001_v13  ;;  %v1510_v41 = vadd.f32 %v4895_v7, %v6135_v40 }
 0x3e0   :  { %1570 = vmax.xlane.f32.xlu0 %v5014_v1  ;;  %1568 = vmax.xlane.f32.xlu1 %v5017_v32 }
 0x3e4   :  { %1574 = vmax.xlane.f32.xlu0 %v5022_v46  ;;  %1572 = vmax.xlane.f32.xlu1 %v5025_v50 }
 0x3e8   :  { %2065 = vmax.xlane.f32.xlu0 %v5034_v48  ;;  %2063 = vmax.xlane.f32.xlu1 %v5037_v10  ;;  %v2001_v48 = vadd.f32 %v4933_v12, %v6132_v58  ;;  %v5070_v10 = vadd.f32 %v1539_v62, %v4841_v56  ;;  %v6133_v58 = vld [vmem:[#allocation31_spill] sm:$0xff] }
 0x3e9   :  { %v1508_v27 = vadd.f32 %v4895_v7, %v6133_v58  ;;  %v1977_v58 = vpop.permute.xlu1 %1976 }
 0x3ea   :  { %v2017_v3 = vmul.f32 0.2, %v2001_v48 }
 0x3eb   :  { %v1524_v20 = vmul.f32 0.2, %v1508_v27 }
 0x3ec   :  { %2069 = vmax.xlane.f32.xlu0 %v5046_v5  ;;  %2067 = vmax.xlane.f32.xlu1 %v5049_v49  ;;  %v2031_v5 = vmax.f32 %v1999_v39, %v2015_v21  ;;  %v2018_v49 = vmul.f32 0.2, %v2002_v53  ;;  %v2033_v38 = vmax.f32 %v2001_v48, %v2017_v3  ;;  %v6134_v21 = vld [vmem:[#allocation33_spill] sm:$0xff]  ;;  %v2004_v48 = vadd.f32 %v4933_v12, %v1977_v58 }
 0x3ed   :  { %v1511_v62 = vadd.f32 %v4895_v7, %v6134_v21  ;;  %v1540_v2 = vmax.f32 %v1508_v27, %v1524_v20  ;;  %v1526_v7 = vmul.f32 0.2, %v1510_v41 }
 0x3ee   :  { %v5084_v60 = vadd.f32 %v2031_v5, %v4824_v59  ;;  %v2034_v39 = vmax.f32 %v2002_v53, %v2018_v49  ;;  %v5096_v59 = vadd.f32 %v2033_v38, %v4846_v16  ;;  %v6137_v5 = vld [vmem:[#allocation32_spill] sm:$0xff]  ;;  %v1541_v53 = vmax.f32 %v1509_v17, %v1525_v0  ;;  %v6139_v16 = vld [vmem:[#allocation30_spill] sm:$0xff] }
 0x3ef   :  { %v2003_v49 = vadd.f32 %v4933_v12, %v6137_v5  ;;  %v1527_v3 = vmul.f32 0.2, %v1511_v62  ;;  %v2020_v21 = vmul.f32 0.2, %v2004_v48  ;;  %v2005_v38 = vadd.f32 %v4933_v12, %v6139_v16 }
 0x3f0   :  { %1578 = vmax.xlane.f32.xlu0 %v5062_v26  ;;  %1576 = vmax.xlane.f32.xlu1 %v5065_v45  ;;  %v5093_v19 = vadd.f32 %v2034_v39, %v4841_v56  ;;  %6136 = vst [vmem:[#allocation23_spill] sm:$0xff] %v5096_v59  ;;  %v6138_v56 = vld [vmem:[#allocation34_spill] sm:$0xff]  ;;  %v5108_v58 = vadd.f32 %v1541_v53, %v4887_v52 }
 0x3f1   :  { %v2019_v40 = vmul.f32 0.2, %v2003_v49  ;;  %v2006_v39 = vadd.f32 %v4933_v12, %v6138_v56  ;;  %v5111_v17 = vadd.f32 %v1540_v2, %v4892_v25  ;;  %v1543_v27 = vmax.f32 %v1511_v62, %v1527_v3 }
 0x3f2   :  { %v1542_v0 = vmax.f32 %v1510_v41, %v1526_v7  ;;  %v2036_v20 = vmax.f32 %v2004_v48, %v2020_v21  ;;  %v2021_v53 = vmul.f32 0.2, %v2005_v38 }
 0x3f3   :  { %v2022_v5 = vmul.f32 0.2, %v2006_v39  ;;  %v2035_v12 = vmax.f32 %v2003_v49, %v2019_v40 }
 0x3f4   :  { %1582 = vmax.xlane.f32.xlu0 %v5070_v10  ;;  %1580 = vmax.xlane.f32.xlu1 %v5073_v34  ;;  %v5119_v56 = vadd.f32 %v1542_v0, %v4917_v11  ;;  %v5124_v62 = vadd.f32 %v2036_v20, %v4887_v52  ;;  %v2037_v2 = vmax.f32 %v2005_v38, %v2021_v53 }
 0x3f5   :  { %v5127_v41 = vadd.f32 %v2035_v12, %v4892_v25  ;;  %v2038_v48 = vmax.f32 %v2006_v39, %v2022_v5 }
 0x3f6   :  { %v5135_v49 = vadd.f32 %v2037_v2, %v4917_v11 }
 0x3f7   :  { %v5132_v3 = vadd.f32 %v2038_v48, %v4912_v36 }
 0x3f8   :  { %2073 = vmax.xlane.f32.xlu0 %v5081_v55  ;;  %2071 = vmax.xlane.f32.xlu1 %v5084_v60  ;;  %6141 = vst [vmem:[#allocation21_spill] sm:$0xff] %v5135_v49 }
 0x3f9   :  { %6140 = vst [vmem:[#allocation26_spill] sm:$0xff] %v5132_v3 }
 0x3fc   :  { %2077 = vmax.xlane.f32.xlu0 %v5093_v19  ;;  %2075 = vmax.xlane.f32.xlu1 %v5096_v59  ;;  %v5116_v59 = vadd.f32 %v1543_v27, %v4912_v36 }
 0x400   :  { %1586 = vmax.xlane.f32.xlu0 %v5108_v58  ;;  %1584 = vmax.xlane.f32.xlu1 %v5111_v17 }
 0x404   :  { %1590 = vmax.xlane.f32.xlu0 %v5116_v59  ;;  %1588 = vmax.xlane.f32.xlu1 %v5119_v56 }
 0x408   :  { %2081 = vmax.xlane.f32.xlu0 %v5124_v62  ;;  %2079 = vmax.xlane.f32.xlu1 %v5127_v41 }
 0x40c   :  { %2085 = vmax.xlane.f32.xlu0 %v5132_v3  ;;  %2083 = vmax.xlane.f32.xlu1 %v5135_v49 }
 0x41d   :  { %v623_v52 = vpop.xlane.xlu0 %622  ;;  %v621_v7 = vpop.xlane.xlu1 %620 }
 0x41e   :  { %v653_v25 = vsub.f32 %v4697_v63, %v623_v52  ;;  %v652_v21 = vsub.f32 %v4700_v43, %v621_v7  ;;  %v6142_v52 = vld [vmem:[#allocation36_spill] sm:$0xff]  ;;  %v6143_v7 = vld [vmem:[#allocation37_spill] sm:$0xff] }
 0x420   :  { %v670_v40 = vmul.f32 1.442695, %v653_v25  ;;  %v668_v39 = vmul.f32 1.442695, %v652_v21 }
 0x421   :  { %v627_v16 = vpop.xlane.xlu0 %626  ;;  %v625_v38 = vpop.xlane.xlu1 %624 }
 0x422   :  { %3837 = vpow2.f32 %v670_v40  ;;  %v655_v36 = vsub.f32 %v4715_v35, %v627_v16  ;;  %v654_v11 = vsub.f32 %v4718_v6, %v625_v38 }
 0x423   :  { %3839 = vpow2.f32 %v668_v39 }
 0x424   :  { %v674_v27 = vmul.f32 1.442695, %v655_v36  ;;  %v672_v0 = vmul.f32 1.442695, %v654_v11 }
 0x425   :  { %v1060_v20 = vpop.xlane.xlu0 %1059  ;;  %v1058_v5 = vpop.xlane.xlu1 %1057 }
 0x426   :  { %3841 = vpow2.f32 %v674_v27  ;;  %v1090_v12 = vsub.f32 %v4727_v42, %v1060_v20  ;;  %v1089_v63 = vsub.f32 %v4730_v9, %v1058_v5 }
 0x427   :  { %3843 = vpow2.f32 %v672_v0 }
 0x428   :  { %v1107_v43 = vmul.f32 1.442695, %v1090_v12  ;;  %v1105_v53 = vmul.f32 1.442695, %v1089_v63  ;;  %v6144_v12 = vld [vmem:[#allocation38_spill] sm:$0xff] }
 0x429   :  { %v1064_v48 = vpop.xlane.xlu0 %1063  ;;  %v1062_v2 = vpop.xlane.xlu1 %1061 }
 0x42a   :  { %3845 = vpow2.f32 %v1107_v43  ;;  %v1092_v35 = vsub.f32 %v6142_v52, %v1064_v48  ;;  %v1091_v6 = vsub.f32 %v6143_v7, %v1062_v2  ;;  %v6145_v52 = vld [vmem:[#allocation39_spill] sm:$0xff]  ;;  %v6146_v7 = vld [vmem:[#allocation40_spill] sm:$0xff] }
 0x42b   :  { %3847 = vpow2.f32 %v1105_v53 }
 0x42c   :  { %v5147_v25 = vpop.eup %3837  ;;  %v1109_v21 = vmul.f32 1.442695, %v1091_v6  ;;  %v1111_v39 = vmul.f32 1.442695, %v1092_v35 }
 0x42d   :  { %v5149_v40 = vpop.eup %3839  ;;  %702 = vadd.xlane.f32.xlu0 %v5147_v25  ;;  %v631_v42 = vpop.xlane.xlu0 %630 }
 0x42e   :  { %v629_v9 = vpop.xlane.xlu1 %628  ;;  %v657_v16 = vsub.f32 %v4765_v57, %v631_v42  ;;  %700 = vadd.xlane.f32.xlu1 %v5149_v40  ;;  %3849 = vpow2.f32 %v1109_v21 }
 0x42f   :  { %v656_v38 = vsub.f32 %v4768_v23, %v629_v9  ;;  %3851 = vpow2.f32 %v1111_v39 }
 0x430   :  { %v5155_v36 = vpop.eup %3841  ;;  %v678_v5 = vmul.f32 1.442695, %v657_v16 }
 0x431   :  { %v676_v11 = vmul.f32 1.442695, %v656_v38  ;;  %v5157_v27 = vpop.eup %3843  ;;  %706 = vadd.xlane.f32.xlu0 %v5155_v36  ;;  %v635_v0 = vpop.xlane.xlu0 %634  ;;  %v6147_v38 = vld [vmem:[#allocation41_spill] sm:$0xff] }
 0x432   :  { %v633_v20 = vpop.xlane.xlu1 %632  ;;  %704 = vadd.xlane.f32.xlu1 %v5157_v27  ;;  %v659_v63 = vsub.f32 %v6144_v12, %v635_v0  ;;  %v6148_v0 = vld [vmem:[#allocation42_spill] sm:$0xff] }
 0x433   :  { %v658_v57 = vsub.f32 %v4786_v54, %v633_v20  ;;  %3853 = vpow2.f32 %v676_v11 }
 0x434   :  { %v5163_v23 = vpop.eup %3845  ;;  %3855 = vpow2.f32 %v678_v5  ;;  %v682_v54 = vmul.f32 1.442695, %v659_v63 }
 0x435   :  { %v680_v43 = vmul.f32 1.442695, %v658_v57  ;;  %v5165_v53 = vpop.eup %3847  ;;  %1139 = vadd.xlane.f32.xlu0 %v5163_v23  ;;  %v1068_v48 = vpop.xlane.xlu0 %1067 }
 0x436   :  { %v1066_v2 = vpop.xlane.xlu1 %1065  ;;  %v1094_v35 = vsub.f32 %v6145_v52, %v1068_v48  ;;  %1137 = vadd.xlane.f32.xlu1 %v5165_v53 }
 0x437   :  { %v1093_v6 = vsub.f32 %v6146_v7, %v1066_v2  ;;  %3857 = vpow2.f32 %v680_v43 }
 0x438   :  { %v1115_v21 = vmul.f32 1.442695, %v1094_v35  ;;  %v5171_v42 = vpop.eup %3849 }
 0x439   :  { %v1072_v9 = vpop.xlane.xlu0 %1071  ;;  %v1113_v16 = vmul.f32 1.442695, %v1093_v6  ;;  %1141 = vadd.xlane.f32.xlu0 %v5171_v42  ;;  %v5176_v5 = vpop.eup %3851 }
 0x43a   :  { %v1070_v39 = vpop.xlane.xlu1 %1069  ;;  %3859 = vpow2.f32 %v1115_v21  ;;  %v1096_v11 = vsub.f32 %v6147_v38, %v1072_v9 }
 0x43b   :  { %v1095_v20 = vsub.f32 %v6148_v0, %v1070_v39  ;;  %3861 = vpow2.f32 %v682_v54  ;;  %v6149_v39 = vld [vmem:[#allocation43_spill] sm:$0xff] }
 0x43c   :  { %3863 = vpow2.f32 %v1113_v16  ;;  %v1119_v48 = vmul.f32 1.442695, %v1096_v11 }
 0x43d   :  { %v1117_v57 = vmul.f32 1.442695, %v1095_v20  ;;  %v5178_v12 = vpop.eup %3853  ;;  %v639_v63 = vpop.xlane.xlu0 %638  ;;  %1143 = vadd.xlane.f32.xlu0 %v5176_v5 }
 0x43e   :  { %v637_v43 = vpop.xlane.xlu1 %636  ;;  %v661_v2 = vsub.f32 %v4833_v44, %v639_v63  ;;  %708 = vadd.xlane.f32.xlu1 %v5178_v12  ;;  %v5184_v35 = vpop.eup %3855  ;;  %v6150_v63 = vld [vmem:[#allocation44_spill] sm:$0xff] }
 0x43f   :  { %v660_v52 = vsub.f32 %v4836_v51, %v637_v43  ;;  %3865 = vpow2.f32 %v1117_v57 }
 0x440   :  { %3867 = vpow2.f32 %v1119_v48  ;;  %v686_v9 = vmul.f32 1.442695, %v661_v2 }
 0x441   :  { %v684_v7 = vmul.f32 1.442695, %v660_v52  ;;  %v5186_v6 = vpop.eup %3857  ;;  %v643_v54 = vpop.xlane.xlu0 %642  ;;  %710 = vadd.xlane.f32.xlu0 %v5184_v35 }
 0x442   :  { %v641_v21 = vpop.xlane.xlu1 %640  ;;  %712 = vadd.xlane.f32.xlu1 %v5186_v6  ;;  %v663_v16 = vsub.f32 %v6149_v39, %v643_v54 }
 0x443   :  { %v662_v44 = vsub.f32 %v4854_v15, %v641_v21  ;;  %3869 = vpow2.f32 %v684_v7 }
 0x444   :  { %v5192_v51 = vpop.eup %3859  ;;  %3871 = vpow2.f32 %v686_v9  ;;  %v690_v15 = vmul.f32 1.442695, %v663_v16 }
 0x445   :  { %v688_v38 = vmul.f32 1.442695, %v662_v44  ;;  %v5194_v11 = vpop.eup %3861  ;;  %v1076_v0 = vpop.xlane.xlu0 %1075  ;;  %1147 = vadd.xlane.f32.xlu0 %v5192_v51 }
 0x446   :  { %v1074_v20 = vpop.xlane.xlu1 %1073  ;;  %v1098_v57 = vsub.f32 %v4862_v14, %v1076_v0  ;;  %714 = vadd.xlane.f32.xlu1 %v5194_v11  ;;  %v5200_v48 = vpop.eup %3863  ;;  %v6151_v14 = vld [vmem:[#allocation45_spill] sm:$0xff] }
 0x447   :  { %v1097_v43 = vsub.f32 %v6150_v63, %v1074_v20  ;;  %3873 = vpow2.f32 %v688_v38  ;;  %v6152_v63 = vld [vmem:[#allocation46_spill] sm:$0xff] }
 0x448   :  { %v1123_v2 = vmul.f32 1.442695, %v1098_v57 }
 0x449   :  { %v5202_v52 = vpop.eup %3865  ;;  %v1080_v7 = vpop.xlane.xlu0 %1079  ;;  %v1121_v21 = vmul.f32 1.442695, %v1097_v43 }
 0x44a   :  { %v1078_v54 = vpop.xlane.xlu1 %1077  ;;  %3875 = vpow2.f32 %v1123_v2  ;;  %v1100_v9 = vsub.f32 %v4875_v4, %v1080_v7  ;;  %1145 = vadd.xlane.f32.xlu1 %v5200_v48  ;;  %1149 = vadd.xlane.f32.xlu0 %v5202_v52  ;;  %v5208_v39 = vpop.eup %3867 }
 0x44b   :  { %v1099_v44 = vsub.f32 %v6151_v14, %v1078_v54  ;;  %3877 = vpow2.f32 %v690_v15 }
 0x44c   :  { %3879 = vpow2.f32 %v1121_v21  ;;  %v1127_v57 = vmul.f32 1.442695, %v1100_v9 }
 0x44d   :  { %v1125_v16 = vmul.f32 1.442695, %v1099_v44  ;;  %v5210_v38 = vpop.eup %3869  ;;  %v647_v0 = vpop.xlane.xlu0 %646 }
 0x44e   :  { %v645_v20 = vpop.xlane.xlu1 %644  ;;  %v665_v43 = vsub.f32 %v6152_v63, %v647_v0  ;;  %1151 = vadd.xlane.f32.xlu0 %v5208_v39  ;;  %716 = vadd.xlane.f32.xlu1 %v5210_v38  ;;  %v5216_v2 = vpop.eup %3871 }
 0x44f   :  { %v664_v4 = vsub.f32 %v4907_v8, %v645_v20  ;;  %3881 = vpow2.f32 %v1125_v16 }
 0x450   :  { %3883 = vpow2.f32 %v1127_v57  ;;  %v694_v44 = vmul.f32 1.442695, %v665_v43 }
 0x451   :  { %v692_v15 = vmul.f32 1.442695, %v664_v4  ;;  %v5218_v7 = vpop.eup %3873  ;;  %v651_v54 = vpop.xlane.xlu0 %650 }
 0x452   :  { %v649_v14 = vpop.xlane.xlu1 %648  ;;  %718 = vadd.xlane.f32.xlu0 %v5216_v2  ;;  %720 = vadd.xlane.f32.xlu1 %v5218_v7  ;;  %v667_v9 = vsub.f32 %v4923_v37, %v651_v54 }
 0x453   :  { %v666_v21 = vsub.f32 %v4926_v47, %v649_v14  ;;  %3885 = vpow2.f32 %v692_v15 }
 0x454   :  { %v5224_v8 = vpop.eup %3875  ;;  %3887 = vpow2.f32 %v694_v44  ;;  %v698_v47 = vmul.f32 1.442695, %v667_v9  ;;  %v6153_v44 = vld [vmem:[#allocation47_spill] sm:$0xff] }
 0x455   :  { %v696_v16 = vmul.f32 1.442695, %v666_v21  ;;  %v5226_v0 = vpop.eup %3877  ;;  %v1084_v20 = vpop.xlane.xlu0 %1083 }
 0x456   :  { %v1082_v63 = vpop.xlane.xlu1 %1081  ;;  %v1102_v57 = vsub.f32 %v4938_v31, %v1084_v20  ;;  %1155 = vadd.xlane.f32.xlu0 %v5224_v8  ;;  %722 = vadd.xlane.f32.xlu1 %v5226_v0  ;;  %v5232_v4 = vpop.eup %3879  ;;  %v6154_v31 = vld [vmem:[#allocation48_spill] sm:$0xff] }
 0x457   :  { %v1101_v43 = vsub.f32 %v4941_v24, %v1082_v63  ;;  %3889 = vpow2.f32 %v696_v16 }
 0x458   :  { %v1131_v37 = vmul.f32 1.442695, %v1102_v57 }
 0x459   :  { %v5234_v15 = vpop.eup %3881  ;;  %v1088_v54 = vpop.xlane.xlu0 %1087  ;;  %v1129_v21 = vmul.f32 1.442695, %v1101_v43 }
 0x45a   :  { %v1086_v14 = vpop.xlane.xlu1 %1085  ;;  %3891 = vpow2.f32 %v1131_v37  ;;  %v1104_v3 = vsub.f32 %v6153_v44, %v1088_v54  ;;  %1153 = vadd.xlane.f32.xlu1 %v5232_v4  ;;  %1157 = vadd.xlane.f32.xlu0 %v5234_v15  ;;  %v5240_v24 = vpop.eup %3883 }
 0x45b   :  { %v1103_v20 = vsub.f32 %v6154_v31, %v1086_v14  ;;  %3893 = vpow2.f32 %v698_v47 }
 0x45c   :  { %3895 = vpow2.f32 %v1129_v21  ;;  %v1135_v49 = vmul.f32 1.442695, %v1104_v3 }
 0x45d   :  { %v1133_v9 = vmul.f32 1.442695, %v1103_v20  ;;  %v5242_v16 = vpop.eup %3885  ;;  %v1563_v63 = vpop.xlane.xlu0 %1562 }
 0x45e   :  { %v1561_v57 = vpop.xlane.xlu1 %1560  ;;  %1159 = vadd.xlane.f32.xlu0 %v5240_v24  ;;  %724 = vadd.xlane.f32.xlu1 %v5242_v16  ;;  %v1593_v37 = vsub.f32 %v4966_v33, %v1563_v63  ;;  %v5248_v54 = vpop.eup %3887 }
 0x45f   :  { %v1592_v43 = vsub.f32 %v4969_v22, %v1561_v57  ;;  %3897 = vpow2.f32 %v1133_v9 }
 0x460   :  { %3899 = vpow2.f32 %v1135_v49  ;;  %v1610_v21 = vmul.f32 1.442695, %v1593_v37 }
 0x461   :  { %v1608_v47 = vmul.f32 1.442695, %v1592_v43  ;;  %v5250_v14 = vpop.eup %3889  ;;  %v1567_v44 = vpop.xlane.xlu0 %1566 }
 0x462   :  { %6155 = vst [vmem:[#allocation28_spill] sm:$0xff] %v5250_v14  ;;  %v1565_v31 = vpop.xlane.xlu1 %1564  ;;  %726 = vadd.xlane.f32.xlu0 %v5248_v54  ;;  %728 = vadd.xlane.f32.xlu1 %v5250_v14  ;;  %v1595_v57 = vsub.f32 %v4974_v28, %v1567_v44 }
 0x463   :  { %v1594_v3 = vsub.f32 %v4977_v18, %v1565_v31  ;;  %3901 = vpow2.f32 %v1608_v47 }
 0x464   :  { %v5255_v22 = vpop.eup %3891  ;;  %3903 = vpow2.f32 %v1610_v21 }
 0x465   :  { %v5257_v20 = vpop.eup %3893  ;;  %v2058_v33 = vpop.xlane.xlu0 %2057  ;;  %v1612_v63 = vmul.f32 1.442695, %v1594_v3  ;;  %v1614_v3 = vmul.f32 1.442695, %v1595_v57 }
 0x466   :  { %v2056_v9 = vpop.xlane.xlu1 %2055  ;;  %1163 = vadd.xlane.f32.xlu0 %v5255_v22  ;;  %730 = vadd.xlane.f32.xlu1 %v5257_v20  ;;  %v5263_v43 = vpop.eup %3895 }
 0x467   :  { %v2087_v49 = vsub.f32 %v4989_v61, %v2056_v9  ;;  %3905 = vpow2.f32 %v1612_v63  ;;  %v2088_v61 = vsub.f32 %v4986_v29, %v2058_v33 }
 0x469   :  { %v2103_v18 = vmul.f32 1.442695, %v2087_v49  ;;  %v5265_v37 = vpop.eup %3897  ;;  %v2062_v47 = vpop.xlane.xlu0 %2061 }
 0x46a   :  { %v2060_v31 = vpop.xlane.xlu1 %2059  ;;  %v2090_v14 = vsub.f32 %v4998_v30, %v2062_v47  ;;  %1161 = vadd.xlane.f32.xlu1 %v5263_v43  ;;  %1165 = vadd.xlane.f32.xlu0 %v5265_v37  ;;  %v5271_v21 = vpop.eup %3899  ;;  %v2105_v30 = vmul.f32 1.442695, %v2088_v61 }
 0x46b   :  { %3907 = vpow2.f32 %v2103_v18  ;;  %v2089_v57 = vsub.f32 %v5001_v13, %v2060_v31 }
 0x46c   :  { %v2109_v28 = vmul.f32 1.442695, %v2090_v14 }
 0x46d   :  { %v5273_v44 = vpop.eup %3901  ;;  %v1571_v9 = vpop.xlane.xlu0 %1570 }
 0x46e   :  { %6156 = vst [vmem:[#allocation24_spill] sm:$0xff] %v5273_v44  ;;  %v1569_v49 = vpop.xlane.xlu1 %1568  ;;  %3909 = vpow2.f32 %v2109_v28  ;;  %v1597_v63 = vsub.f32 %v5014_v1, %v1571_v9  ;;  %1167 = vadd.xlane.f32.xlu0 %v5271_v21  ;;  %1640 = vadd.xlane.f32.xlu1 %v5273_v44  ;;  %v5279_v33 = vpop.eup %3903  ;;  %v2107_v1 = vmul.f32 1.442695, %v2089_v57 }
 0x46f   :  { %3911 = vpow2.f32 %v1614_v3  ;;  %v1596_v47 = vsub.f32 %v5017_v32, %v1569_v49  ;;  %v6158_v32 = vld [vmem:[#allocation20_spill] sm:$0xff]  ;;  %v6159_v49 = vld [vmem:[#allocation19_spill] sm:$0xff] }
 0x470   :  { %v1618_v29 = vmul.f32 1.442695, %v1597_v63 }
 0x471   :  { %v1575_v18 = vpop.xlane.xlu0 %1574  ;;  %v5284_v9 = vpop.eup %3905  ;;  %v1616_v63 = vmul.f32 1.442695, %v1596_v47 }
 0x472   :  { %v1573_v14 = vpop.xlane.xlu1 %1572  ;;  %3913 = vpow2.f32 %v1618_v29  ;;  %v1599_v28 = vsub.f32 %v5022_v46, %v1575_v18  ;;  %1642 = vadd.xlane.f32.xlu0 %v5279_v33  ;;  %6157 = vst [vmem:[#allocation25_spill] sm:$0xff] %v5284_v9 }
 0x473   :  { %3915 = vpow2.f32 %v2105_v30  ;;  %v1598_v44 = vsub.f32 %v5025_v50, %v1573_v14  ;;  %v6162_v50 = vld [vmem:[#allocation27_spill] sm:$0xff] }
 0x474   :  { %v1622_v3 = vmul.f32 1.442695, %v1599_v28 }
 0x475   :  { %v5286_v61 = vpop.eup %3907  ;;  %v2066_v13 = vpop.xlane.xlu0 %2065  ;;  %v1620_v47 = vmul.f32 1.442695, %v1598_v44 }
 0x476   :  { %v2064_v31 = vpop.xlane.xlu1 %2063  ;;  %3917 = vpow2.f32 %v1622_v3  ;;  %1644 = vadd.xlane.f32.xlu0 %v5284_v9  ;;  %2135 = vadd.xlane.f32.xlu1 %v5286_v61  ;;  %v2092_v30 = vsub.f32 %v6159_v49, %v2066_v13 }
 0x477   :  { %v2091_v46 = vsub.f32 %v6158_v32, %v2064_v31  ;;  %3919 = vpow2.f32 %v2107_v1 }
 0x478   :  { %v5293_v57 = vpop.eup %3909  ;;  %3921 = vpow2.f32 %v1616_v63  ;;  %v2113_v9 = vmul.f32 1.442695, %v2092_v30  ;;  %v6164_v63 = vld [vmem:[#allocation18_spill] sm:$0xff] }
 0x479   :  { %6160 = vst [vmem:[#allocation22_spill] sm:$0xff] %v5293_v57  ;;  %v2111_v29 = vmul.f32 1.442695, %v2091_v46  ;;  %v5295_v18 = vpop.eup %3911  ;;  %v2070_v3 = vpop.xlane.xlu0 %2069 }
 0x47a   :  { %6161 = vst [vmem:[#allocation31_spill] sm:$0xff] %v5295_v18  ;;  %v2068_v28 = vpop.xlane.xlu1 %2067  ;;  %1646 = vadd.xlane.f32.xlu0 %v5295_v18  ;;  %2141 = vadd.xlane.f32.xlu1 %v5293_v57  ;;  %v2094_v46 = vsub.f32 %v6164_v63, %v2070_v3 }
 0x47b   :  { %v2093_v14 = vsub.f32 %v6162_v50, %v2068_v28  ;;  %3923 = vpow2.f32 %v2111_v29 }
 0x47c   :  { %v5300_v1 = vpop.eup %3913  ;;  %3925 = vpow2.f32 %v1620_v47  ;;  %v2117_v47 = vmul.f32 1.442695, %v2094_v46 }
 0x47d   :  { %6163 = vst [vmem:[#allocation33_spill] sm:$0xff] %v5300_v1  ;;  %v5302_v13 = vpop.eup %3915  ;;  %v2115_v32 = vmul.f32 1.442695, %v2093_v14  ;;  %3927 = vpow2.f32 %v2113_v9  ;;  %v1579_v30 = vpop.xlane.xlu0 %1578 }
 0x47e   :  { %v1577_v31 = vpop.xlane.xlu1 %1576  ;;  %2137 = vadd.xlane.f32.xlu0 %v5302_v13  ;;  %1650 = vadd.xlane.f32.xlu1 %v5300_v1  ;;  %v1601_v50 = vsub.f32 %v5062_v26, %v1579_v30 }
 0x47f   :  { %v1600_v44 = vsub.f32 %v5065_v45, %v1577_v31  ;;  %3929 = vpow2.f32 %v2115_v32 }
 0x480   :  { %v5308_v49 = vpop.eup %3917  ;;  %v1626_v31 = vmul.f32 1.442695, %v1601_v50 }
 0x481   :  { %6165 = vst [vmem:[#allocation29_spill] sm:$0xff] %v5308_v49  ;;  %v1624_v29 = vmul.f32 1.442695, %v1600_v44  ;;  %v5310_v28 = vpop.eup %3919  ;;  %v1583_v3 = vpop.xlane.xlu0 %1582 }
 0x482   :  { %6166 = vst [vmem:[#allocation32_spill] sm:$0xff] %v5310_v28  ;;  %1654 = vadd.xlane.f32.xlu1 %v5308_v49  ;;  %2139 = vadd.xlane.f32.xlu0 %v5310_v28  ;;  %v5315_v14 = vpop.eup %3921  ;;  %v1581_v45 = vpop.xlane.xlu1 %1580  ;;  %v1603_v26 = vsub.f32 %v5070_v10, %v1583_v3 }
 0x483   :  { %3931 = vpow2.f32 %v1624_v29  ;;  %6167 = vst [vmem:[#allocation34_spill] sm:$0xff] %v5315_v14  ;;  %v1602_v32 = vsub.f32 %v5073_v34, %v1581_v45 }
 0x484   :  { %3933 = vpow2.f32 %v2117_v47  ;;  %v1630_v34 = vmul.f32 1.442695, %v1603_v26 }
 0x485   :  { %v5317_v9 = vpop.eup %3923  ;;  %3935 = vpow2.f32 %v1626_v31  ;;  %v1628_v46 = vmul.f32 1.442695, %v1602_v32  ;;  %v2074_v29 = vpop.xlane.xlu0 %2073 }
 0x486   :  { %6168 = vst [vmem:[#allocation30_spill] sm:$0xff] %v5317_v9  ;;  %1648 = vadd.xlane.f32.xlu0 %v5315_v14  ;;  %2143 = vadd.xlane.f32.xlu1 %v5317_v9  ;;  %v5322_v44 = vpop.eup %3925  ;;  %v2096_v47 = vsub.f32 %v5081_v55, %v2074_v29  ;;  %v2072_v31 = vpop.xlane.xlu1 %2071 }
 0x487   :  { %6169 = vst [vmem:[#allocation36_spill] sm:$0xff] %v5322_v44  ;;  %v5324_v63 = vpop.eup %3927  ;;  %3937 = vpow2.f32 %v1628_v46  ;;  %v6177_v46 = vld [vmem:[#allocation7_spill] sm:$0xff] }
 0x488   :  { %6170 = vst [vmem:[#allocation37_spill] sm:$0xff] %v5324_v63  ;;  %3939 = vpow2.f32 %v1630_v34  ;;  %v2121_v10 = vmul.f32 1.442695, %v2096_v47 }
 0x489   :  { %v5329_v30 = vpop.eup %3929  ;;  %v2078_v26 = vpop.xlane.xlu0 %2077 }
 0x48a   :  { %1652 = vadd.xlane.f32.xlu0 %v5322_v44  ;;  %2145 = vadd.xlane.f32.xlu1 %v5324_v63  ;;  %6171 = vst [vmem:[#allocation38_spill] sm:$0xff] %v5329_v30  ;;  %3941 = vpow2.f32 %v2121_v10  ;;  %v2076_v55 = vpop.xlane.xlu1 %2075  ;;  %v2098_v18 = vsub.f32 %v5093_v19, %v2078_v26 }
 0x48d   :  { %v5331_v49 = vpop.eup %3931  ;;  %v5353_v34 = vpop.xlane.xlu0 %1586 }
 0x48e   :  { %6172 = vst [vmem:[#allocation39_spill] sm:$0xff] %v5331_v49  ;;  %2147 = vadd.xlane.f32.xlu0 %v5329_v30  ;;  %1656 = vadd.xlane.f32.xlu1 %v5331_v49  ;;  %v5336_v50 = vpop.eup %3933  ;;  %v1585_v47 = vpop.xlane.xlu1 %1584 }
 0x48f   :  { %6173 = vst [vmem:[#allocation40_spill] sm:$0xff] %v5336_v50  ;;  %v5339_v45 = vpop.eup %3935 }
 0x490   :  { %6174 = vst [vmem:[#allocation41_spill] sm:$0xff] %v5339_v45 }
 0x491   :  { %v5342_v3 = vpop.eup %3937  ;;  %v5355_v10 = vpop.xlane.xlu0 %1590 }
 0x492   :  { %2149 = vadd.xlane.f32.xlu0 %v5336_v50  ;;  %6175 = vst [vmem:[#allocation42_spill] sm:$0xff] %v5342_v3  ;;  %v5345_v32 = vpop.eup %3939  ;;  %v5357_v49 = vpop.xlane.xlu1 %1588 }
 0x493   :  { %6176 = vst [vmem:[#allocation43_spill] sm:$0xff] %v5345_v32 }
 0x494   :  { %v5350_v29 = vpop.eup %3941 }
 0x495   :  { %6178 = vst [vmem:[#allocation44_spill] sm:$0xff] %v5350_v29  ;;  %v5360_v44 = vpop.xlane.xlu0 %2081 }
 0x496   :  { %1658 = vadd.xlane.f32.xlu0 %v5339_v45  ;;  %v2095_v45 = vsub.f32 %v5084_v60, %v2072_v31  ;;  %v5362_v1 = vpop.xlane.xlu1 %2079 }
 0x498   :  { %v2119_v14 = vmul.f32 1.442695, %v2095_v45 }
 0x499   :  { %v5365_v9 = vpop.xlane.xlu0 %2085 }
 0x49a   :  { %1660 = vadd.xlane.f32.xlu0 %v5342_v3  ;;  %v5367_v57 = vpop.xlane.xlu1 %2083  ;;  %3943 = vpow2.f32 %v2119_v14 }
 0x49e   :  { %1662 = vadd.xlane.f32.xlu0 %v5345_v32 }
 0x49f   :  { %1742 = vrot.lane.b32.xlu1 %v6177_v46, %s4197_s30 }
 0x4a2   :  { %2153 = vadd.xlane.f32.xlu0 %v5350_v29  ;;  %v2125_v29 = vmul.f32 1.442695, %v2098_v18  ;;  %v6180_v18 = vld [vmem:[#allocation23_spill] sm:$0xff] }
 0x4a3   :  { %v2097_v50 = vsub.f32 %v6180_v18, %v2076_v55 }
 0x4a4   :  { %3945 = vpow2.f32 %v2125_v29  ;;  %v5371_v26 = vpop.eup %3943 }
 0x4a5   :  { %6179 = vst [vmem:[#allocation45_spill] sm:$0xff] %v5371_v26  ;;  %v2123_v29 = vmul.f32 1.442695, %v2097_v50 }
 0x4b8   :  { %2237 = vrot.lane.b32.xlu0 %v6177_v46, %s4199_s0 }
 0x4ba   :  { %v703_v63 = vpop.xlane.xlu0 %702 }
 0x4bb   :  { %v733_v28 = vmax.f32 %v703_v63, 1e-06  ;;  %v701_v32 = vpop.xlane.xlu1 %700 }
 0x4bc   :  { %v732_v60 = vmax.f32 %v701_v32, 1e-06  ;;  %v5375_v32 = vpop.eup %3945 }
 0x4bd   :  { %3947 = vrcp.f32 %v733_v28  ;;  %6181 = vst [vmem:[#allocation46_spill] sm:$0xff] %v5375_v32 }
 0x4be   :  { %3949 = vrcp.f32 %v732_v60  ;;  %v707_v31 = vpop.xlane.xlu0 %706 }
 0x4bf   :  { %v735_v45 = vmax.f32 %v707_v31, 1e-06  ;;  %v705_v3 = vpop.xlane.xlu1 %704 }
 0x4c0   :  { %v734_v19 = vmax.f32 %v705_v3, 1e-06  ;;  %v1604_v3 = vsub.f32 %v5111_v17, %v1585_v47 }
 0x4c1   :  { %3951 = vrcp.f32 %v735_v45 }
 0x4c2   :  { %3953 = vrcp.f32 %v734_v19  ;;  %v1140_v14 = vpop.xlane.xlu0 %1139  ;;  %v1632_v18 = vmul.f32 1.442695, %v1604_v3 }
 0x4c3   :  { %v1170_v30 = vmax.f32 %v1140_v14, 1e-06  ;;  %2151 = vadd.xlane.f32.xlu1 %v5371_v26  ;;  %v1138_v63 = vpop.xlane.xlu1 %1137 }
 0x4c4   :  { %v1169_v46 = vmax.f32 %v1138_v63, 1e-06 }
 0x4c5   :  { %3955 = vrcp.f32 %v1170_v30 }
 0x4c6   :  { %3957 = vrcp.f32 %v1169_v46  ;;  %v1142_v60 = vpop.xlane.xlu0 %1141 }
 0x4c7   :  { %v3948_v28 = vpop.eup %3947  ;;  %2157 = vadd.xlane.f32.xlu1 %v5375_v32  ;;  %v1171_v45 = vmax.f32 %v1142_v60, 1e-06  ;;  %3959 = vpow2.f32 %v2123_v29 }
 0x4c8   :  { %v3950_v31 = vpop.eup %3949  ;;  %v765_v55 = vmul.f32 %v3948_v28, %v5147_v25 }
 0x4c9   :  { %v764_v19 = vmul.f32 %v3950_v31, %v5149_v40  ;;  %3961 = vrcp.f32 %v1171_v45  ;;  %v6182_v45 = vld [vmem:[#allocation13_spill] sm:$0xff] }
 0x4ca   :  { %v1144_v30 = vpop.xlane.xlu0 %1143 }
 0x4cb   :  { %v3952_v14 = vpop.eup %3951  ;;  %v709_v63 = vpop.xlane.xlu1 %708  ;;  %v780_v26 = vpack.c.bf16 %v765_v55, %v764_v19  ;;  %v1172_v17 = vmax.f32 %v1144_v30, 1e-06 }
 0x4cc   :  { %v3954_v46 = vpop.eup %3953  ;;  %v767_v50 = vmul.f32 %v3952_v14, %v5155_v36  ;;  %v736_v47 = vmax.f32 %v709_v63, 1e-06 }
 0x4cd   :  { %v766_v32 = vmul.f32 %v3954_v46, %v5157_v27  ;;  %3520 = vmatprep.mubr.bf16.mxu0 %v780_v26  ;;  %3963 = vrcp.f32 %v1172_v17  ;;  %v6183_v27 = vld [vmem:[#allocation10_spill] sm:$0xff] }
 0x4ce   :  { %3965 = vpow2.f32 %v1632_v18  ;;  %v711_v25 = vpop.xlane.xlu0 %710 }
 0x4cf   :  { %v3956_v60 = vpop.eup %3955  ;;  %v713_v40 = vpop.xlane.xlu1 %712  ;;  %v781_v28 = vpack.c.bf16 %v767_v50, %v766_v32  ;;  %3967 = vrcp.f32 %v736_v47  ;;  %v737_v3 = vmax.f32 %v711_v25, 1e-06 }
 0x4d0   :  { %v3958_v29 = vpop.eup %3957  ;;  %v1202_v31 = vmul.f32 %v3956_v60, %v5163_v23  ;;  %v738_v55 = vmax.f32 %v713_v40, 1e-06  ;;  %v6184_v23 = vld [vmem:[#allocation16_spill] sm:$0xff]  ;;  %v6185_v60 = vld [vmem:[#allocation6_spill] sm:$0xff] }
 0x4d1   :  { %3521 = vmatmul.mubr.bf16.vlgmr.msra.gmra.mrb[16].mxu0 %v781_v28  ;;  %v1201_v36 = vmul.f32 %v3958_v29, %v5165_v53  ;;  %3969 = vrcp.f32 %v737_v3  ;;  %v5387_v30 = vpop.eup %3959  ;;  %v6186_v3 = vld [vmem:[#allocation15_spill] sm:$0xff] }
 0x4d2   :  { %3569 = vmatpush3.bf16.msra.mxu0 %v6182_v45  ;;  %v1148_v26 = vpop.xlane.xlu0 %1147  ;;  %3971 = vrcp.f32 %v738_v55 }
 0x4d3   :  { %3570 = vmatprep.subr.bf16.mxu0 %v6183_v27  ;;  %v715_v19 = vpop.xlane.xlu1 %714  ;;  %v1217_v14 = vpack.c.bf16 %v1202_v31, %v1201_v36  ;;  %v1174_v32 = vmax.f32 %v1148_v26, 1e-06  ;;  %v3962_v63 = vpop.eup %3961 }
 0x4d4   :  { %v739_v18 = vmax.f32 %v715_v19, 1e-06  ;;  %v1203_v40 = vmul.f32 %v3962_v63, %v5171_v42  ;;  %v6187_v19 = vld [vmem:[#allocation12_spill] sm:$0xff] }
 0x4d5   :  { %3552 = vmatprep.mubr.bf16.mxu1 %v1217_v14 }
 0x4d6   :  { %3571 = vmatpush3.bf16.msra.mxu0 %v6183_v27  ;;  %3973 = vrcp.f32 %v739_v18  ;;  %v6188_v18 = vld [vmem:[#allocation11_spill] sm:$0xff] }
 0x4d7   :  { %3572 = vmatprep.subr.bf16.mxu0 %v6184_v23  ;;  %v1150_v53 = vpop.xlane.xlu0 %1149  ;;  %2155 = vadd.xlane.f32.xlu0 %v5387_v30  ;;  %v1146_v46 = vpop.xlane.xlu1 %1145  ;;  %3975 = vrcp.f32 %v1174_v32 }
 0x4d8   :  { %v3964_v50 = vpop.eup %3963  ;;  %v1175_v17 = vmax.f32 %v1150_v53, 1e-06  ;;  %v1173_v47 = vmax.f32 %v1146_v46, 1e-06  ;;  %1744 = vrot.lane.b32.xlu1 %v6185_v60, %s4197_s30 }
 0x4d9   :  { %v5394_v25 = vpop.eup %3965  ;;  %v1204_v28 = vmul.f32 %v3964_v50, %v5176_v5 }
 0x4da   :  { %v3968_v29 = vpop.eup %3967  ;;  %3573 = vmatpush3.bf16.msra.mxu0 %v6184_v23  ;;  %3977 = vrcp.f32 %v1173_v47  ;;  %v6189_v47 = vld [vmem:[#allocation17_spill] sm:$0xff] }
 0x4db   :  { %3574 = vmatprep.subr.bf16.mxu0 %v6186_v3  ;;  %v1152_v31 = vpop.xlane.xlu0 %1151  ;;  %1664 = vadd.xlane.f32.xlu0 %v5394_v25  ;;  %v717_v55 = vpop.xlane.xlu1 %716  ;;  %v1218_v36 = vpack.c.bf16 %v1204_v28, %v1203_v40  ;;  %3979 = vrcp.f32 %v1175_v17  ;;  %v768_v42 = vmul.f32 %v3968_v29, %v5178_v12 }
 0x4dc   :  { %v3970_v45 = vpop.eup %3969  ;;  %v1176_v27 = vmax.f32 %v1152_v31, 1e-06  ;;  %v740_v26 = vmax.f32 %v717_v55, 1e-06  ;;  %2239 = vrot.lane.b32.xlu1 %v6185_v60, %s4199_s0 }
 0x4dd   :  { %3553 = vmatmul.mubr.bf16.vlgmr.msra.gmra.mrb[16].mxu1 %v1218_v36  ;;  %v769_v5 = vmul.f32 %v3970_v45, %v5184_v35  ;;  %v3972_v14 = vpop.eup %3971 }
 0x4de   :  { %3981 = vrcp.f32 %v1176_v27  ;;  %3575 = vmatpush3.bf16.msra.mxu0 %v6186_v3  ;;  %3601 = vmatpush3.bf16.msra.mxu1 %v6187_v19  ;;  %v770_v12 = vmul.f32 %v3972_v14, %v5186_v6 }
 0x4df   :  { %3602 = vmatprep.subr.bf16.mxu1 %v6188_v18  ;;  %v719_v32 = vpop.xlane.xlu0 %718  ;;  %v721_v63 = vpop.xlane.xlu1 %720  ;;  %v782_v23 = vpack.c.bf16 %v769_v5, %v768_v42  ;;  %3983 = vrcp.f32 %v740_v26 }
 0x4e0   :  { %v741_v53 = vmax.f32 %v719_v32, 1e-06  ;;  %v3974_v46 = vpop.eup %3973  ;;  %v742_v50 = vmax.f32 %v721_v63, 1e-06 }
 0x4e1   :  { %3524 = vmatprep.mubr.bf16.mxu0 %v782_v23  ;;  %v771_v35 = vmul.f32 %v3974_v46, %v5194_v11  ;;  %v3976_v17 = vpop.eup %3975  ;;  %v6190_v11 = vld [vmem:[#allocation14_spill] sm:$0xff] }
 0x4e2   :  { %3985 = vrcp.f32 %v741_v53  ;;  %3603 = vmatpush3.bf16.msra.mxu1 %v6188_v18  ;;  %v1206_v6 = vmul.f32 %v3976_v17, %v5192_v51  ;;  %v1605_v53 = vsub.f32 %v5108_v58, %v5353_v34 }
 0x4e3   :  { %3604 = vmatprep.subr.bf16.mxu1 %v6189_v47  ;;  %v1156_v60 = vpop.xlane.xlu0 %1155  ;;  %v723_v40 = vpop.xlane.xlu1 %722  ;;  %v783_v29 = vpack.c.bf16 %v771_v35, %v770_v12  ;;  %3987 = vrcp.f32 %v742_v50  ;;  %v1607_v12 = vsub.f32 %v5116_v59, %v5355_v10 }
 0x4e4   :  { %v743_v28 = vmax.f32 %v723_v40, 1e-06  ;;  %v3978_v3 = vpop.eup %3977  ;;  %v1178_v31 = vmax.f32 %v1156_v60, 1e-06  ;;  %v1634_v40 = vmul.f32 1.442695, %v1605_v53  ;;  %v1606_v53 = vsub.f32 %v5119_v56, %v5357_v49 }
 0x4e5   :  { %v3980_v55 = vpop.eup %3979  ;;  %3525 = vmatmul.mubr.bf16.gmra.mrb[20].mxu0 %v783_v29  ;;  %v1205_v36 = vmul.f32 %v3978_v3, %v5200_v48  ;;  %v6191_v29 = vld [vmem:[#allocation9_spill] sm:$0xff] }
 0x4e6   :  { %3605 = vmatpush3.bf16.msra.mxu1 %v6189_v47  ;;  %3989 = vrcp.f32 %v743_v28  ;;  %v1207_v14 = vmul.f32 %v3980_v55, %v5202_v52 }
 0x4e7   :  { %3606 = vmatprep.subr.bf16.mxu1 %v6190_v11  ;;  %v1158_v45 = vpop.xlane.xlu0 %1157  ;;  %v1154_v27 = vpop.xlane.xlu1 %1153  ;;  %v1219_v19 = vpack.c.bf16 %v1206_v6, %v1205_v36  ;;  %3991 = vrcp.f32 %v1178_v31 }
 0x4e8   :  { %v3982_v26 = vpop.eup %3981  ;;  %v1179_v42 = vmax.f32 %v1158_v45, 1e-06  ;;  %v1177_v5 = vmax.f32 %v1154_v27, 1e-06 }
 0x4e9   :  { %v1208_v18 = vmul.f32 %v3982_v26, %v5208_v39  ;;  %v3984_v32 = vpop.eup %3983  ;;  %3556 = vmatprep.mubr.bf16.mxu1 %v1219_v19  ;;  %v2100_v19 = vsub.f32 %v5124_v62, %v5360_v44 }
 0x4ea   :  { %3607 = vmatpush3.bf16.msra.mxu1 %v6190_v11  ;;  %3993 = vrcp.f32 %v1177_v5  ;;  %v772_v52 = vmul.f32 %v3984_v32, %v5210_v38  ;;  %v1638_v38 = vmul.f32 1.442695, %v1607_v12  ;;  %v2099_v11 = vsub.f32 %v5127_v41, %v5362_v1 }
 0x4eb   :  { %v1160_v51 = vpop.xlane.xlu0 %1159  ;;  %v725_v48 = vpop.xlane.xlu1 %724  ;;  %v1220_v63 = vpack.c.bf16 %v1208_v18, %v1207_v14  ;;  %3995 = vrcp.f32 %v1179_v42 }
 0x4ec   :  { %v3986_v23 = vpop.eup %3985  ;;  %v1180_v46 = vmax.f32 %v1160_v51, 1e-06  ;;  %v744_v50 = vmax.f32 %v725_v48, 1e-06  ;;  %v2127_v41 = vmul.f32 1.442695, %v2099_v11 }
 0x4ed   :  { %3557 = vmatmul.mubr.bf16.gmra.mrb[20].mxu1 %v1220_v63  ;;  %v773_v39 = vmul.f32 %v3986_v23, %v5216_v2  ;;  %v3988_v35 = vpop.eup %3987 }
 0x4ee   :  { %3997 = vrcp.f32 %v1180_v46  ;;  %v774_v2 = vmul.f32 %v3988_v35, %v5218_v7  ;;  %v2129_v46 = vmul.f32 1.442695, %v2100_v19 }
 0x4ef   :  { %v727_v17 = vpop.xlane.xlu0 %726  ;;  %v729_v47 = vpop.xlane.xlu1 %728  ;;  %v784_v60 = vpack.c.bf16 %v773_v39, %v772_v52  ;;  %3999 = vrcp.f32 %v744_v50 }
 0x4f0   :  { %v745_v28 = vmax.f32 %v727_v17, 1e-06  ;;  %v3990_v58 = vpop.eup %3989  ;;  %v746_v34 = vmax.f32 %v729_v47, 1e-06  ;;  %v1636_v17 = vmul.f32 1.442695, %v1606_v53 }
 0x4f1   :  { %1746 = vrot.lane.b32.xlu0 %v6191_v29, %s4197_s30  ;;  %3528 = vmatprep.mubr.bf16.mxu0 %v784_v60  ;;  %v775_v59 = vmul.f32 %v3990_v58, %v5226_v0  ;;  %v3992_v10 = vpop.eup %3991  ;;  %v6192_v47 = vld [vmem:[#allocation21_spill] sm:$0xff] }
 0x4f2   :  { %4001 = vrcp.f32 %v745_v28  ;;  %v1210_v7 = vmul.f32 %v3992_v10, %v5224_v8 }
 0x4f3   :  { %v1164_v3 = vpop.xlane.xlu0 %1163  ;;  %v731_v31 = vpop.xlane.xlu1 %730  ;;  %4003 = vpow2.f32 %v1634_v40  ;;  %v785_v36 = vpack.c.bf16 %v775_v59, %v774_v2  ;;  %v6194_v59 = vld [vmem:[#allocation26_spill] sm:$0xff] }
 0x4f4   :  { %v747_v55 = vmax.f32 %v731_v31, 1e-06  ;;  %v3994_v6 = vpop.eup %3993  ;;  %4005 = vrcp.f32 %v746_v34  ;;  %v1182_v45 = vmax.f32 %v1164_v3, 1e-06  ;;  %v2102_v10 = vsub.f32 %v6194_v59, %v5365_v9 }
 0x4f5   :  { %v3996_v27 = vpop.eup %3995  ;;  %4007 = vpow2.f32 %v1638_v38  ;;  %3529 = vmatmul.mubr.bf16.gmra.mrb[24].mxu0 %v785_v36  ;;  %v1209_v26 = vmul.f32 %v3994_v6, %v5232_v4 }
 0x4f6   :  { %4009 = vrcp.f32 %v747_v55  ;;  %v1211_v1 = vmul.f32 %v3996_v27, %v5234_v15 }
 0x4f7   :  { %v1166_v0 = vpop.xlane.xlu0 %1165  ;;  %v1162_v42 = vpop.xlane.xlu1 %1161  ;;  %v1221_v32 = vpack.c.bf16 %v1210_v7, %v1209_v26  ;;  %4011 = vrcp.f32 %v1182_v45  ;;  %v2133_v26 = vmul.f32 1.442695, %v2102_v10 }
 0x4f8   :  { %v3998_v5 = vpop.eup %3997  ;;  %v1183_v14 = vmax.f32 %v1166_v0, 1e-06  ;;  %v1181_v18 = vmax.f32 %v1162_v42, 1e-06 }
 0x4f9   :  { %v1212_v51 = vmul.f32 %v3998_v5, %v5240_v24  ;;  %v4000_v48 = vpop.eup %3999  ;;  %3560 = vmatprep.mubr.bf16.mxu1 %v1221_v32 }
 0x4fa   :  { %4013 = vrcp.f32 %v1181_v18  ;;  %v776_v15 = vmul.f32 %v4000_v48, %v5242_v16  ;;  %v2101_v16 = vsub.f32 %v6192_v47, %v5367_v57  ;;  %v6195_v18 = vld [vmem:[#allocation24_spill] sm:$0xff] }
 0x4fb   :  { %v1168_v8 = vpop.xlane.xlu0 %1167  ;;  %v1641_v4 = vpop.xlane.xlu1 %1640  ;;  %v1222_v63 = vpack.c.bf16 %v1212_v51, %v1211_v1  ;;  %4015 = vrcp.f32 %v1183_v14 }
 0x4fc   :  { %v4002_v23 = vpop.eup %4001  ;;  %v1184_v62 = vmax.f32 %v1168_v8, 1e-06  ;;  %v1672_v44 = vmax.f32 %v1641_v4, 1e-06  ;;  %4017 = vpow2.f32 %v2127_v41  ;;  %v2131_v3 = vmul.f32 1.442695, %v2101_v16 }
 0x4fd   :  { %3561 = vmatmul.mubr.bf16.gmra.mrb[24].mxu1 %v1222_v63  ;;  %v777_v24 = vmul.f32 %v4002_v23, %v5248_v54  ;;  %v5441_v50 = vpop.eup %4003  ;;  %v6193_v54 = vld [vmem:[#allocation28_spill] sm:$0xff] }
 0x4fe   :  { %4019 = vrcp.f32 %v1184_v62  ;;  %v4006_v52 = vpop.eup %4005 }
 0x4ff   :  { %v1643_v39 = vpop.xlane.xlu0 %1642  ;;  %v786_v12 = vpack.c.bf16 %v777_v24, %v776_v15  ;;  %v5443_v35 = vpop.eup %4007  ;;  %4021 = vrcp.f32 %v1672_v44  ;;  %v778_v60 = vmul.f32 %v4006_v52, %v6193_v54 }
 0x500   :  { %v1673_v56 = vmax.f32 %v1643_v39, 1e-06  ;;  %1666 = vadd.xlane.f32.xlu1 %v5441_v50  ;;  %v4010_v49 = vpop.eup %4009  ;;  %4023 = vpow2.f32 %v2129_v46 }
 0x501   :  { %3532 = vmatprep.mubr.bf16.mxu0 %v786_v12  ;;  %v779_v40 = vmul.f32 %v4010_v49, %v5257_v20  ;;  %v4012_v28 = vpop.eup %4011 }
 0x502   :  { %4025 = vrcp.f32 %v1673_v56  ;;  %v1214_v55 = vmul.f32 %v4012_v28, %v5255_v22  ;;  %v6197_v28 = vld [vmem:[#allocation38_spill] sm:$0xff] }
 0x503   :  { %v5450_v58 = vpop.xlane.xlu0 %1644  ;;  %v2136_v34 = vpop.xlane.xlu1 %2135  ;;  %v787_v38 = vpack.c.bf16 %v779_v40, %v778_v60  ;;  %4027 = vpow2.f32 %v1636_v17  ;;  %v6196_v17 = vld [vmem:[#allocation8_spill] sm:$0xff] }
 0x504   :  { %1670 = vadd.xlane.f32.xlu1 %v5443_v35  ;;  %v4014_v2 = vpop.eup %4013  ;;  %v2167_v45 = vmax.f32 %v2136_v34, 1e-06  ;;  %4029 = vpow2.f32 %v2131_v3 }
 0x505   :  { %v4016_v57 = vpop.eup %4015  ;;  %3533 = vmatmul.mubr.bf16.gmra.mrb[28].mxu0 %v787_v38  ;;  %v1213_v31 = vmul.f32 %v4014_v2, %v5263_v43  ;;  %v6198_v38 = vld [vmem:[#allocation40_spill] sm:$0xff] }
 0x506   :  { %v5457_v20 = vpop.eup %4017  ;;  %v1215_v9 = vmul.f32 %v4016_v57, %v5265_v37  ;;  %4031 = vrcp.f32 %v2167_v45  ;;  %v6200_v45 = vld [vmem:[#allocation43_spill] sm:$0xff] }
 0x507   :  { %v5459_v36 = vpop.xlane.xlu0 %1646  ;;  %v5461_v6 = vpop.xlane.xlu1 %2141  ;;  %v1223_v27 = vpack.c.bf16 %v1214_v55, %v1213_v31  ;;  %4033 = vpow2.f32 %v2133_v26  ;;  %v6199_v55 = vld [vmem:[#allocation42_spill] sm:$0xff] }
 0x508   :  { %v4020_v11 = vpop.eup %4019  ;;  %2159 = vadd.xlane.f32.xlu1 %v5457_v20 }
 0x509   :  { %v1216_v7 = vmul.f32 %v4020_v11, %v5271_v21  ;;  %v4022_v43 = vpop.eup %4021  ;;  %3564 = vmatprep.mubr.bf16.mxu1 %v1223_v27 }
 0x50a   :  { %v5466_v22 = vpop.eup %4023  ;;  %v1704_v32 = vmul.f32 %v4022_v43, %v6195_v18 }
 0x50b   :  { %v2138_v0 = vpop.xlane.xlu0 %2137  ;;  %v5468_v42 = vpop.xlane.xlu1 %1650  ;;  %v1224_v5 = vpack.c.bf16 %v1216_v7, %v1215_v9 }
 0x50c   :  { %v4026_v19 = vpop.eup %4025  ;;  %v2168_v14 = vmax.f32 %v2138_v0, 1e-06  ;;  %2161 = vadd.xlane.f32.xlu1 %v5466_v22 }
 0x50d   :  { %3565 = vmatmul.mubr.bf16.gmra.mrb[28].mxu1 %v1224_v5  ;;  %v1705_v37 = vmul.f32 %v4026_v19, %v5279_v33  ;;  %v5473_v21 = vpop.eup %4027 }
 0x50e   :  { %4035 = vrcp.f32 %v2168_v14  ;;  %v5480_v48 = vpop.eup %4029 }
 0x50f   :  { %v5475_v41 = vpop.xlane.xlu0 %2139  ;;  %v5477_v1 = vpop.xlane.xlu1 %1654  ;;  %v1720_v51 = vpack.c.bf16 %v1705_v37, %v1704_v32 }
 0x510   :  { %1668 = vadd.xlane.f32.xlu0 %v5473_v21  ;;  %v4032_v33 = vpop.eup %4031  ;;  %v2169_v32 = vmax.f32 %v5475_v41, 1e-06 }
 0x511   :  { %3584 = vmatprep.mubr.bf16.mxu0 %v1720_v51  ;;  %v5487_v63 = vpop.eup %4033  ;;  %v2199_v44 = vmul.f32 %v4032_v33, %v5286_v61  ;;  %v5505_v61 = vld [vmem:[%s6009_s4] ss:$0 sm:$0xff]  ;;  %v2170_v51 = vmax.f32 %v5461_v6, 1e-06  ;;  %s4205_s4 = smov 16  }
 0x513   :  { %v5482_v8 = vpop.xlane.xlu0 %1648  ;;  %v5484_v4 = vpop.xlane.xlu1 %2143 }
 0x514   :  { %2163 = vadd.xlane.f32.xlu0 %v5480_v48 }
 0x517   :  { %v5489_v23 = vpop.xlane.xlu0 %1652  ;;  %v5491_v53 = vpop.xlane.xlu1 %2145 }
 0x518   :  { %v4036_v62 = vpop.eup %4035  ;;  %2165 = vadd.xlane.f32.xlu0 %v5487_v63  ;;  %v2172_v37 = vmax.f32 %v5491_v53, 1e-06  ;;  %v1677_v53 = vmax.f32 %v5468_v42, 1e-06 }
 0x519   :  { %v2200_v46 = vmul.f32 %v4036_v62, %v5302_v13  ;;  %v2171_v62 = vmax.f32 %v5484_v4, 1e-06  ;;  %v1679_v4 = vmax.f32 %v5477_v1, 1e-06 }
 0x51b   :  { %v2148_v15 = vpop.xlane.xlu0 %2147  ;;  %v5496_v24 = vpop.xlane.xlu1 %1656  ;;  %v2215_v52 = vpack.c.bf16 %v2200_v46, %v2199_v44  ;;  %v1674_v44 = vmax.f32 %v5450_v58, 1e-06 }
 0x51c   :  { %v2173_v39 = vmax.f32 %v2148_v15, 1e-06  ;;  %v1675_v15 = vmax.f32 %v5459_v36, 1e-06  ;;  %v1680_v36 = vmax.f32 %v5496_v24, 1e-06 }
 0x51d   :  { %2241 = vrot.lane.b32.xlu1 %v6191_v29, %s4199_s0  ;;  %3616 = vmatprep.mubr.bf16.mxu1 %v2215_v52  ;;  %v1676_v52 = vmax.f32 %v5482_v8, 1e-06 }
 0x51e   :  { %4037 = vrcp.f32 %v2173_v39 }
 0x51f   :  { %v2150_v12 = vpop.xlane.xlu0 %2149  ;;  %v1743_v56 = vpop.permute.xlu1 %1742 }
 0x520   :  { %v2174_v49 = vmax.f32 %v2150_v12, 1e-06  ;;  %3576 = vmatprep.subr.bf16.mxu0 %v1743_v56  ;;  %v1678_v12 = vmax.f32 %v5489_v23, 1e-06 }
 0x521   :  { %2243 = vrot.lane.b32.xlu1 %v6196_v17, %s4199_s0  ;;  %3577 = vmatpush3.bf16.msra.mxu0 %v1743_v56 }
 0x522   :  { %4039 = vrcp.f32 %v2174_v49 }
 0x523   :  { %v5507_v13 = vpop.xlane.xlu0 %1658 }
 0x525   :  { %1263 = vrot.lane.b32.xlu1 %v5505_v61, %s4198_s9 }
 0x527   :  { %v1661_v29 = vpop.xlane.xlu0 %1660 }
 0x528   :  { %v1682_v47 = vmax.f32 %v1661_v29, 1e-06  ;;  %v4038_v16 = vpop.eup %4037 }
 0x529   :  { %1758 = vrot.lane.b32.xlu1 %v5505_v61, %s4197_s30  ;;  %v5514_v34 = vmul.f32 %v4038_v16, %v6197_v28 }
 0x52a   :  { %4041 = vrcp.f32 %v1682_v47  ;;  %v6201_v47 = vld [vmem:[#allocation32_spill] sm:$0xff] }
 0x52b   :  { %v1663_v54 = vpop.xlane.xlu0 %1662 }
 0x52c   :  { %v4040_v60 = vpop.eup %4039  ;;  %v1683_v40 = vmax.f32 %v1663_v54, 1e-06 }
 0x52d   :  { %v5517_v2 = vmul.f32 %v4040_v60, %v6198_v38  ;;  %2253 = vrot.lane.b32.xlu1 %v5505_v61, %s4199_s0  ;;  %v6203_v38 = vld [vmem:[#allocation22_spill] sm:$0xff] }
 0x52e   :  { %4043 = vrcp.f32 %v1683_v40  ;;  %1748 = vrot.lane.b32.xlu0 %v6196_v17, %s4197_s30  ;;  %v1681_v17 = vmax.f32 %v5507_v13, 1e-06  ;;  %v6202_v40 = vld [vmem:[#allocation37_spill] sm:$0xff] }
 0x52f   :  { %v2154_v59 = vpop.xlane.xlu0 %2153  ;;  %v2218_v10 = vpack.c.bf16 %v5517_v2, %v5514_v34  ;;  %4045 = vrcp.f32 %v2169_v32 }
 0x530   :  { %4047 = vrcp.f32 %v2172_v37  ;;  %v2176_v39 = vmax.f32 %v2154_v59, 1e-06 }
 0x531   :  { %4049 = vrcp.f32 %v2170_v51 }
 0x532   :  { %4051 = vrcp.f32 %v2171_v62 }
 0x533   :  { %v2238_v3 = vpop.permute.xlu0 %2237  ;;  %4053 = vrcp.f32 %v1674_v44  ;;  %v6205_v44 = vld [vmem:[#allocation25_spill] sm:$0xff] }
 0x534   :  { %3608 = vmatprep.subr.bf16.mxu1 %v2238_v3  ;;  %v4042_v57 = vpop.eup %4041  ;;  %4055 = vrcp.f32 %v1675_v15 }
 0x535   :  { %3609 = vmatpush3.bf16.msra.mxu1 %v2238_v3  ;;  %v5526_v11 = vmul.f32 %v4042_v57, %v6199_v55  ;;  %4057 = vrcp.f32 %v1676_v52  ;;  %v6204_v57 = vld [vmem:[#allocation30_spill] sm:$0xff] }
 0x538   :  { %v4044_v31 = vpop.eup %4043 }
 0x539   :  { %v5529_v27 = vmul.f32 %v4044_v31, %v6200_v45  ;;  %v4046_v58 = vpop.eup %4045 }
 0x53a   :  { %v4048_v49 = vpop.eup %4047  ;;  %v2201_v23 = vmul.f32 %v4046_v58, %v6201_v47  ;;  %v6207_v58 = vld [vmem:[#allocation34_spill] sm:$0xff] }
 0x53b   :  { %v1725_v26 = vpack.c.bf16 %v5529_v27, %v5526_v11  ;;  %v4050_v42 = vpop.eup %4049  ;;  %v2204_v28 = vmul.f32 %v4048_v49, %v6202_v40 }
 0x53c   :  { %v4052_v1 = vpop.eup %4051  ;;  %v2202_v13 = vmul.f32 %v4050_v42, %v6203_v38 }
 0x53d   :  { %v4054_v3 = vpop.eup %4053  ;;  %v2203_v31 = vmul.f32 %v4052_v1, %v6204_v57  ;;  %v6208_v1 = vld [vmem:[#allocation45_spill] sm:$0xff] }
 0x53e   :  { %v4056_v55 = vpop.eup %4055 }
 0x550   :  { %v2152_v9 = vpop.xlane.xlu1 %2151 }
 0x551   :  { %v2175_v41 = vmax.f32 %v2152_v9, 1e-06  ;;  %v2216_v9 = vpack.c.bf16 %v2202_v13, %v2201_v23  ;;  %v6210_v13 = vld [vmem:[#allocation44_spill] sm:$0xff] }
 0x553   :  { %4059 = vrcp.f32 %v2175_v41 }
 0x554   :  { %v5533_v7 = vpop.xlane.xlu1 %2157  ;;  %4061 = vrcp.f32 %v1677_v53 }
 0x555   :  { %4063 = vrcp.f32 %v2176_v39  ;;  %v2178_v24 = vmax.f32 %v5533_v7, 1e-06 }
 0x556   :  { %4065 = vrcp.f32 %v1679_v4 }
 0x557   :  { %4067 = vrcp.f32 %v1678_v12 }
 0x558   :  { %v1745_v43 = vpop.permute.xlu1 %1744  ;;  %4069 = vrcp.f32 %v1680_v36 }
 0x559   :  { %3578 = vmatprep.subr.bf16.mxu0 %v1745_v43  ;;  %4071 = vrcp.f32 %v1681_v17 }
 0x55a   :  { %3579 = vmatpush3.bf16.msra.mxu0 %v1745_v43  ;;  %v4058_v43 = vpop.eup %4057 }
 0x55b   :  { %v1708_v36 = vmul.f32 %v4058_v43, %v6207_v58 }
 0x55c   :  { %v2240_v0 = vpop.permute.xlu1 %2239 }
 0x55d   :  { %3610 = vmatprep.subr.bf16.mxu1 %v2240_v0  ;;  %v4060_v32 = vpop.eup %4059 }
 0x55e   :  { %3611 = vmatpush3.bf16.msra.mxu1 %v2240_v0  ;;  %v4062_v62 = vpop.eup %4061  ;;  %v2207_v47 = vmul.f32 %v4060_v32, %v6208_v1 }
 0x55f   :  { %v4064_v53 = vpop.eup %4063 }
 0x564   :  { %v2156_v5 = vpop.xlane.xlu0 %2155 }
 0x565   :  { %v2177_v29 = vmax.f32 %v2156_v5, 1e-06 }
 0x567   :  { %4073 = vrcp.f32 %v2177_v29 }
 0x568   :  { %v5535_v19 = vpop.xlane.xlu0 %1664 }
 0x56c   :  { %v1747_v14 = vpop.permute.xlu0 %1746 }
 0x56d   :  { %3580 = vmatprep.subr.bf16.mxu0 %v1747_v14 }
 0x56e   :  { %3581 = vmatpush3.bf16.msra.mxu0 %v1747_v14  ;;  %v2217_v14 = vpack.c.bf16 %v2204_v28, %v2203_v31  ;;  %v6209_v28 = vld [vmem:[#allocation33_spill] sm:$0xff] }
 0x56f   :  { %v1709_v38 = vmul.f32 %v4062_v62, %v6209_v28 }
 0x58d   :  { %v5537_v18 = vpop.xlane.xlu1 %1666 }
 0x58e   :  { %v1685_v4 = vmax.f32 %v5537_v18, 1e-06 }
 0x591   :  { %v5542_v33 = vpop.xlane.xlu1 %1670 }
 0x592   :  { %v1687_v34 = vmax.f32 %v5542_v33, 1e-06 }
 0x595   :  { %v2160_v46 = vpop.xlane.xlu1 %2159 }
 0x596   :  { %v2179_v59 = vmax.f32 %v2160_v46, 1e-06  ;;  %v1706_v46 = vmul.f32 %v4054_v3, %v6205_v44 }
 0x599   :  { %v2162_v6 = vpop.xlane.xlu1 %2161 }
 0x59a   :  { %v2180_v16 = vmax.f32 %v2162_v6, 1e-06  ;;  %v6206_v6 = vld [vmem:[#allocation31_spill] sm:$0xff] }
 0x59b   :  { %v1707_v39 = vmul.f32 %v4056_v55, %v6206_v6  ;;  %v1722_v55 = vpack.c.bf16 %v1709_v38, %v1708_v36  ;;  %v6215_v6 = vld [vmem:[#allocation39_spill] sm:$0xff] }
 0x59c   :  { %4075 = vrcp.f32 %v2180_v16  ;;  %v1684_v16 = vmax.f32 %v5535_v19, 1e-06 }
 0x59d   :  { %v5552_v56 = vpop.xlane.xlu0 %1668  ;;  %v2242_v8 = vpop.permute.xlu1 %2241  ;;  %4077 = vrcp.f32 %v2178_v24  ;;  %v1721_v57 = vpack.c.bf16 %v1707_v39, %v1706_v46 }
 0x59e   :  { %3612 = vmatprep.subr.bf16.mxu1 %v2242_v8  ;;  %4079 = vrcp.f32 %v2179_v59 }
 0x59f   :  { %3613 = vmatpush3.bf16.msra.mxu1 %v2242_v8  ;;  %v4066_v8 = vpop.eup %4065 }
 0x5a0   :  { %v4068_v23 = vpop.eup %4067 }
 0x5a1   :  { %v2164_v54 = vpop.xlane.xlu0 %2163  ;;  %v2244_v60 = vpop.permute.xlu1 %2243 }
 0x5a2   :  { %3614 = vmatprep.subr.bf16.mxu1 %v2244_v60  ;;  %v2181_v49 = vmax.f32 %v2164_v54, 1e-06  ;;  %v4070_v40 = vpop.eup %4069  ;;  %v2208_v54 = vmul.f32 %v4064_v53, %v6210_v13 }
 0x5a3   :  { %3615 = vmatpush3.bf16.msra.mxu1 %v2244_v60  ;;  %v4072_v59 = vpop.eup %4071  ;;  %v1712_v39 = vmul.f32 %v4070_v40, %v6215_v6 }
 0x5a4   :  { %v3522_v45 = vpop.f32.mrb[16].mxu0  ;;  %v4074_v31 = vpop.eup %4073  ;;  %v2219_v19 = vpack.c.bf16 %v2208_v54, %v2207_v47 }
 0x5a5   :  { %v838_v7 = vadd.f32 %v3522_v45, %v5505_v61  ;;  %v2166_v0 = vpop.xlane.xlu0 %2165  ;;  %v829_v5 = vpop.f32.mrb[17].mxu0 }
 0x5a6   :  { %v830_v37 = vadd.f32 %v5505_v61, %v829_v5  ;;  %v3523_v51 = vpop.f32.mrb[18].mxu0  ;;  %3617 = vmatmul.mubr.bf16.vlgmr.msra.gmra.mrb[32].mxu1 %v2216_v9  ;;  %v2182_v15 = vmax.f32 %v2166_v0, 1e-06  ;;  %v4076_v45 = vpop.eup %4075 }
 0x5a7   :  { %v841_v52 = vadd.f32 %v3523_v51, %v5505_v61  ;;  %v832_v41 = vpop.f32.mrb[19].mxu0  ;;  %3620 = vmatprep.mubr.bf16.mxu1 %v2217_v14  ;;  %v894_v17 = vmax.f32 %v838_v7, 0.0  ;;  %v5576_v9 = vpop.permute.xlu1 %1263  ;;  %v1686_v7 = vmax.f32 %v5552_v56, 1e-06  ;;  %v6211_v14 = vld [vmem:[#allocation36_spill] sm:$0xff]  ;;  %v6212_v51 = vld [vmem:[#allocation41_spill] sm:$0xff]  ;;  %v2212_v44 = vmul.f32 %v4076_v45, %v5466_v22 }
 0x5a8   :  { %v833_v12 = vadd.f32 %v5505_v61, %v832_v41  ;;  %v892_v24 = vmax.f32 %v830_v37, 0.0  ;;  %4081 = vrcp.f32 %v2182_v15  ;;  %v4078_v43 = vpop.eup %4077  ;;  %v1710_v32 = vmul.f32 %v4068_v23, %v6211_v14  ;;  %v6213_v15 = vld [vmem:[#allocation29_spill] sm:$0xff]  ;;  %v6214_v41 = vld [vmem:[#allocation46_spill] sm:$0xff] }
 0x5a9   :  { %v895_v42 = vmax.f32 %v841_v52, 0.0  ;;  %v1749_v29 = vpop.permute.xlu0 %1748  ;;  %4083 = vrcp.f32 %v1685_v4  ;;  %v4080_v0 = vpop.eup %4079  ;;  %v2209_v37 = vmul.f32 %v4074_v31, %v5387_v30  ;;  %v1713_v62 = vmul.f32 %v4072_v59, %v6212_v51 }
 0x5aa   :  { %v893_v60 = vmax.f32 %v833_v12, 0.0  ;;  %3582 = vmatprep.subr.bf16.mxu0 %v1749_v29  ;;  %4085 = vrcp.f32 %v2181_v49  ;;  %v1711_v52 = vmul.f32 %v4066_v8, %v6213_v15  ;;  %v2210_v53 = vmul.f32 %v4078_v43, %v6214_v41 }
 0x5ab   :  { %v909_v18 = vpack.c.bf16 %v895_v42, %v894_v17  ;;  %3583 = vmatpush3.bf16.msra.mxu0 %v1749_v29  ;;  %4087 = vrcp.f32 %v1684_v16  ;;  %v2211_v33 = vmul.f32 %v4080_v0, %v5457_v20  ;;  %v1724_v22 = vpack.c.bf16 %v1713_v62, %v1712_v39 }
 0x5ac   :  { %v908_v3 = vpack.c.bf16 %v893_v60, %v892_v24  ;;  %4089 = vrcp.f32 %v1686_v7  ;;  %v1723_v58 = vpack.c.bf16 %v1711_v52, %v1710_v32  ;;  %v2220_v36 = vpack.c.bf16 %v2210_v53, %v2209_v37 }
 0x5ad   :  { %918 = vst.msk [vmem:[#allocation2 + $0x8] sm:$0xff] %vm916_vm3, %v909_v18  ;;  %4091 = vrcp.f32 %v1687_v34  ;;  %v2221_v8 = vpack.c.bf16 %v2212_v44, %v2211_v33 }
 0x5ae   :  { %3585 = vmatmul.mubr.bf16.vlgmr.msra.gmra.mrb[32].mxu0 %v1721_v57  ;;  %3621 = vmatmul.mubr.bf16.gmra.mrb[36].mxu1 %v2218_v10  ;;  %917 = vst.msk [vmem:[#allocation2] sm:$0xff] %vm916_vm3, %v908_v3 }
 0x5af   :  { %3588 = vmatprep.mubr.bf16.mxu0 %v1722_v55  ;;  %3624 = vmatprep.mubr.bf16.mxu1 %v2219_v19 }
 0x5b0   :  { %v3554_v5 = vpop.f32.mrb[16].mxu1 }
 0x5b1   :  { %v1300_v2 = vpop.f32.mrb[17].mxu1  ;;  %v1309_v10 = vadd.f32 %v3554_v5, %v5576_v9 }
 0x5b2   :  { %v1301_v46 = vadd.f32 %v1300_v2, %v5576_v9  ;;  %v3555_v56 = vpop.f32.mrb[18].mxu1  ;;  %v4082_v49 = vpop.eup %4081 }
 0x5b3   :  { %v1312_v30 = vadd.f32 %v3555_v56, %v5576_v9  ;;  %v1303_v4 = vpop.f32.mrb[19].mxu1  ;;  %v1365_v17 = vmax.f32 %v1309_v10, 0.0  ;;  %v4084_v29 = vpop.eup %4083  ;;  %v2214_v60 = vmul.f32 %v4082_v49, %v5487_v63 }
 0x5b4   :  { %v1304_v12 = vadd.f32 %v1303_v4, %v5576_v9  ;;  %v1363_v1 = vmax.f32 %v1301_v46, 0.0  ;;  %v4086_v23 = vpop.eup %4085  ;;  %v1717_v18 = vmul.f32 %v4084_v29, %v5441_v50 }
 0x5b5   :  { %v1366_v42 = vmax.f32 %v1312_v30, 0.0  ;;  %v4088_v20 = vpop.eup %4087  ;;  %v2213_v13 = vmul.f32 %v4086_v23, %v5480_v48 }
 0x5b6   :  { %v1364_v47 = vmax.f32 %v1304_v12, 0.0  ;;  %3589 = vmatmul.mubr.bf16.gmra.mrb[36].mxu0 %v1723_v58  ;;  %3625 = vmatmul.mubr.bf16.gmra.mrb[40].mxu1 %v2220_v36  ;;  %v1716_v3 = vmul.f32 %v4088_v20, %v5394_v25  ;;  %v4090_v55 = vpop.eup %4089 }
 0x5b7   :  { %v1380_v16 = vpack.c.bf16 %v1366_v42, %v1365_v17  ;;  %3592 = vmatprep.mubr.bf16.mxu0 %v1724_v22  ;;  %3628 = vmatprep.mubr.bf16.mxu1 %v2221_v8  ;;  %v2222_v31 = vpack.c.bf16 %v2214_v60, %v2213_v13  ;;  %v4092_v48 = vpop.eup %4091  ;;  %v1718_v14 = vmul.f32 %v4090_v55, %v5473_v21 }
 0x5b8   :  { %v1379_v24 = vpack.c.bf16 %v1364_v47, %v1363_v1  ;;  %v3526_v40 = vpop.f32.mrb[20].mxu0  ;;  %v1726_v50 = vpack.c.bf16 %v1717_v18, %v1716_v3  ;;  %v1719_v2 = vmul.f32 %v4092_v48, %v5443_v35 }
 0x5b9   :  { %1397 = vrot.lane.b32.xlu0 %v1380_v16, %s4205_s4  ;;  %v854_v28 = vadd.f32 %v3526_v40, %v5505_v61  ;;  %v845_v38 = vpop.f32.mrb[21].mxu0 }
 0x5ba   :  { %1395 = vrot.lane.b32.xlu1 %v1379_v24, %s4205_s4  ;;  %v846_v54 = vadd.f32 %v5505_v61, %v845_v38  ;;  %v3527_v59 = vpop.f32.mrb[22].mxu0  ;;  %v1727_v10 = vpack.c.bf16 %v1719_v2, %v1718_v14 }
 0x5bb   :  { %v857_v63 = vadd.f32 %v3527_v59, %v5505_v61  ;;  %v848_v57 = vpop.f32.mrb[23].mxu0  ;;  %v898_v45 = vmax.f32 %v854_v28, 0.0 }
 0x5bc   :  { %v849_v19 = vadd.f32 %v5505_v61, %v848_v57  ;;  %v896_v7 = vmax.f32 %v846_v54, 0.0 }
 0x5bd   :  { %v899_v43 = vmax.f32 %v857_v63, 0.0 }
 0x5be   :  { %3593 = vmatmul.mubr.bf16.gmra.mrb[40].mxu0 %v1725_v26  ;;  %3629 = vmatmul.mubr.bf16.gmra.mrb[44].mxu1 %v2222_v31  ;;  %v897_v0 = vmax.f32 %v849_v19, 0.0 }
 0x5bf   :  { %3596 = vmatprep.mubr.bf16.mxu0 %v1726_v50  ;;  %v911_v25 = vpack.c.bf16 %v899_v43, %v898_v45 }
 0x5c0   :  { %v3558_v5 = vpop.f32.mrb[20].mxu1  ;;  %v910_v32 = vpack.c.bf16 %v897_v0, %v896_v7 }
 0x5c1   :  { %v1325_v37 = vadd.f32 %v3558_v5, %v5576_v9  ;;  %v1316_v51 = vpop.f32.mrb[21].mxu1  ;;  %920 = vst.msk [vmem:[#allocation2 + $0x18] sm:$0xff] %vm916_vm3, %v911_v25 }
 0x5c2   :  { %v1317_v62 = vadd.f32 %v1316_v51, %v5576_v9  ;;  %v3559_v34 = vpop.f32.mrb[22].mxu1  ;;  %919 = vst.msk [vmem:[#allocation2 + $0x10] sm:$0xff] %vm916_vm3, %v910_v32 }
 0x5c3   :  { %v1328_v11 = vadd.f32 %v3559_v34, %v5576_v9  ;;  %v1319_v27 = vpop.f32.mrb[23].mxu1  ;;  %v1369_v21 = vmax.f32 %v1325_v37, 0.0 }
 0x5c4   :  { %v1320_v26 = vadd.f32 %v1319_v27, %v5576_v9  ;;  %v1367_v46 = vmax.f32 %v1317_v62, 0.0 }
 0x5c5   :  { %v1370_v44 = vmax.f32 %v1328_v11, 0.0 }
 0x5c6   :  { %v1368_v56 = vmax.f32 %v1320_v26, 0.0  ;;  %3597 = vmatmul.mubr.bf16.gmra.mrb[44].mxu0 %v1727_v10  ;;  %v5640_v10 = vpop.permute.xlu1 %1758 }
 0x5c7   :  { %v1382_v15 = vpack.c.bf16 %v1370_v44, %v1369_v21  ;;  %v3825_v44 = vld [vmem:[%s6010_s5] sm:$0xff]  }
 0x5c8   :  { %v1381_v52 = vpack.c.bf16 %v1368_v56, %v1367_v46  ;;  %v3530_v41 = vpop.f32.mrb[24].mxu0  ;;  %3632 = vmatprep.subr.bf16.mxu0 %v3825_v44  ;;  %v3827_v56 = vld [vmem:[%s6010_s5 + $0x10] sm:$0xff]  }
 0x5c9   :  { %1401 = vrot.lane.b32.xlu0 %v1382_v15, %s4205_s4  ;;  %v870_v35 = vadd.f32 %v3530_v41, %v5505_v61  ;;  %v861_v53 = vpop.f32.mrb[25].mxu0  ;;  %3633 = vmatpush3.bf16.msra.mxu0 %v3825_v44 }
 0x5ca   :  { %1399 = vrot.lane.b32.xlu1 %v1381_v52, %s4205_s4  ;;  %v862_v6 = vadd.f32 %v5505_v61, %v861_v53  ;;  %v3531_v39 = vpop.f32.mrb[26].mxu0  ;;  %v5642_v21 = vpop.permute.xlu1 %2253 }
 0x5cb   :  { %v873_v30 = vadd.f32 %v3531_v39, %v5505_v61  ;;  %v864_v4 = vpop.f32.mrb[27].mxu0  ;;  %v902_v12 = vmax.f32 %v870_v35, 0.0 }
 0x5cc   :  { %v865_v33 = vadd.f32 %v5505_v61, %v864_v4  ;;  %v900_v36 = vmax.f32 %v862_v6, 0.0 }
 0x5cd   :  { %v903_v58 = vmax.f32 %v873_v30, 0.0 }
 0x5ce   :  { %v901_v22 = vmax.f32 %v865_v33, 0.0 }
 0x5cf   :  { %v913_v49 = vpack.c.bf16 %v903_v58, %v902_v12 }
 0x5d0   :  { %v3562_v17 = vpop.f32.mrb[24].mxu1  ;;  %v912_v42 = vpack.c.bf16 %v901_v22, %v900_v36 }
 0x5d1   :  { %v1341_v8 = vadd.f32 %v3562_v17, %v5576_v9  ;;  %v1332_v29 = vpop.f32.mrb[25].mxu1  ;;  %922 = vst.msk [vmem:[#allocation2 + $0x28] sm:$0xff] %vm916_vm3, %v913_v49 }
 0x5d2   :  { %v1333_v1 = vadd.f32 %v1332_v29, %v5576_v9  ;;  %v3563_v47 = vpop.f32.mrb[26].mxu1  ;;  %921 = vst.msk [vmem:[#allocation2 + $0x20] sm:$0xff] %vm916_vm3, %v912_v42 }
 0x5d3   :  { %v1344_v23 = vadd.f32 %v3563_v47, %v5576_v9  ;;  %v1335_v16 = vpop.f32.mrb[27].mxu1  ;;  %v1373_v24 = vmax.f32 %v1341_v8, 0.0 }
 0x5d4   :  { %v1336_v20 = vadd.f32 %v1335_v16, %v5576_v9  ;;  %v1371_v40 = vmax.f32 %v1333_v1, 0.0 }
 0x5d5   :  { %v1374_v60 = vmax.f32 %v1344_v23, 0.0 }
 0x5d6   :  { %v1372_v18 = vmax.f32 %v1336_v20, 0.0 }
 0x5d7   :  { %v1384_v28 = vpack.c.bf16 %v1374_v60, %v1373_v24 }
 0x5d8   :  { %v1383_v38 = vpack.c.bf16 %v1372_v18, %v1371_v40  ;;  %v3534_v13 = vpop.f32.mrb[28].mxu0  ;;  %v3828_v18 = vld [vmem:[%s6010_s5 + $0x18] sm:$0xff]  }
 0x5d9   :  { %1405 = vrot.lane.b32.xlu0 %v1384_v28, %s4205_s4  ;;  %v886_v54 = vadd.f32 %v3534_v13, %v5505_v61  ;;  %v877_v59 = vpop.f32.mrb[29].mxu0 }
 0x5da   :  { %1403 = vrot.lane.b32.xlu1 %v1383_v38, %s4205_s4  ;;  %v878_v3 = vadd.f32 %v5505_v61, %v877_v59  ;;  %v3535_v63 = vpop.f32.mrb[30].mxu0 }
 0x5db   :  { %v889_v57 = vadd.f32 %v3535_v63, %v5505_v61  ;;  %v880_v31 = vpop.f32.mrb[31].mxu0  ;;  %v906_v19 = vmax.f32 %v886_v54, 0.0 }
 0x5dc   :  { %v881_v55 = vadd.f32 %v5505_v61, %v880_v31  ;;  %v904_v45 = vmax.f32 %v878_v3, 0.0 }
 0x5dd   :  { %v907_v50 = vmax.f32 %v889_v57, 0.0 }
 0x5de   :  { %v905_v43 = vmax.f32 %v881_v55, 0.0 }
 0x5df   :  { %v915_v48 = vpack.c.bf16 %v907_v50, %v906_v19 }
 0x5e0   :  { %v3566_v7 = vpop.f32.mrb[28].mxu1  ;;  %v914_v0 = vpack.c.bf16 %v905_v43, %v904_v45 }
 0x5e1   :  { %v1357_v25 = vadd.f32 %v3566_v7, %v5576_v9  ;;  %v1348_v5 = vpop.f32.mrb[29].mxu1  ;;  %924 = vst.msk [vmem:[#allocation2 + $0x38] sm:$0xff] %vm916_vm3, %v915_v48 }
 0x5e2   :  { %v1349_v14 = vadd.f32 %v1348_v5, %v5576_v9  ;;  %v3567_v32 = vpop.f32.mrb[30].mxu1  ;;  %923 = vst.msk [vmem:[#allocation2 + $0x30] sm:$0xff] %vm916_vm3, %v914_v0 }
 0x5e3   :  { %v1360_v37 = vadd.f32 %v3567_v32, %v5576_v9  ;;  %v1351_v51 = vpop.f32.mrb[31].mxu1  ;;  %v1377_v62 = vmax.f32 %v1357_v25, 0.0 }
 0x5e4   :  { %v1352_v61 = vadd.f32 %v1351_v51, %v5576_v9  ;;  %v1375_v2 = vmax.f32 %v1349_v14, 0.0  ;;  %v3826_v9 = vld [vmem:[%s6010_s5 + $0x8] sm:$0xff]   ;;  %s4206_s5 = smov 32  }
 0x5e5   :  { %v1378_v34 = vmax.f32 %v1360_v37, 0.0  ;;  %3634 = vmatprep.subr.bf16.mxu0 %v3826_v9 }
 0x5e6   :  { %v1376_v11 = vmax.f32 %v1352_v61, 0.0  ;;  %3635 = vmatpush3.bf16.msra.mxu0 %v3826_v9 }
 0x5e7   :  { %v1386_v27 = vpack.c.bf16 %v1378_v34, %v1377_v62  ;;  %3636 = vmatprep.subr.bf16.mxu0 %v3827_v56 }
 0x5e8   :  { %v1385_v26 = vpack.c.bf16 %v1376_v11, %v1375_v2 }
 0x5e9   :  { %1409 = vrot.lane.b32.xlu0 %v1386_v27, %s4205_s4 }
 0x5ea   :  { %1407 = vrot.lane.b32.xlu1 %v1385_v26, %s4205_s4  ;;  %3637 = vmatpush3.bf16.msra.mxu0 %v3827_v56 }
 0x5eb   :  { %3638 = vmatprep.subr.bf16.mxu0 %v3828_v18 }
 0x5ee   :  { %3639 = vmatpush3.bf16.msra.mxu0 %v3828_v18 }
 0x62b   :  { %v1398_v46 = vpop.permute.xlu0 %1397 }
 0x62c   :  { %1421 = vst.msk [vmem:[#allocation2 + $0x8] sm:$0xff] %vm1419_vm4, %v1398_v46  ;;  %v1396_v15 = vpop.permute.xlu1 %1395 }
 0x62d   :  { %1420 = vst.msk [vmem:[#allocation2] sm:$0xff] %vm1419_vm4, %v1396_v15 }
 0x63b   :  { %v1402_v52 = vpop.permute.xlu0 %1401 }
 0x63c   :  { %1423 = vst.msk [vmem:[#allocation2 + $0x18] sm:$0xff] %vm1419_vm4, %v1402_v52  ;;  %v1400_v41 = vpop.permute.xlu1 %1399 }
 0x63d   :  { %1422 = vst.msk [vmem:[#allocation2 + $0x10] sm:$0xff] %vm1419_vm4, %v1400_v41 }
 0x64b   :  { %v1406_v35 = vpop.permute.xlu0 %1405 }
 0x64c   :  { %1425 = vst.msk [vmem:[#allocation2 + $0x28] sm:$0xff] %vm1419_vm4, %v1406_v35  ;;  %v1404_v53 = vpop.permute.xlu1 %1403 }
 0x64d   :  { %1424 = vst.msk [vmem:[#allocation2 + $0x20] sm:$0xff] %vm1419_vm4, %v1404_v53 }
 0x65b   :  { %v1410_v6 = vpop.permute.xlu0 %1409 }
 0x65c   :  { %1427 = vst.msk [vmem:[#allocation2 + $0x38] sm:$0xff] %vm1419_vm4, %v1410_v6  ;;  %v1408_v39 = vpop.permute.xlu1 %1407 }
 0x65d   :  { %1426 = vst.msk [vmem:[#allocation2 + $0x30] sm:$0xff] %vm1419_vm4, %v1408_v39 }
 0x679   :  { %v3618_v30 = vpop.f32.mrb[32].mxu1 }
 0x67a   :  { %v2299_v4 = vadd.f32 %v3618_v30, %v5642_v21  ;;  %v2290_v33 = vpop.f32.mrb[33].mxu1 }
 0x67b   :  { %v2291_v12 = vadd.f32 %v2290_v33, %v5642_v21  ;;  %v3619_v58 = vpop.f32.mrb[34].mxu1 }
 0x67c   :  { %v2302_v36 = vadd.f32 %v3619_v58, %v5642_v21  ;;  %v2293_v22 = vpop.f32.mrb[35].mxu1  ;;  %v2355_v17 = vmax.f32 %v2299_v4, 0.0 }
 0x67d   :  { %v2294_v49 = vadd.f32 %v2293_v22, %v5642_v21  ;;  %v2353_v8 = vmax.f32 %v2291_v12, 0.0 }
 0x67e   :  { %v2356_v42 = vmax.f32 %v2302_v36, 0.0 }
 0x67f   :  { %v2354_v29 = vmax.f32 %v2294_v49, 0.0 }
 0x680   :  { %v2370_v1 = vpack.c.bf16 %v2356_v42, %v2355_v17 }
 0x681   :  { %v2369_v47 = vpack.c.bf16 %v2354_v29, %v2353_v8  ;;  %v3586_v23 = vpop.f32.mrb[32].mxu0  ;;  %v3622_v16 = vpop.f32.mrb[36].mxu1 }
 0x682   :  { %v1804_v20 = vadd.f32 %v3586_v23, %v5640_v10  ;;  %v2315_v24 = vadd.f32 %v3622_v16, %v5642_v21  ;;  %v1795_v60 = vpop.f32.mrb[33].mxu0  ;;  %v2306_v40 = vpop.f32.mrb[37].mxu1 }
 0x683   :  { %v1796_v28 = vadd.f32 %v1795_v60, %v5640_v10  ;;  %v2307_v38 = vadd.f32 %v2306_v40, %v5642_v21  ;;  %v3587_v13 = vpop.f32.mrb[34].mxu0  ;;  %v3623_v54 = vpop.f32.mrb[38].mxu1 }
 0x684   :  { %v1807_v59 = vadd.f32 %v3587_v13, %v5640_v10  ;;  %v2318_v3 = vadd.f32 %v3623_v54, %v5642_v21  ;;  %v1798_v63 = vpop.f32.mrb[35].mxu0  ;;  %v2309_v57 = vpop.f32.mrb[39].mxu1  ;;  %v1860_v19 = vmax.f32 %v1804_v20, 0.0  ;;  %v2359_v50 = vmax.f32 %v2315_v24, 0.0 }
 0x685   :  { %v1799_v31 = vadd.f32 %v1798_v63, %v5640_v10  ;;  %v2310_v55 = vadd.f32 %v2309_v57, %v5642_v21  ;;  %v1858_v48 = vmax.f32 %v1796_v28, 0.0  ;;  %v2357_v7 = vmax.f32 %v2307_v38, 0.0 }
 0x686   :  { %v1861_v45 = vmax.f32 %v1807_v59, 0.0  ;;  %v2360_v43 = vmax.f32 %v2318_v3, 0.0 }
 0x687   :  { %v1859_v0 = vmax.f32 %v1799_v31, 0.0  ;;  %v2358_v25 = vmax.f32 %v2310_v55, 0.0 }
 0x688   :  { %v1875_v5 = vpack.c.bf16 %v1861_v45, %v1860_v19  ;;  %v2372_v14 = vpack.c.bf16 %v2360_v43, %v2359_v50 }
 0x689   :  { %v1874_v32 = vpack.c.bf16 %v1859_v0, %v1858_v48  ;;  %v2371_v37 = vpack.c.bf16 %v2358_v25, %v2357_v7  ;;  %v3590_v51 = vpop.f32.mrb[36].mxu0  ;;  %v3626_v61 = vpop.f32.mrb[40].mxu1 }
 0x68a   :  { %v1820_v62 = vadd.f32 %v3590_v51, %v5640_v10  ;;  %v2331_v34 = vadd.f32 %v3626_v61, %v5642_v21  ;;  %v1811_v2 = vpop.f32.mrb[37].mxu0  ;;  %v2322_v11 = vpop.f32.mrb[41].mxu1  ;;  %1892 = vrot.lane.b32.xlu0 %v1875_v5, %s4206_s5 }
 0x68b   :  { %v1812_v27 = vadd.f32 %v1811_v2, %v5640_v10  ;;  %v2323_v26 = vadd.f32 %v2322_v11, %v5642_v21  ;;  %v3591_v44 = vpop.f32.mrb[38].mxu0  ;;  %v3627_v9 = vpop.f32.mrb[42].mxu1  ;;  %1890 = vrot.lane.b32.xlu1 %v1874_v32, %s4206_s5 }
 0x68c   :  { %v1823_v46 = vadd.f32 %v3591_v44, %v5640_v10  ;;  %v2334_v56 = vadd.f32 %v3627_v9, %v5642_v21  ;;  %v1814_v15 = vpop.f32.mrb[39].mxu0  ;;  %v2325_v52 = vpop.f32.mrb[43].mxu1  ;;  %v1864_v53 = vmax.f32 %v1820_v62, 0.0  ;;  %v2363_v6 = vmax.f32 %v2331_v34, 0.0  ;;  %v3831_v44 = vld [vmem:[%s6011_s6 + $0x10] sm:$0xff]   ;;  %v3832_v9 = vld [vmem:[%s6011_s6 + $0x18] sm:$0xff]  }
 0x68d   :  { %v1815_v41 = vadd.f32 %v1814_v15, %v5640_v10  ;;  %v2326_v35 = vadd.f32 %v2325_v52, %v5642_v21  ;;  %v1862_v4 = vmax.f32 %v1812_v27, 0.0  ;;  %v2361_v33 = vmax.f32 %v2323_v26, 0.0  ;;  %v3829_v26 = vld [vmem:[%s6011_s6] sm:$0xff]   ;;  %v3835_v15 = vld [vmem:[%s6011_s6 + $0x30] sm:$0xff]  }
 0x68e   :  { %v1865_v39 = vmax.f32 %v1823_v46, 0.0  ;;  %v2364_v30 = vmax.f32 %v2334_v56, 0.0  ;;  %2387 = vrot.lane.b32.xlu0 %v2370_v1, %s4207_s27  ;;  %3656 = vmatprep.subr.bf16.mxu1 %v3829_v26  ;;  %v3833_v46 = vld [vmem:[%s6011_s6 + $0x20] sm:$0xff]   ;;  %v3834_v56 = vld [vmem:[%s6011_s6 + $0x28] sm:$0xff]  }
 0x68f   :  { %v1863_v12 = vmax.f32 %v1815_v41, 0.0  ;;  %v2362_v58 = vmax.f32 %v2326_v35, 0.0  ;;  %2385 = vrot.lane.b32.xlu1 %v2369_v47, %s4207_s27  ;;  %3657 = vmatpush3.bf16.msra.mxu1 %v3829_v26 }
 0x690   :  { %v1877_v36 = vpack.c.bf16 %v1865_v39, %v1864_v53  ;;  %v2374_v22 = vpack.c.bf16 %v2364_v30, %v2363_v6 }
 0x691   :  { %v1876_v49 = vpack.c.bf16 %v1863_v12, %v1862_v4  ;;  %v2373_v17 = vpack.c.bf16 %v2362_v58, %v2361_v33  ;;  %v3594_v42 = vpop.f32.mrb[40].mxu0  ;;  %v3630_v8 = vpop.f32.mrb[44].mxu1 }
 0x692   :  { %v1836_v29 = vadd.f32 %v3594_v42, %v5640_v10  ;;  %v2347_v23 = vadd.f32 %v3630_v8, %v5642_v21  ;;  %v1827_v16 = vpop.f32.mrb[41].mxu0  ;;  %v2338_v20 = vpop.f32.mrb[45].mxu1  ;;  %1896 = vrot.lane.b32.xlu0 %v1877_v36, %s4206_s5 }
 0x693   :  { %v1828_v1 = vadd.f32 %v1827_v16, %v5640_v10  ;;  %v2339_v24 = vadd.f32 %v2338_v20, %v5642_v21  ;;  %v3595_v60 = vpop.f32.mrb[42].mxu0  ;;  %v3631_v47 = vpop.f32.mrb[46].mxu1  ;;  %1894 = vrot.lane.b32.xlu1 %v1876_v49, %s4206_s5 }
 0x694   :  { %v1839_v40 = vadd.f32 %v3595_v60, %v5640_v10  ;;  %v2350_v18 = vadd.f32 %v3631_v47, %v5642_v21  ;;  %v1830_v28 = vpop.f32.mrb[43].mxu0  ;;  %v2341_v38 = vpop.f32.mrb[47].mxu1  ;;  %v1868_v59 = vmax.f32 %v1836_v29, 0.0  ;;  %v2367_v3 = vmax.f32 %v2347_v23, 0.0  ;;  %v3836_v47 = vld [vmem:[%s6011_s6 + $0x38] sm:$0xff]  }
 0x695   :  { %v1831_v13 = vadd.f32 %v1830_v28, %v5640_v10  ;;  %v2342_v54 = vadd.f32 %v2341_v38, %v5642_v21  ;;  %v1866_v31 = vmax.f32 %v1828_v1, 0.0  ;;  %v2365_v55 = vmax.f32 %v2339_v24, 0.0 }
 0x696   :  { %v1869_v63 = vmax.f32 %v1839_v40, 0.0  ;;  %v2368_v57 = vmax.f32 %v2350_v18, 0.0  ;;  %2391 = vrot.lane.b32.xlu0 %v2372_v14, %s4207_s27 }
 0x697   :  { %v1867_v19 = vmax.f32 %v1831_v13, 0.0  ;;  %v2366_v50 = vmax.f32 %v2342_v54, 0.0  ;;  %2389 = vrot.lane.b32.xlu1 %v2371_v37, %s4207_s27 }
 0x698   :  { %v1879_v45 = vpack.c.bf16 %v1869_v63, %v1868_v59  ;;  %v2376_v43 = vpack.c.bf16 %v2368_v57, %v2367_v3 }
 0x699   :  { %v1878_v48 = vpack.c.bf16 %v1867_v19, %v1866_v31  ;;  %v2375_v7 = vpack.c.bf16 %v2366_v50, %v2365_v55  ;;  %v3598_v0 = vpop.f32.mrb[44].mxu0 }
 0x69a   :  { %v1852_v25 = vadd.f32 %v3598_v0, %v5640_v10  ;;  %v1843_v21 = vpop.f32.mrb[45].mxu0  ;;  %1900 = vrot.lane.b32.xlu0 %v1879_v45, %s4206_s5 }
 0x69b   :  { %v1844_v5 = vadd.f32 %v1843_v21, %v5640_v10  ;;  %v3599_v32 = vpop.f32.mrb[46].mxu0  ;;  %1898 = vrot.lane.b32.xlu1 %v1878_v48, %s4206_s5 }
 0x69c   :  { %v1855_v14 = vadd.f32 %v3599_v32, %v5640_v10  ;;  %v1846_v51 = vpop.f32.mrb[47].mxu0  ;;  %v1872_v61 = vmax.f32 %v1852_v25, 0.0 }
 0x69d   :  { %v1847_v37 = vadd.f32 %v1846_v51, %v5640_v10  ;;  %v1870_v34 = vmax.f32 %v1844_v5, 0.0  ;;  %v3830_v10 = vld [vmem:[%s6011_s6 + $0x8] sm:$0xff]  }
 0x69e   :  { %v1873_v62 = vmax.f32 %v1855_v14, 0.0  ;;  %2395 = vrot.lane.b32.xlu0 %v2374_v22, %s4207_s27  ;;  %3658 = vmatprep.subr.bf16.mxu1 %v3830_v10 }
 0x69f   :  { %v1871_v2 = vmax.f32 %v1847_v37, 0.0  ;;  %2393 = vrot.lane.b32.xlu1 %v2373_v17, %s4207_s27  ;;  %3659 = vmatpush3.bf16.msra.mxu1 %v3830_v10 }
 0x6a0   :  { %v1881_v11 = vpack.c.bf16 %v1873_v62, %v1872_v61  ;;  %3660 = vmatprep.subr.bf16.mxu1 %v3831_v44 }
 0x6a1   :  { %v1880_v27 = vpack.c.bf16 %v1871_v2, %v1870_v34 }
 0x6a2   :  { %1904 = vrot.lane.b32.xlu0 %v1881_v11, %s4206_s5 }
 0x6a3   :  { %1902 = vrot.lane.b32.xlu1 %v1880_v27, %s4206_s5  ;;  %3661 = vmatpush3.bf16.msra.mxu1 %v3831_v44 }
 0x6a4   :  { %3662 = vmatprep.subr.bf16.mxu1 %v3832_v9 }
 0x6a6   :  { %2399 = vrot.lane.b32.xlu0 %v2376_v43, %s4207_s27 }
 0x6a7   :  { %2397 = vrot.lane.b32.xlu1 %v2375_v7, %s4207_s27  ;;  %3663 = vmatpush3.bf16.msra.mxu1 %v3832_v9 }
 0x6a8   :  { %3664 = vmatprep.subr.bf16.mxu1 %v3833_v46 }
 0x6ab   :  { %3665 = vmatpush3.bf16.msra.mxu1 %v3833_v46 }
 0x6ac   :  { %3666 = vmatprep.subr.bf16.mxu1 %v3834_v56 }
 0x6af   :  { %3667 = vmatpush3.bf16.msra.mxu1 %v3834_v56 }
 0x6b0   :  { %3668 = vmatprep.subr.bf16.mxu1 %v3835_v15 }
 0x6b3   :  { %3669 = vmatpush3.bf16.msra.mxu1 %v3835_v15 }
 0x6b4   :  { %3670 = vmatprep.subr.bf16.mxu1 %v3836_v47 }
 0x6b7   :  { %3671 = vmatpush3.bf16.msra.mxu1 %v3836_v47 }
 0x6fc   :  { %v1893_v52 = vpop.permute.xlu0 %1892 }
 0x6fd   :  { %1916 = vst.msk [vmem:[#allocation2 + $0x8] sm:$0xff] %vm1914_vm5, %v1893_v52  ;;  %v1891_v41 = vpop.permute.xlu1 %1890 }
 0x6fe   :  { %1915 = vst.msk [vmem:[#allocation2] sm:$0xff] %vm1914_vm5, %v1891_v41 }
 0x700   :  { %v2388_v35 = vpop.permute.xlu0 %2387 }
 0x701   :  { %2411 = vst.msk [vmem:[#allocation2 + $0x8] sm:$0xff] %vm2409_vm6, %v2388_v35  ;;  %v2386_v53 = vpop.permute.xlu1 %2385 }
 0x702   :  { %2410 = vst.msk [vmem:[#allocation2] sm:$0xff] %vm2409_vm6, %v2386_v53 }
 0x704   :  { %v1897_v6 = vpop.permute.xlu0 %1896 }
 0x705   :  { %1918 = vst.msk [vmem:[#allocation2 + $0x18] sm:$0xff] %vm1914_vm5, %v1897_v6  ;;  %v1895_v39 = vpop.permute.xlu1 %1894 }
 0x706   :  { %1917 = vst.msk [vmem:[#allocation2 + $0x10] sm:$0xff] %vm1914_vm5, %v1895_v39 }
 0x708   :  { %v2392_v30 = vpop.permute.xlu0 %2391  ;;  %v2419_v12 = vld [vmem:[#allocation2 + $0x8] sm:$0xff] }
 0x709   :  { %2413 = vst.msk [vmem:[#allocation2 + $0x18] sm:$0xff] %vm2409_vm6, %v2392_v30  ;;  %v2390_v4 = vpop.permute.xlu1 %2389  ;;  %v2418_v33 = vld [vmem:[#allocation2] sm:$0xff] }
 0x70a   :  { %2412 = vst.msk [vmem:[#allocation2 + $0x10] sm:$0xff] %vm2409_vm6, %v2390_v4  ;;  %3640 = vmatprep.mubr.msk.bf16.mxu0 %vm270_vm2, %v2418_v33 }
 0x70b   :  { %3641 = vmatmul.mubr.msk.bf16.vlgmr.msra.gmra.mrb[48].mxu0 %vm270_vm2, %v2419_v12 }
 0x70c   :  { %v1901_v58 = vpop.permute.xlu0 %1900 }
 0x70d   :  { %1920 = vst.msk [vmem:[#allocation2 + $0x28] sm:$0xff] %vm1914_vm5, %v1901_v58  ;;  %v1899_v36 = vpop.permute.xlu1 %1898 }
 0x70e   :  { %1919 = vst.msk [vmem:[#allocation2 + $0x20] sm:$0xff] %vm1914_vm5, %v1899_v36 }
 0x710   :  { %v2396_v22 = vpop.permute.xlu0 %2395  ;;  %v2421_v42 = vld [vmem:[#allocation2 + $0x18] sm:$0xff] }
 0x711   :  { %2415 = vst.msk [vmem:[#allocation2 + $0x28] sm:$0xff] %vm2409_vm6, %v2396_v22  ;;  %v2394_v49 = vpop.permute.xlu1 %2393  ;;  %v2420_v17 = vld [vmem:[#allocation2 + $0x10] sm:$0xff] }
 0x712   :  { %2414 = vst.msk [vmem:[#allocation2 + $0x20] sm:$0xff] %vm2409_vm6, %v2394_v49  ;;  %3644 = vmatprep.mubr.msk.bf16.mxu0 %vm270_vm2, %v2420_v17 }
 0x713   :  { %3645 = vmatmul.mubr.msk.bf16.gmra.mrb[52].mxu0 %vm270_vm2, %v2421_v42 }
 0x714   :  { %v1905_v8 = vpop.permute.xlu0 %1904 }
 0x715   :  { %1922 = vst.msk [vmem:[#allocation2 + $0x38] sm:$0xff] %vm1914_vm5, %v1905_v8  ;;  %v1903_v29 = vpop.permute.xlu1 %1902 }
 0x716   :  { %1921 = vst.msk [vmem:[#allocation2 + $0x30] sm:$0xff] %vm1914_vm5, %v1903_v29 }
 0x718   :  { %v2400_v23 = vpop.permute.xlu0 %2399  ;;  %v2423_v1 = vld [vmem:[#allocation2 + $0x28] sm:$0xff] }
 0x719   :  { %2417 = vst.msk [vmem:[#allocation2 + $0x38] sm:$0xff] %vm2409_vm6, %v2400_v23  ;;  %v2398_v16 = vpop.permute.xlu1 %2397  ;;  %v2422_v20 = vld [vmem:[#allocation2 + $0x20] sm:$0xff] }
 0x71a   :  { %2416 = vst.msk [vmem:[#allocation2 + $0x30] sm:$0xff] %vm2409_vm6, %v2398_v16  ;;  %3648 = vmatprep.mubr.msk.bf16.mxu0 %vm270_vm2, %v2422_v20 }
 0x71b   :  { %3649 = vmatmul.mubr.msk.bf16.gmra.mrb[56].mxu0 %vm270_vm2, %v2423_v1 }
 0x720   :  { %v2425_v60 = vld [vmem:[#allocation2 + $0x38] sm:$0xff] }
 0x721   :  { %v2424_v24 = vld [vmem:[#allocation2 + $0x30] sm:$0xff] }
 0x722   :  { %3652 = vmatprep.mubr.msk.bf16.mxu0 %vm270_vm2, %v2424_v24 }
 0x723   :  { %3653 = vmatmul.mubr.msk.bf16.gmra.mrb[60].mxu0 %vm270_vm2, %v2425_v60 }
 0x7de   :  { %v3642_v40 = vpop.f32.mrb[48].mxu0 }
 0x7df   :  { %v2516_v18 = vpop.f32.mrb[49].mxu0 }
 0x7e0   :  { %v3643_v28 = vpop.f32.mrb[50].mxu0 }
 0x7e1   :  { %v2580_v38 = vpack.c.bf16 %v3643_v28, %v3642_v40  ;;  %v2519_v13 = vpop.f32.mrb[51].mxu0 }
 0x7e2   :  { %v2579_v54 = vpack.c.bf16 %v2519_v13, %v2516_v18 }
 0x7e4   :  { %3672 = vmatprep.mubr.bf16.mxu1 %v2579_v54  ;;  %3688 = vmatprep.subr.bf16.mxu0 %v2579_v54 }
 0x7e5   :  { %3720 = vmatprep.subr.bf16.mxu1 %v2579_v54  ;;  %3673 = vmatmul.mubr.bf16.vlgmr.msra.gmra.mrb[48].mxu1 %v2580_v38 }
 0x7e6   :  { %3689 = vmatpush3.bf16.msra.mxu0 %v2579_v54  ;;  %3728 = vmatpush3.bf16.msra.mxu1 %v2579_v54  ;;  %v3646_v59 = vpop.f32.mrb[52].mxu0 }
 0x7e7   :  { %3690 = vmatprep.subr.bf16.mxu0 %v2580_v38  ;;  %3721 = vmatprep.subr.bf16.mxu1 %v2580_v38  ;;  %v2532_v3 = vpop.f32.mrb[53].mxu0 }
 0x7e8   :  { %v3647_v63 = vpop.f32.mrb[54].mxu0 }
 0x7e9   :  { %v2582_v57 = vpack.c.bf16 %v3647_v63, %v3646_v59  ;;  %v2535_v31 = vpop.f32.mrb[55].mxu0  ;;  %v6216_v63 = vld [vmem:[#allocation35_spill] sm:$0xff] }
 0x7ea   :  { %v2581_v55 = vpack.c.bf16 %v2535_v31, %v2532_v3  ;;  %3691 = vmatpush3.bf16.msra.mxu0 %v2580_v38  ;;  %3729 = vmatpush3.bf16.msra.mxu1 %v2580_v38 }
 0x7ec   :  { %3676 = vmatprep.mubr.bf16.mxu1 %v2581_v55  ;;  %3692 = vmatprep.subr.bf16.mxu0 %v2581_v55 }
 0x7ed   :  { %3722 = vmatprep.subr.bf16.mxu1 %v2581_v55  ;;  %3677 = vmatmul.mubr.bf16.gmra.mrb[52].mxu1 %v2582_v57 }
 0x7ee   :  { %3693 = vmatpush3.bf16.msra.mxu0 %v2581_v55  ;;  %3730 = vmatpush3.bf16.msra.mxu1 %v2581_v55  ;;  %v3650_v19 = vpop.f32.mrb[56].mxu0 }
 0x7ef   :  { %3694 = vmatprep.subr.bf16.mxu0 %v2582_v57  ;;  %3723 = vmatprep.subr.bf16.mxu1 %v2582_v57  ;;  %v2548_v50 = vpop.f32.mrb[57].mxu0 }
 0x7f0   :  { %v3651_v45 = vpop.f32.mrb[58].mxu0 }
 0x7f1   :  { %v2584_v43 = vpack.c.bf16 %v3651_v45, %v3650_v19  ;;  %v2551_v48 = vpop.f32.mrb[59].mxu0 }
 0x7f2   :  { %v2583_v7 = vpack.c.bf16 %v2551_v48, %v2548_v50  ;;  %3695 = vmatpush3.bf16.msra.mxu0 %v2582_v57  ;;  %3731 = vmatpush3.bf16.msra.mxu1 %v2582_v57  ;;  %v6217_v57 = vsub.s32 0, %v6216_v63 }
 0x7f4   :  { %3680 = vmatprep.mubr.bf16.mxu1 %v2583_v7  ;;  %3696 = vmatprep.subr.bf16.mxu0 %v2583_v7 }
 0x7f5   :  { %3724 = vmatprep.subr.bf16.mxu1 %v2583_v7  ;;  %3681 = vmatmul.mubr.bf16.gmra.mrb[56].mxu1 %v2584_v43 }
 0x7f6   :  { %3697 = vmatpush3.bf16.msra.mxu0 %v2583_v7  ;;  %3732 = vmatpush3.bf16.msra.mxu1 %v2583_v7  ;;  %v3654_v0 = vpop.f32.mrb[60].mxu0 }
 0x7f7   :  { %3698 = vmatprep.subr.bf16.mxu0 %v2584_v43  ;;  %3725 = vmatprep.subr.bf16.mxu1 %v2584_v43  ;;  %v2564_v25 = vpop.f32.mrb[61].mxu0 }
 0x7f8   :  { %v3655_v21 = vpop.f32.mrb[62].mxu0 }
 0x7f9   :  { %v2586_v5 = vpack.c.bf16 %v3655_v21, %v3654_v0  ;;  %v2567_v32 = vpop.f32.mrb[63].mxu0 }
 0x7fa   :  { %v2585_v14 = vpack.c.bf16 %v2567_v32, %v2564_v25  ;;  %3699 = vmatpush3.bf16.msra.mxu0 %v2584_v43  ;;  %3733 = vmatpush3.bf16.msra.mxu1 %v2584_v43  ;;  %v4157_v32 = vld [vmem:[%s6006_s1] sm:$0xff] }
 0x7fc   :  { %3684 = vmatprep.mubr.bf16.mxu1 %v2585_v14  ;;  %3700 = vmatprep.subr.bf16.mxu0 %v2585_v14 }
 0x7fd   :  { %3726 = vmatprep.subr.bf16.mxu1 %v2585_v14  ;;  %3685 = vmatmul.mubr.bf16.gmra.mrb[60].mxu1 %v2586_v5 }
 0x7fe   :  { %3701 = vmatpush3.bf16.msra.mxu0 %v2585_v14  ;;  %3734 = vmatpush3.bf16.msra.mxu1 %v2585_v14 }
 0x7ff   :  { %3702 = vmatprep.subr.bf16.mxu0 %v2586_v5  ;;  %3727 = vmatprep.subr.bf16.mxu1 %v2586_v5 }
 0x802   :  { %3703 = vmatpush3.bf16.msra.mxu0 %v2586_v5  ;;  %3735 = vmatpush3.bf16.msra.mxu1 %v2586_v5 }
 0x8b8   :  { %v3674_v51 = vpop.f32.mrb[48].mxu1 }
 0x8b9   :  { %v2685_v37 = vpop.f32.mrb[49].mxu1 }
 0x8ba   :  { %2764 = vrot.lane.b32.xlu1 %v2685_v37, %s4201_s3  ;;  %v3675_v61 = vpop.f32.mrb[50].mxu1 }
 0x8bb   :  { %2770 = vrot.lane.b32.xlu0 %v3675_v61, %s4201_s3  ;;  %v2688_v62 = vpop.f32.mrb[51].mxu1 }
 0x8be   :  { %2768 = vrot.lane.b32.xlu1 %v3674_v51, %s4201_s3 }
 0x8bf   :  { %2766 = vrot.lane.b32.xlu0 %v2688_v62, %s4201_s3 }
 0x8c0   :  { %v3678_v34 = vpop.f32.mrb[52].mxu1 }
 0x8c1   :  { %v2701_v2 = vpop.f32.mrb[53].mxu1 }
 0x8c2   :  { %2772 = vrot.lane.b32.xlu1 %v2701_v2, %s4201_s3  ;;  %v3679_v11 = vpop.f32.mrb[54].mxu1 }
 0x8c3   :  { %2778 = vrot.lane.b32.xlu0 %v3679_v11, %s4201_s3  ;;  %v2704_v27 = vpop.f32.mrb[55].mxu1 }
 0x8c6   :  { %2776 = vrot.lane.b32.xlu1 %v3678_v34, %s4201_s3 }
 0x8c7   :  { %2774 = vrot.lane.b32.xlu0 %v2704_v27, %s4201_s3 }
 0x8c8   :  { %v3682_v26 = vpop.f32.mrb[56].mxu1 }
 0x8c9   :  { %v2717_v10 = vpop.f32.mrb[57].mxu1 }
 0x8ca   :  { %2780 = vrot.lane.b32.xlu1 %v2717_v10, %s4201_s3  ;;  %v3683_v44 = vpop.f32.mrb[58].mxu1 }
 0x8cb   :  { %2786 = vrot.lane.b32.xlu0 %v3683_v44, %s4201_s3  ;;  %v2720_v9 = vpop.f32.mrb[59].mxu1 }
 0x8ce   :  { %2784 = vrot.lane.b32.xlu1 %v3682_v26, %s4201_s3 }
 0x8cf   :  { %2782 = vrot.lane.b32.xlu0 %v2720_v9, %s4201_s3 }
 0x8d0   :  { %v3686_v46 = vpop.f32.mrb[60].mxu1 }
 0x8d1   :  { %v2733_v56 = vpop.f32.mrb[61].mxu1 }
 0x8d2   :  { %2788 = vrot.lane.b32.xlu1 %v2733_v56, %s4201_s3  ;;  %v3687_v15 = vpop.f32.mrb[62].mxu1 }
 0x8d3   :  { %2849 = vperm.xlu0 %3812, %v2688_v62   ;;  %v2736_v52 = vpop.f32.mrb[63].mxu1 }
 0x8d6   :  { %2792 = vrot.lane.b32.xlu1 %v3686_v46, %s4201_s3 }
 0x8d7   :  { %2861 = vperm.xlu0 %3812, %v2701_v2  }
 0x8da   :  { %2845 = vperm.xlu1 %3811, %v2685_v37  }
 0x8db   :  { %2869 = vperm.xlu0 %3812, %v3678_v34   ;;  %v4159_v34 = vld [vmem:[%s6006_s1 + $0x8] sm:$0xff] }
 0x8de   :  { %2853 = vperm.xlu1 %3811, %v3674_v51   ;;  %v4158_v51 = vld [vmem:[%s6006_s1 + $0x78] sm:$0xff] }
 0x8df   :  { %2877 = vperm.xlu0 %3812, %v2717_v10   ;;  %v4160_v10 = vld [vmem:[%s6006_s1 + $0x10] sm:$0xff] }
 0x8e2   :  { %2857 = vperm.xlu1 %3811, %v3675_v61  }
 0x8e3   :  { %2885 = vperm.xlu0 %3812, %v3682_v26  }
 0x8e6   :  { %2865 = vperm.xlu1 %3811, %v2704_v27  }
 0x8e7   :  { %2901 = vperm.xlu0 %3812, %v3686_v46  }
 0x8ea   :  { %2873 = vperm.xlu1 %3811, %v3679_v11  }
 0x8eb   :  { %2893 = vperm.xlu0 %3812, %v2733_v56  }
 0x8ee   :  { %2881 = vperm.xlu1 %3811, %v2720_v9  }
 0x8ef   :  { %2794 = vrot.lane.b32.xlu0 %v3687_v15, %s4201_s3 }
 0x8f2   :  { %2889 = vperm.xlu1 %3811, %v3683_v44  }
 0x8f3   :  { %2790 = vrot.lane.b32.xlu0 %v2736_v52, %s4201_s3 }
 0x8f6   :  { %2897 = vperm.xlu1 %3811, %v2736_v52  }
 0x8fa   :  { %2905 = vperm.xlu1 %3811, %v3687_v15   ;;  %v4161_v15 = vld [vmem:[%s6006_s1 + $0x18] sm:$0xff] }
 0x92c   :  { %v2765_v41 = vpop.permute.xlu1 %2764 }
 0x92d   :  { %v2771_v35 = vpop.permute.xlu0 %2770  ;;  %2812 = vxpose.xlu0.b32.start [1/16] (narrow) %v2765_v41, 8 }
 0x930   :  { %v2769_v6 = vpop.permute.xlu1 %2768 }
 0x931   :  { %v2767_v53 = vpop.permute.xlu0 %2766 }
 0x932   :  { %2813 = vxpose.xlu0.b32.cont [2/16] (narrow) %v2767_v53, 8 }
 0x934   :  { %v2773_v30 = vpop.permute.xlu1 %2772 }
 0x935   :  { %v2779_v39 = vpop.permute.xlu0 %2778 }
 0x936   :  { %2814 = vxpose.xlu0.b32.cont [3/16] (narrow) %v2769_v6, 8  ;;  %v4162_v6 = vld [vmem:[%s6006_s1 + $0x20] sm:$0xff] }
 0x938   :  { %v2777_v33 = vpop.permute.xlu1 %2776 }
 0x939   :  { %v2775_v4 = vpop.permute.xlu0 %2774 }
 0x93a   :  { %2815 = vxpose.xlu0.b32.cont [4/16] (narrow) %v2771_v35, 8 }
 0x93c   :  { %v2781_v58 = vpop.permute.xlu1 %2780 }
 0x93d   :  { %v2787_v12 = vpop.permute.xlu0 %2786 }
 0x93e   :  { %2816 = vxpose.xlu0.b32.cont [5/16] (narrow) %v2773_v30, 8 }
 0x940   :  { %v2785_v49 = vpop.permute.xlu1 %2784 }
 0x941   :  { %v2783_v36 = vpop.permute.xlu0 %2782 }
 0x942   :  { %2817 = vxpose.xlu0.b32.cont [6/16] (narrow) %v2775_v4, 8 }
 0x944   :  { %v2789_v8 = vpop.permute.xlu1 %2788 }
 0x946   :  { %2818 = vxpose.xlu0.b32.cont [7/16] (narrow) %v2777_v33, 8 }
 0x948   :  { %v2793_v60 = vpop.permute.xlu1 %2792 }
 0x94a   :  { %2819 = vxpose.xlu0.b32.cont [8/16] (narrow) %v2779_v39, 8 }
 0x94e   :  { %2820 = vxpose.xlu0.b32.cont [9/16] (narrow) %v2781_v58, 8 }
 0x952   :  { %v2850_v22 = vpop.permute.xlu0 %2849  ;;  %2821 = vxpose.xlu0.b32.cont [10/16] (narrow) %v2783_v36, 8 }
 0x956   :  { %v2862_v17 = vpop.permute.xlu0 %2861  ;;  %2822 = vxpose.xlu0.b32.cont [11/16] (narrow) %v2785_v49, 8 }
 0x959   :  { %v2846_v47 = vpop.permute.xlu1 %2845 }
 0x95a   :  { %v2870_v42 = vpop.permute.xlu0 %2869  ;;  %2823 = vxpose.xlu0.b32.cont [12/16] (narrow) %v2787_v12, 8  ;;  %v4163_v12 = vld [vmem:[%s6006_s1 + $0x28] sm:$0xff] }
 0x95d   :  { %v2854_v40 = vpop.permute.xlu1 %2853 }
 0x95e   :  { %v5776_v29 = vpop.permute.xlu0 %2877  ;;  %2824 = vxpose.xlu0.b32.cont [13/16] (narrow) %v2789_v8, 8 }
 0x961   :  { %v2858_v18 = vpop.permute.xlu1 %2857 }
 0x962   :  { %v5778_v23 = vpop.permute.xlu0 %2885 }
 0x965   :  { %v2866_v28 = vpop.permute.xlu1 %2865 }
 0x966   :  { %v5780_v16 = vpop.permute.xlu0 %2901 }
 0x969   :  { %v2874_v38 = vpop.permute.xlu1 %2873 }
 0x96a   :  { %v5782_v20 = vpop.permute.xlu0 %2893 }
 0x96d   :  { %v2882_v13 = vpop.permute.xlu1 %2881 }
 0x96e   :  { %v2795_v1 = vpop.permute.xlu0 %2794 }
 0x971   :  { %v5784_v54 = vpop.permute.xlu1 %2889 }
 0x972   :  { %v2791_v24 = vpop.permute.xlu0 %2790 }
 0x973   :  { %2825 = vxpose.xlu0.b32.cont [14/16] (narrow) %v2791_v24, 8 }
 0x975   :  { %v5786_v59 = vpop.permute.xlu1 %2897 }
 0x977   :  { %2826 = vxpose.xlu0.b32.cont [15/16] (narrow) %v2793_v60, 8  ;;  %v4165_v60 = vld [vmem:[%s6006_s1 + $0x38] sm:$0xff] }
 0x979   :  { %v2906_v55 = vpop.permute.xlu1 %2905 }
 0x97b   :  { %2827 = vxpose.xlu0.b32.end [16/16] (narrow) %v2795_v1, 8 }
 0x9bf   :  { %v2828_v3 = vpop.trf.xlu0 }
 0x9c0   :  { %v5790_v31 = vrot.slane %v2828_v3, %v6217_v57  ;;  %v4167_v57 = vld [vmem:[%s6006_s1 + $0x48] sm:$0xff] }
 0x9c2   :  { %v2912_v19 = vadd.f32 %v5790_v31, %v2846_v47  ;;  %v2927_v50 = vadd.f32 %v5790_v31, %v2906_v55  ;;  %v2913_v45 = vadd.f32 %v5790_v31, %v2850_v22  ;;  %v2914_v0 = vadd.f32 %v5790_v31, %v2854_v40 }
 0x9c3   :  { %v2915_v5 = vadd.f32 %v5790_v31, %v2858_v18  ;;  %v2916_v26 = vadd.f32 %v5790_v31, %v2862_v17  ;;  %v2917_v56 = vadd.f32 %v5790_v31, %v2866_v28  ;;  %v2918_v53 = vadd.f32 %v5790_v31, %v2870_v42  ;;  %v4164_v17 = vld [vmem:[%s6006_s1 + $0x30] sm:$0xff]  ;;  %v4166_v28 = vld [vmem:[%s6006_s1 + $0x40] sm:$0xff] }
 0x9c4   :  { %v2928_v43 = vmul.f32 0.2, %v2912_v19  ;;  %v2943_v48 = vmul.f32 0.2, %v2927_v50  ;;  %v2929_v7 = vmul.f32 0.2, %v2913_v45  ;;  %v2919_v33 = vadd.f32 %v5790_v31, %v2874_v38 }
 0x9c5   :  { %v2930_v62 = vmul.f32 0.2, %v2914_v0  ;;  %v2931_v27 = vmul.f32 0.2, %v2915_v5  ;;  %v2932_v46 = vmul.f32 0.2, %v2916_v26  ;;  %v2920_v49 = vadd.f32 %v5790_v31, %v5776_v29 }
 0x9c6   :  { %v2944_v25 = vmax.f32 %v2912_v19, %v2928_v43  ;;  %v2959_v21 = vmax.f32 %v2927_v50, %v2943_v48  ;;  %v2945_v61 = vmax.f32 %v2913_v45, %v2929_v7  ;;  %v2933_v35 = vmul.f32 0.2, %v2917_v56  ;;  %v4168_v45 = vld [vmem:[%s6006_s1 + $0x60] sm:$0xff] }
 0x9c7   :  { %v2946_v11 = vmax.f32 %v2914_v0, %v2930_v62  ;;  %v2947_v9 = vmax.f32 %v2915_v5, %v2931_v27  ;;  %v2948_v41 = vmax.f32 %v2916_v26, %v2932_v46  ;;  %v2934_v4 = vmul.f32 0.2, %v2918_v53  ;;  %v4169_v0 = vld [vmem:[%s6006_s1 + $0x68] sm:$0xff]  ;;  %v4171_v62 = vld [vmem:[%s6006_s1 + $0x58] sm:$0xff] }
 0x9c8   :  { %v5800_v14 = vadd.f32 %v4157_v32, %v2944_v25  ;;  %v5805_v37 = vadd.f32 %v4158_v51, %v2959_v21  ;;  %v5812_v2 = vadd.f32 %v4159_v34, %v2945_v61  ;;  %v2949_v30 = vmax.f32 %v2917_v56, %v2933_v35  ;;  %v4170_v32 = vld [vmem:[%s6006_s1 + $0x50] sm:$0xff] }
 0x9c9   :  { %v5819_v44 = vadd.f32 %v4160_v10, %v2946_v11  ;;  %v5826_v52 = vadd.f32 %v4161_v15, %v2947_v9  ;;  %v5833_v39 = vadd.f32 %v4162_v6, %v2948_v41  ;;  %v2950_v36 = vmax.f32 %v2918_v53, %v2934_v4 }
 0x9ca   :  { %2976 = vmax.xlane.f32.xlu1 %v5800_v14  ;;  %3006 = vmax.xlane.f32.xlu0 %v5805_v37  ;;  %v5840_v58 = vadd.f32 %v4163_v12, %v2949_v30  ;;  %v2935_v22 = vmul.f32 0.2, %v2919_v33  ;;  %v2936_v1 = vmul.f32 0.2, %v2920_v49  ;;  %v2921_v24 = vadd.f32 %v5790_v31, %v2882_v13 }
 0x9cb   :  { %v5848_v42 = vadd.f32 %v4164_v17, %v2950_v36  ;;  %v2924_v18 = vadd.f32 %v5790_v31, %v5782_v20  ;;  %v2925_v63 = vadd.f32 %v5790_v31, %v5786_v59  ;;  %v2922_v50 = vadd.f32 %v5790_v31, %v5778_v23 }
 0x9cc   :  { %v2951_v8 = vmax.f32 %v2919_v33, %v2935_v22  ;;  %v2952_v29 = vmax.f32 %v2920_v49, %v2936_v1  ;;  %v2937_v40 = vmul.f32 0.2, %v2921_v24  ;;  %v2923_v7 = vadd.f32 %v5790_v31, %v5784_v54 }
 0x9cd   :  { %v2940_v3 = vmul.f32 0.2, %v2924_v18  ;;  %v2941_v19 = vmul.f32 0.2, %v2925_v63  ;;  %v2938_v48 = vmul.f32 0.2, %v2922_v50  ;;  %v2926_v5 = vadd.f32 %v5790_v31, %v5780_v16 }
 0x9ce   :  { %2978 = vmax.xlane.f32.xlu1 %v5812_v2  ;;  %v5855_v47 = vadd.f32 %v4165_v60, %v2951_v8  ;;  %v5863_v38 = vadd.f32 %v4166_v28, %v2952_v29  ;;  %v2953_v13 = vmax.f32 %v2921_v24, %v2937_v40  ;;  %v2939_v21 = vmul.f32 0.2, %v2923_v7  ;;  %v4172_v16 = vld [vmem:[%s6006_s1 + $0x70] sm:$0xff] }
 0x9cf   :  { %v2956_v55 = vmax.f32 %v2924_v18, %v2940_v3  ;;  %v2957_v43 = vmax.f32 %v2925_v63, %v2941_v19  ;;  %v2954_v25 = vmax.f32 %v2922_v50, %v2938_v48  ;;  %v2942_v61 = vmul.f32 0.2, %v2926_v5 }
 0x9d0   :  { %v5871_v20 = vadd.f32 %v4167_v57, %v2953_v13  ;;  %v2955_v51 = vmax.f32 %v2923_v7, %v2939_v21 }
 0x9d1   :  { %v5879_v59 = vadd.f32 %v4168_v45, %v2956_v55  ;;  %v5887_v23 = vadd.f32 %v4169_v0, %v2957_v43  ;;  %v5895_v54 = vadd.f32 %v4170_v32, %v2954_v25  ;;  %v2958_v11 = vmax.f32 %v2926_v5, %v2942_v61 }
 0x9d2   :  { %2980 = vmax.xlane.f32.xlu1 %v5819_v44  ;;  %v5901_v34 = vadd.f32 %v4171_v62, %v2955_v51 }
 0x9d3   :  { %v5907_v31 = vadd.f32 %v4172_v16, %v2958_v11 }
 0x9d6   :  { %2982 = vmax.xlane.f32.xlu1 %v5826_v52 }
 0x9da   :  { %2984 = vmax.xlane.f32.xlu1 %v5833_v39 }
 0x9de   :  { %2986 = vmax.xlane.f32.xlu1 %v5840_v58 }
 0x9e2   :  { %2988 = vmax.xlane.f32.xlu1 %v5848_v42 }
 0x9e6   :  { %2990 = vmax.xlane.f32.xlu1 %v5855_v47 }
 0x9ea   :  { %2992 = vmax.xlane.f32.xlu1 %v5863_v38 }
 0x9ee   :  { %2994 = vmax.xlane.f32.xlu1 %v5871_v20 }
 0x9f2   :  { %3000 = vmax.xlane.f32.xlu1 %v5879_v59 }
 0x9f6   :  { %3002 = vmax.xlane.f32.xlu1 %v5887_v23 }
 0x9fa   :  { %2996 = vmax.xlane.f32.xlu1 %v5895_v54 }
 0x9fe   :  { %2998 = vmax.xlane.f32.xlu1 %v5901_v34 }
 0xa02   :  { %3004 = vmax.xlane.f32.xlu1 %v5907_v31 }
 0xa57   :  { %v2977_v27 = vpop.xlane.xlu1 %2976  ;;  %v3007_v48 = vpop.xlane.xlu0 %3006 }
 0xa58   :  { %v3008_v26 = vsub.f32 %v5800_v14, %v2977_v27  ;;  %v3023_v25 = vsub.f32 %v5805_v37, %v3007_v48 }
 0xa5a   :  { %v3024_v10 = vmul.f32 1.442695, %v3008_v26  ;;  %v3054_v51 = vmul.f32 1.442695, %v3023_v25 }
 0xa5b   :  { %v2979_v9 = vpop.xlane.xlu1 %2978 }
 0xa5c   :  { %v3009_v46 = vsub.f32 %v5812_v2, %v2979_v9  ;;  %4093 = vpow2.f32 %v3024_v10 }
 0xa5e   :  { %v3026_v56 = vmul.f32 1.442695, %v3009_v46 }
 0xa5f   :  { %v2981_v15 = vpop.xlane.xlu1 %2980 }
 0xa60   :  { %4095 = vpow2.f32 %v3026_v56  ;;  %v3010_v41 = vsub.f32 %v5819_v44, %v2981_v15 }
 0xa62   :  { %v3028_v35 = vmul.f32 1.442695, %v3010_v41 }
 0xa63   :  { %v2983_v53 = vpop.xlane.xlu1 %2982 }
 0xa64   :  { %4097 = vpow2.f32 %v3028_v35  ;;  %v3011_v6 = vsub.f32 %v5826_v52, %v2983_v53 }
 0xa66   :  { %v3030_v30 = vmul.f32 1.442695, %v3011_v6  ;;  %v5914_v4 = vpop.eup %4093 }
 0xa67   :  { %v2985_v33 = vpop.xlane.xlu1 %2984  ;;  %3056 = vadd.xlane.f32.xlu1 %v5914_v4 }
 0xa68   :  { %4099 = vpow2.f32 %v3030_v30  ;;  %v3012_v14 = vsub.f32 %v5833_v39, %v2985_v33 }
 0xa6a   :  { %v5918_v2 = vpop.eup %4095  ;;  %v3032_v12 = vmul.f32 1.442695, %v3012_v14 }
 0xa6b   :  { %v2987_v36 = vpop.xlane.xlu1 %2986  ;;  %3058 = vadd.xlane.f32.xlu1 %v5918_v2 }
 0xa6c   :  { %4101 = vpow2.f32 %v3032_v12  ;;  %v3013_v44 = vsub.f32 %v5840_v58, %v2987_v36 }
 0xa6e   :  { %v5922_v22 = vpop.eup %4097  ;;  %v3034_v52 = vmul.f32 1.442695, %v3013_v44 }
 0xa6f   :  { %v2989_v49 = vpop.xlane.xlu1 %2988  ;;  %3060 = vadd.xlane.f32.xlu1 %v5922_v22 }
 0xa70   :  { %4103 = vpow2.f32 %v3034_v52  ;;  %v3014_v17 = vsub.f32 %v5848_v42, %v2989_v49 }
 0xa72   :  { %v5926_v8 = vpop.eup %4099  ;;  %v3036_v39 = vmul.f32 1.442695, %v3014_v17 }
 0xa73   :  { %v2991_v1 = vpop.xlane.xlu1 %2990  ;;  %3062 = vadd.xlane.f32.xlu1 %v5926_v8 }
 0xa74   :  { %4105 = vpow2.f32 %v3036_v39  ;;  %v3015_v24 = vsub.f32 %v5855_v47, %v2991_v1 }
 0xa76   :  { %v5930_v60 = vpop.eup %4101  ;;  %v3038_v58 = vmul.f32 1.442695, %v3015_v24 }
 0xa77   :  { %v2993_v29 = vpop.xlane.xlu1 %2992  ;;  %3064 = vadd.xlane.f32.xlu1 %v5930_v60 }
 0xa78   :  { %4107 = vpow2.f32 %v3038_v58  ;;  %v3016_v40 = vsub.f32 %v5863_v38, %v2993_v29 }
 0xa7a   :  { %v5934_v18 = vpop.eup %4103  ;;  %v3040_v42 = vmul.f32 1.442695, %v3016_v40 }
 0xa7b   :  { %v2995_v28 = vpop.xlane.xlu1 %2994  ;;  %3066 = vadd.xlane.f32.xlu1 %v5934_v18 }
 0xa7c   :  { %4109 = vpow2.f32 %v3040_v42  ;;  %v3017_v13 = vsub.f32 %v5871_v20, %v2995_v28 }
 0xa7e   :  { %v5938_v3 = vpop.eup %4105  ;;  %v3042_v47 = vmul.f32 1.442695, %v3017_v13 }
 0xa7f   :  { %v3001_v63 = vpop.xlane.xlu1 %3000  ;;  %3068 = vadd.xlane.f32.xlu1 %v5938_v3 }
 0xa80   :  { %4111 = vpow2.f32 %v3042_v47  ;;  %v3020_v57 = vsub.f32 %v5879_v59, %v3001_v63 }
 0xa82   :  { %v5942_v55 = vpop.eup %4107  ;;  %v3048_v38 = vmul.f32 1.442695, %v3020_v57 }
 0xa83   :  { %v3003_v19 = vpop.xlane.xlu1 %3002  ;;  %3070 = vadd.xlane.f32.xlu1 %v5942_v55 }
 0xa84   :  { %4113 = vpow2.f32 %v3048_v38  ;;  %v3021_v50 = vsub.f32 %v5887_v23, %v3003_v19 }
 0xa86   :  { %v5946_v45 = vpop.eup %4109  ;;  %v3050_v20 = vmul.f32 1.442695, %v3021_v50 }
 0xa87   :  { %v2997_v43 = vpop.xlane.xlu1 %2996  ;;  %3072 = vadd.xlane.f32.xlu1 %v5946_v45 }
 0xa88   :  { %4115 = vpow2.f32 %v3050_v20  ;;  %v3018_v7 = vsub.f32 %v5895_v54, %v2997_v43 }
 0xa8a   :  { %v5950_v59 = vpop.eup %4111  ;;  %v3044_v0 = vmul.f32 1.442695, %v3018_v7 }
 0xa8b   :  { %v2999_v21 = vpop.xlane.xlu1 %2998  ;;  %3074 = vadd.xlane.f32.xlu1 %v5950_v59 }
 0xa8c   :  { %4117 = vpow2.f32 %v3044_v0  ;;  %v3019_v23 = vsub.f32 %v5901_v34, %v2999_v21 }
 0xa8e   :  { %v5955_v5 = vpop.eup %4113  ;;  %v3046_v32 = vmul.f32 1.442695, %v3019_v23 }
 0xa8f   :  { %v3005_v61 = vpop.xlane.xlu1 %3004  ;;  %3080 = vadd.xlane.f32.xlu1 %v5955_v5 }
 0xa90   :  { %4119 = vpow2.f32 %v3046_v32  ;;  %v3022_v54 = vsub.f32 %v5907_v31, %v3005_v61 }
 0xa91   :  { %4121 = vpow2.f32 %v3054_v51 }
 0xa92   :  { %v5959_v62 = vpop.eup %4115  ;;  %v3052_v11 = vmul.f32 1.442695, %v3022_v54 }
 0xa93   :  { %3082 = vadd.xlane.f32.xlu0 %v5959_v62 }
 0xa94   :  { %4123 = vpow2.f32 %v3052_v11 }
 0xa96   :  { %v5962_v37 = vpop.eup %4117 }
 0xa97   :  { %3076 = vadd.xlane.f32.xlu1 %v5962_v37 }
 0xa9a   :  { %v5965_v34 = vpop.eup %4119 }
 0xa9b   :  { %3078 = vadd.xlane.f32.xlu0 %v5965_v34  ;;  %v5968_v16 = vpop.eup %4121 }
 0xa9e   :  { %v5970_v27 = vpop.eup %4123 }
 0xa9f   :  { %3086 = vadd.xlane.f32.xlu0 %v5968_v16  ;;  %3084 = vadd.xlane.f32.xlu1 %v5970_v27 }
 0xaf4   :  { %v3057_v31 = vpop.xlane.xlu1 %3056 }
 0xaf5   :  { %v3088_v26 = vmax.f32 %v3057_v31, 1e-06 }
 0xaf7   :  { %4125 = vrcp.f32 %v3088_v26 }
 0xaf8   :  { %v3059_v10 = vpop.xlane.xlu1 %3058 }
 0xaf9   :  { %v3089_v9 = vmax.f32 %v3059_v10, 1e-06 }
 0xafb   :  { %4127 = vrcp.f32 %v3089_v9 }
 0xafc   :  { %v3061_v46 = vpop.xlane.xlu1 %3060 }
 0xafd   :  { %v3090_v56 = vmax.f32 %v3061_v46, 1e-06 }
 0xaff   :  { %4129 = vrcp.f32 %v3090_v56 }
 0xb00   :  { %v3063_v15 = vpop.xlane.xlu1 %3062 }
 0xb01   :  { %v3091_v41 = vmax.f32 %v3063_v15, 1e-06  ;;  %v4126_v35 = vpop.eup %4125 }
 0xb02   :  { %v3120_v33 = vmul.f32 %v4126_v35, %v5914_v4 }
 0xb03   :  { %4131 = vrcp.f32 %v3091_v41 }
 0xb04   :  { %v3065_v53 = vpop.xlane.xlu1 %3064 }
 0xb05   :  { %v4128_v6 = vpop.eup %4127  ;;  %v3092_v30 = vmax.f32 %v3065_v53, 1e-06 }
 0xb06   :  { %v3121_v14 = vmul.f32 %v4128_v6, %v5918_v2 }
 0xb07   :  { %4133 = vrcp.f32 %v3092_v30 }
 0xb08   :  { %v3067_v12 = vpop.xlane.xlu1 %3066  ;;  %v3136_v36 = vpack.c.bf16 %v3121_v14, %v3120_v33 }
 0xb09   :  { %v3093_v44 = vmax.f32 %v3067_v12, 1e-06  ;;  %v4130_v52 = vpop.eup %4129 }
 0xb0a   :  { %3704 = vmatprep.mubr.bf16.mxu0 %v3136_v36  ;;  %v3122_v1 = vmul.f32 %v4130_v52, %v5922_v22 }
 0xb0b   :  { %4135 = vrcp.f32 %v3093_v44 }
 0xb0c   :  { %v3069_v49 = vpop.xlane.xlu1 %3068 }
 0xb0d   :  { %v4132_v17 = vpop.eup %4131  ;;  %v3094_v39 = vmax.f32 %v3069_v49, 1e-06 }
 0xb0e   :  { %v3123_v24 = vmul.f32 %v4132_v17, %v5926_v8 }
 0xb0f   :  { %4137 = vrcp.f32 %v3094_v39 }
 0xb10   :  { %v3071_v58 = vpop.xlane.xlu1 %3070  ;;  %v3137_v29 = vpack.c.bf16 %v3123_v24, %v3122_v1 }
 0xb11   :  { %v3095_v4 = vmax.f32 %v3071_v58, 1e-06  ;;  %v4134_v2 = vpop.eup %4133 }
 0xb12   :  { %3705 = vmatmul.mubr.bf16.vlgmr.msra.gmra.mrb[64].mxu0 %v3137_v29  ;;  %v3124_v13 = vmul.f32 %v4134_v2, %v5930_v60 }
 0xb13   :  { %4139 = vrcp.f32 %v3095_v4 }
 0xb14   :  { %v3073_v40 = vpop.xlane.xlu1 %3072 }
 0xb15   :  { %v4136_v42 = vpop.eup %4135  ;;  %v3096_v28 = vmax.f32 %v3073_v40, 1e-06 }
 0xb16   :  { %v3125_v47 = vmul.f32 %v4136_v42, %v5934_v18 }
 0xb17   :  { %4141 = vrcp.f32 %v3096_v28 }
 0xb18   :  { %v3075_v63 = vpop.xlane.xlu1 %3074  ;;  %v3138_v57 = vpack.c.bf16 %v3125_v47, %v3124_v13 }
 0xb19   :  { %v3097_v22 = vmax.f32 %v3075_v63, 1e-06  ;;  %v4138_v8 = vpop.eup %4137 }
 0xb1a   :  { %3708 = vmatprep.mubr.bf16.mxu0 %v3138_v57  ;;  %v3126_v20 = vmul.f32 %v4138_v8, %v5938_v3 }
 0xb1b   :  { %4143 = vrcp.f32 %v3097_v22 }
 0xb1c   :  { %v3081_v38 = vpop.xlane.xlu1 %3080 }
 0xb1d   :  { %v4140_v19 = vpop.eup %4139  ;;  %v3100_v50 = vmax.f32 %v3081_v38, 1e-06 }
 0xb1e   :  { %v3127_v43 = vmul.f32 %v4140_v19, %v5942_v55 }
 0xb1f   :  { %4145 = vrcp.f32 %v3100_v50 }
 0xb20   :  { %v3083_v48 = vpop.xlane.xlu0 %3082  ;;  %v3139_v60 = vpack.c.bf16 %v3127_v43, %v3126_v20 }
 0xb21   :  { %v3101_v7 = vmax.f32 %v3083_v48, 1e-06  ;;  %v4142_v18 = vpop.eup %4141 }
 0xb22   :  { %3709 = vmatmul.mubr.bf16.gmra.mrb[68].mxu0 %v3139_v60  ;;  %v3128_v23 = vmul.f32 %v4142_v18, %v5946_v45 }
 0xb23   :  { %4147 = vrcp.f32 %v3101_v7 }
 0xb24   :  { %v3077_v0 = vpop.xlane.xlu1 %3076 }
 0xb25   :  { %v3098_v25 = vmax.f32 %v3077_v0, 1e-06  ;;  %v4144_v21 = vpop.eup %4143 }
 0xb26   :  { %v3129_v32 = vmul.f32 %v4144_v21, %v5950_v59 }
 0xb27   :  { %4149 = vrcp.f32 %v3098_v25 }
 0xb28   :  { %v3079_v51 = vpop.xlane.xlu0 %3078  ;;  %v3140_v3 = vpack.c.bf16 %v3129_v32, %v3128_v23 }
 0xb29   :  { %v3099_v61 = vmax.f32 %v3079_v51, 1e-06  ;;  %v4146_v54 = vpop.eup %4145 }
 0xb2a   :  { %3712 = vmatprep.mubr.bf16.mxu0 %v3140_v3  ;;  %v3132_v9 = vmul.f32 %v4146_v54, %v5955_v5 }
 0xb2b   :  { %4151 = vrcp.f32 %v3099_v61 }
 0xb2c   :  { %v3087_v55 = vpop.xlane.xlu0 %3086  ;;  %v3085_v11 = vpop.xlane.xlu1 %3084 }
 0xb2d   :  { %v4148_v31 = vpop.eup %4147  ;;  %v3103_v26 = vmax.f32 %v3087_v55, 1e-06  ;;  %v3102_v10 = vmax.f32 %v3085_v11, 1e-06 }
 0xb2e   :  { %v3133_v46 = vmul.f32 %v4148_v31, %v5959_v62  ;;  %v3332_v62 = vld [vmem:[%s6012_s7] ss:$0 sm:$0xff]  ;;  %s4208_s7 = smov [#allocation3]  }
 0xb2f   :  { %4153 = vrcp.f32 %v3103_v26  ;;  %s3269_s22 = sshll.u32 %s4208_s7, 4  ;;  %s3270_s22 = int_to_ptr.vmem [resolvable:$true] %s3269_s22 }
 0xb30   :  { %4155 = vrcp.f32 %v3102_v10  ;;  %v3142_v45 = vpack.c.bf16 %v3133_v46, %v3132_v9  ;;  %s4173_s23 = scalar_lea.vmem %s3270_s22, 2048  ;;  %p4178_p1 = scmp.lt.s32.totalorder %s3270_s22, %s3270_s22 }
 0xb31   :  { %v4150_v59 = vpop.eup %4149  ;;  %p4174_p0 = scmp.ne.s32.totalorder %s3270_s22, %s4173_s23  ;;  %p4179_p2 = scmp.lt.s32.totalorder %s4173_s23, %s4173_s23 }
 0xb32   :  { %3716 = vmatprep.mubr.bf16.mxu1 %v3142_v45  ;;  %v3130_v15 = vmul.f32 %v4150_v59, %v5962_v37 }
 0xb33   :  { %p4180_p3 = por %p4179_p2, %p4178_p1 }
 0xb35   :  { %v4152_v56 = vpop.eup %4151  ;;  %p4181_p4 = pnand %p4180_p3, %p4174_p0 }
 0xb36   :  { %v3131_v41 = vmul.f32 %v4152_v56, %v5965_v34 }
 0xb38   :  { %v3141_v35 = vpack.c.bf16 %v3131_v41, %v3130_v15 }
 0xb39   :  { %v4154_v53 = vpop.eup %4153 }
 0xb3a   :  { %v4156_v6 = vpop.eup %4155  ;;  %v3135_v30 = vmul.f32 %v4154_v53, %v5968_v16  ;;  %3713 = vmatmul.mubr.bf16.gmra.mrb[72].mxu0 %v3141_v35 }
 0xb3b   :  { %v3134_v5 = vmul.f32 %v4156_v6, %v5970_v27 }
 0xb3d   :  { %v3143_v33 = vpack.c.bf16 %v3135_v30, %v3134_v5 }
 0xb3f   :  { %3717 = vmatmul.mubr.bf16.vlgmr.msra.gmra.mrb[64].mxu1 %v3143_v33 }
 0xbe5   :  { %v3706_v14 = vpop.f32.mrb[64].mxu0 }
 0xbe6   :  { %v3194_v12 = vadd.f32 %v3706_v14, %v3332_v62  ;;  %v3185_v36 = vpop.f32.mrb[65].mxu0 }
 0xbe7   :  { %v3186_v37 = vadd.f32 %v3332_v62, %v3185_v36  ;;  %v3707_v44 = vpop.f32.mrb[66].mxu0 }
 0xbe8   :  { %3250 = vst [vmem:[#allocation3 + $0x10] sm:$0xff] %v3194_v12  ;;  %v3197_v34 = vadd.f32 %v3707_v44, %v3332_v62  ;;  %v3188_v52 = vpop.f32.mrb[67].mxu0 }
 0xbe9   :  { %3248 = vst [vmem:[#allocation3] sm:$0xff] %v3186_v37  ;;  %v3189_v49 = vadd.f32 %v3332_v62, %v3188_v52 }
 0xbea   :  { %3251 = vst [vmem:[#allocation3 + $0x18] sm:$0xff] %v3197_v34 }
 0xbeb   :  { %3249 = vst [vmem:[#allocation3 + $0x8] sm:$0xff] %v3189_v49 }
 0xbf5   :  { %v3710_v16 = vpop.f32.mrb[68].mxu0 }
 0xbf6   :  { %v3210_v27 = vadd.f32 %v3710_v16, %v3332_v62  ;;  %v3201_v17 = vpop.f32.mrb[69].mxu0 }
 0xbf7   :  { %v3202_v39 = vadd.f32 %v3332_v62, %v3201_v17  ;;  %v3711_v1 = vpop.f32.mrb[70].mxu0 }
 0xbf8   :  { %3254 = vst [vmem:[#allocation3 + $0x30] sm:$0xff] %v3210_v27  ;;  %v3213_v24 = vadd.f32 %v3711_v1, %v3332_v62  ;;  %v3204_v58 = vpop.f32.mrb[71].mxu0 }
 0xbf9   :  { %3252 = vst [vmem:[#allocation3 + $0x20] sm:$0xff] %v3202_v39  ;;  %v3205_v29 = vadd.f32 %v3332_v62, %v3204_v58 }
 0xbfa   :  { %3255 = vst [vmem:[#allocation3 + $0x38] sm:$0xff] %v3213_v24 }
 0xbfb   :  { %3253 = vst [vmem:[#allocation3 + $0x28] sm:$0xff] %v3205_v29 }
 0xc0d   :  { %v3714_v4 = vpop.f32.mrb[72].mxu0 }
 0xc0e   :  { %v3226_v2 = vadd.f32 %v3714_v4, %v3332_v62  ;;  %v3217_v40 = vpop.f32.mrb[73].mxu0 }
 0xc0f   :  { %v3218_v42 = vadd.f32 %v3332_v62, %v3217_v40  ;;  %v3715_v28 = vpop.f32.mrb[74].mxu0 }
 0xc10   :  { %3258 = vst [vmem:[#allocation3 + $0x50] sm:$0xff] %v3226_v2  ;;  %v3229_v13 = vadd.f32 %v3715_v28, %v3332_v62  ;;  %v3220_v47 = vpop.f32.mrb[75].mxu0 }
 0xc11   :  { %3256 = vst [vmem:[#allocation3 + $0x40] sm:$0xff] %v3218_v42  ;;  %v3221_v63 = vadd.f32 %v3332_v62, %v3220_v47 }
 0xc12   :  { %3259 = vst [vmem:[#allocation3 + $0x58] sm:$0xff] %v3229_v13  ;;  %v3718_v57 = vpop.f32.mrb[64].mxu1 }
 0xc13   :  { %3257 = vst [vmem:[#allocation3 + $0x48] sm:$0xff] %v3221_v63  ;;  %v3242_v22 = vadd.f32 %v3718_v57, %v3332_v62  ;;  %v3233_v8 = vpop.f32.mrb[65].mxu1 }
 0xc14   :  { %v3234_v38 = vadd.f32 %v3332_v62, %v3233_v8  ;;  %v3719_v19 = vpop.f32.mrb[66].mxu1 }
 0xc15   :  { %3262 = vst [vmem:[#allocation3 + $0x70] sm:$0xff] %v3242_v22  ;;  %v3245_v50 = vadd.f32 %v3719_v19, %v3332_v62  ;;  %v3236_v20 = vpop.f32.mrb[67].mxu1 }
 0xc16   :  { %3260 = vst [vmem:[#allocation3 + $0x60] sm:$0xff] %v3234_v38  ;;  %v3237_v43 = vadd.f32 %v3332_v62, %v3236_v20 }
 0xc17   :  { %3263 = vst [vmem:[#allocation3 + $0x78] sm:$0xff] %v3245_v50 }
 0xc18   :  { %3261 = vst [vmem:[#allocation3 + $0x68] sm:$0xff] %v3237_v43 }
 0xc19   :  { %4184 = shalt.err (!%p4181_p4)
}
 0xc1a   :  { %s4185_s26 = scalar_lea.hbm %s6013_s8, 2048 }
 0xc1b   :  { %p4186_p5 = scmp.ne.s32.totalorder %s6013_s8, %s4185_s26  ;;  %p4189_p6 = scmp.lt.u32.totalorder %s4185_s26, %s6013_s8 }
 0xc1d   :  { %p4191_p7 = pnand %p4189_p6, %p4186_p5 }
 0xc1f   :  { %4194 = shalt.err (!%p4191_p7)
}
 0xc20   :  { %s4209_s10 = smov 128   ;;  %s4210_s11 = smov 8  }
 0xc21   :  { %3275 = dma.vmem_to_hbm [thread:$0]  %s3270_s22, 2048, %s6013_s8, [#allocation4], %s4209_s10, %s4209_s10, %s4210_s11  }
 0xc22   :  { %4195 = dma.done.wait [#allocation4], 2048  }
 0xc23   :  { %4196 = vsyncadd [#allocation4], 4294965248 }
 0xc24   :  { %3279 = vsyncpa [#allocation4], 1 }

</bundles_post_ra>
